<compile_context>
chip_gen: v7x
topology: tpu7x:2x2x1
jax: 0.10.0
libtpu: 0.0.40
codegen_flags: <defaults>
</compile_context>

<pallas_src>
import functools

import jax
import jax.numpy as jnp
from jax.experimental import pallas as pl
from jax.experimental.pallas import tpu as pltpu

MAX_WORD_LENGTH = 21
KERNEL_SIZE = 5
VOCAB_LANE_PAD = 128   # pad the char vocab so each one-hot tap is a 128-lane (vreg-aligned) segment


def _round_up(x, m):
    return ((x + m - 1) // m) * m


def _char_cnn_kernel(ids_ref, wbig_ref, bconv_ref, whw_ref, bhw_ref, out_ref,
                     *, tm, l_out, vp, k, e):
    """One tile of `tm` words.

    ids_ref  : (tm*l_out, k)  int32  im2col'd char ids (row = one conv window)
    wbig_ref : (k*vp, e)      bf16   fused  emb_table @ wconv  per tap, stacked
    bconv_ref: (1, e)         f32    conv bias
    whw_ref  : (e, 2e)        bf16   packed highway weights [W_proj | W_gate]
    bhw_ref  : (1, 2e)        f32    packed highway biases
    out_ref  : (tm, e)        f32    word embeddings
    """
    r = tm * l_out
    cdt = wbig_ref.dtype                       # MXU compute dtype (bf16)

    ids = ids_ref[...]                                              # (R, K) int32
    lane = jax.lax.broadcasted_iota(jnp.int32, (r, vp), 1)          # 0..vp-1 along lanes

    # Multi-hot mask: segment j (exactly 128 lanes) is one_hot(ids[:, j], vp),
    # so the lane-concat below is pure vreg placement (no relayout).
    taps = [(ids[:, j:j + 1] == lane).astype(cdt) for j in range(k)]
    mask = jnp.concatenate(taps, axis=-1)                           # (R, K*Vp)

    # Fused Embedding + Conv1d: a single MXU matmul, f32 accumulation.
    conv = jnp.dot(mask, wbig_ref[...], preferred_element_type=jnp.float32)
    conv = jnp.maximum(conv + bconv_ref[...], 0.0)                  # bias + ReLU (f32, VPU)

    # MaxPool1d over the l_out window positions of each word.
    h = jnp.max(conv.reshape(tm, l_out, e), axis=1)                 # (tm, e) f32

    # Highway: one packed matmul, then split into proj / gate halves.
    hw = jnp.dot(h.astype(cdt), whw_ref[...],
                 preferred_element_type=jnp.float32) + bhw_ref[...]  # (tm, 2e) f32
    proj = jnp.maximum(hw[:, :e], 0.0)
    gate = jax.nn.sigmoid(hw[:, e:])
    out = gate * proj + (1.0 - gate) * h

    # TODO(synk): nn.Dropout(p=0.3) omitted -- eval-mode (identity) semantics.
    out_ref[...] = out.astype(out_ref.dtype)


def char_cnn_words(ids, params, *, tile_words=256, compute_dtype=jnp.bfloat16):
    """ids: (W, max_word_len) int32 char ids -> (W, E) f32 word embeddings."""
    W, L = ids.shape
    V, E = params["emb_table"].shape
    K = params["wconv"].shape[0]
    L_out = L - K + 1
    Vp = _round_up(V, VOCAB_LANE_PAD)

    # ---- tile / grid selection ------------------------------------------
    # Big tiles amortize the ~0.35us per-grid-step overhead; clamp so the grid
    # has >= 2 steps when possible (v7x: 2 TensorCores share the grid).
    half = max(1, (W + 1) // 2)
    tm = max(8, min(_round_up(tile_words, 8), _round_up(half, 8)))
    Wp = _round_up(W, tm)
    grid = (Wp // tm,)

    # ---- fold / pack weights (tiny, done in the XLA wrapper) -------------
    emb_pad = jnp.zeros((Vp, E), jnp.float32).at[:V].set(params["emb_table"])
    # W_big[j*Vp + v, e] = sum_c emb[v, c] * wconv[j, c, e]
    wbig = jnp.einsum("vc,jce->jve", emb_pad, params["wconv"])
    wbig = wbig.reshape(K * Vp, E).astype(compute_dtype)
    whw = jnp.concatenate([params["wproj"], params["wgate"]], axis=1).astype(compute_dtype)
    bconv = params["bconv"].astype(jnp.float32)
    bhw = jnp.concatenate([params["bproj"], params["bgate"]], axis=1).astype(jnp.float32)

    # ---- int32 im2col of the char ids (cheap: ~340 B/word instead of the
    #      old (W, L, E) f32 char-embedding round trip through HBM) --------
    ids_p = jnp.pad(ids.astype(jnp.int32), ((0, Wp - W), (0, 0)))            # pad words with id 0
    ids_col = jnp.stack([ids_p[:, j:j + L_out] for j in range(K)], axis=-1)  # (Wp, L_out, K)
    ids_col = ids_col.reshape(Wp * L_out, K)

    kernel = functools.partial(_char_cnn_kernel, tm=tm, l_out=L_out, vp=Vp, k=K, e=E)
    # Constant index maps -> Pallas keeps these small weights VMEM-resident and
    # does not re-issue their DMAs on every grid step.
    const = lambda shape: pl.BlockSpec(shape, lambda i: tuple(0 for _ in shape))

    out = pl.pallas_call(
        kernel,
        out_shape=jax.ShapeDtypeStruct((Wp, E), jnp.float32),
        grid_spec=pltpu.PrefetchScalarGridSpec(
            num_scalar_prefetch=0,
            grid=grid,
            in_specs=[
                pl.BlockSpec((tm * L_out, K), lambda i: (i, 0)),   # ids im2col tile
                const((K * Vp, E)),                                # fused emb@conv weight
                const((1, E)),                                     # conv bias
                const((E, 2 * E)),                                 # packed highway weight
                const((1, 2 * E)),                                 # packed highway bias
            ],
            out_specs=pl.BlockSpec((tm, E), lambda i: (i, 0)),
        ),
        compiler_params=pltpu.CompilerParams(
            dimension_semantics=("parallel",),
            vmem_limit_bytes=64 * 1024 * 1024,
        ),
    )(ids_col, wbig, bconv, whw, bhw)
    return out[:W]


def model_embeddings_forward(input_tensor, params, *, tile_words=256,
                             compute_dtype=jnp.bfloat16):
    """input_tensor: (S, B, max_word_len) int -> (S, B, E) f32."""
    S, B, L = input_tensor.shape
    E = params["emb_table"].shape[1]
    # Every word is processed independently, so flatten (S, B) directly: the
    # kernel output reshapes straight back to (S, B, E) -- the PyTorch permutes
    # are layout plumbing only, so no transpose / extra HBM pass is needed.
    ids = input_tensor.reshape(S * B, L)
    word_emb = char_cnn_words(ids, params, tile_words=tile_words,
                              compute_dtype=compute_dtype)            # (S*B, E)
    return word_emb.reshape(S, B, E)


def init_params(key, vocab_size, embed_size):
    k = jax.random.split(key, 7)
    E, K = embed_size, KERNEL_SIZE
    emb_table = 0.1 * jax.random.normal(k[0], (vocab_size, E), jnp.float32)
    emb_table = emb_table.at[0].set(0.0)          # padding_idx=0
    return {
        "emb_table": emb_table,
        # wconv[j, c_in, c_out]  (== torch Conv1d weight[c_out, c_in, j])
        "wconv": 0.1 * jax.random.normal(k[1], (K, E, E), jnp.float32),
        "bconv": 0.1 * jax.random.normal(k[2], (1, E), jnp.float32),
        # Linear weights pre-transposed so forward does h @ W
        "wproj": 0.1 * jax.random.normal(k[3], (E, E), jnp.float32),
        "bproj": 0.1 * jax.random.normal(k[4], (1, E), jnp.float32),
        "wgate": 0.1 * jax.random.normal(k[5], (E, E), jnp.float32),
        "bgate": 0.1 * jax.random.normal(k[6], (1, E), jnp.float32),
    }


def _reference_forward(input_tensor, params):
    """Pure-JAX f32 reference mirroring the PyTorch forward (eval mode)."""
    S, B, L = input_tensor.shape
    E = params["emb_table"].shape[1]
    K = params["wconv"].shape[0]
    L_out = L - K + 1
    ids = input_tensor.reshape(S * B, L)
    x = jnp.take(params["emb_table"], ids, axis=0)                   # (W, L, E)
    conv = jnp.zeros((S * B, L_out, E), jnp.float32) + params["bconv"][None]
    for j in range(K):
        conv = conv + jnp.einsum("wle,eo->wlo", x[:, j:j + L_out, :],
                                 params["wconv"][j])
    h = jnp.max(jax.nn.relu(conv), axis=1)
    proj = jax.nn.relu(h @ params["wproj"] + params["bproj"])
    gate = jax.nn.sigmoid(h @ params["wgate"] + params["bgate"])
    out = gate * proj + (1.0 - gate) * h
    return out.reshape(S, B, E)


if __name__ == "__main__":
    key = jax.random.PRNGKey(0)
    kp, ki = jax.random.split(key)

    embed_size = 32
    vocab_size = 30          # char vocab
    sent_len, batch = 7, 6   # W = 42 words -> exercises padding and a 2-step grid

    params = init_params(kp, vocab_size, embed_size)
    input_tensor = jax.random.randint(
        ki, (sent_len, batch, MAX_WORD_LENGTH), 0, vocab_size, dtype=jnp.int32)

    out = model_embeddings_forward(input_tensor, params)
    out = jax.block_until_ready(out)
    assert out.shape == (sent_len, batch, embed_size), out.shape

    ref = jax.block_until_ready(_reference_forward(input_tensor, params))
    err = float(jnp.max(jnp.abs(out - ref)))
    # bf16 MXU operands with f32 accumulation -> ~1e-3 level deviation expected.
    assert jnp.allclose(out, ref, atol=2e-2, rtol=2e-2), err

    print("KERNEL_OK")
</pallas_src>

<mosaic_0001>
module attributes {stable_mosaic.version = 11 : i64} {
  func.func @_char_cnn_kernel(%arg0: i32, %arg1: memref<408x5xi32, #tpu.memory_space<vmem>>, %arg2: memref<640x32xbf16, #tpu.memory_space<vmem>>, %arg3: memref<1x32xf32, #tpu.memory_space<vmem>>, %arg4: memref<32x64xbf16, #tpu.memory_space<vmem>>, %arg5: memref<1x64xf32, #tpu.memory_space<vmem>>, %arg6: memref<24x32xf32, #tpu.memory_space<vmem>>) attributes {dimension_semantics = [#tpu.dimension_semantics<parallel>], iteration_bounds = array<i64: 2>, scalar_prefetch = 0 : i64, scratch_operands = 0 : i64, tpu.core_type = #tpu.core_type<tc>, window_params = [{transform_indices = @transform_0, window_bounds = array<i64: 408, 5>}, {pipeline_mode = #tpu.pipeline_mode<synchronous>, transform_indices = @transform_1, window_bounds = array<i64: 640, 32>}, {pipeline_mode = #tpu.pipeline_mode<synchronous>, transform_indices = @transform_2, window_bounds = array<i64: 1, 32>}, {pipeline_mode = #tpu.pipeline_mode<synchronous>, transform_indices = @transform_3, window_bounds = array<i64: 32, 64>}, {pipeline_mode = #tpu.pipeline_mode<synchronous>, transform_indices = @transform_4, window_bounds = array<i64: 1, 64>}, {transform_indices = @transform_5, window_bounds = array<i64: 24, 32>}]} {
    %c0 = arith.constant 0 : index
    %c0_0 = arith.constant 0 : index
    %0 = vector.load %arg1[%c0, %c0_0] : memref<408x5xi32, #tpu.memory_space<vmem>>, vector<408x5xi32>
    %1 = tpu.iota {dimensions = array<i32: 1>} : vector<408x128xi32>
    %2 = vector.extract_strided_slice %0 {offsets = [0, 0], sizes = [408, 1], strides = [1, 1]} : vector<408x5xi32> to vector<408x1xi32>
    %3 = vector.broadcast %2 : vector<408x1xi32> to vector<408x128xi32>
    %4 = arith.cmpi eq, %3, %1 : vector<408x128xi32>
    %5 = arith.extui %4 : vector<408x128xi1> to vector<408x128xi32>
    %6 = arith.sitofp %5 : vector<408x128xi32> to vector<408x128xf32>
    %7 = arith.truncf %6 : vector<408x128xf32> to vector<408x128xbf16>
    %8 = vector.extract_strided_slice %0 {offsets = [0, 1], sizes = [408, 1], strides = [1, 1]} : vector<408x5xi32> to vector<408x1xi32>
    %9 = vector.broadcast %8 : vector<408x1xi32> to vector<408x128xi32>
    %10 = arith.cmpi eq, %9, %1 : vector<408x128xi32>
    %11 = arith.extui %10 : vector<408x128xi1> to vector<408x128xi32>
    %12 = arith.sitofp %11 : vector<408x128xi32> to vector<408x128xf32>
    %13 = arith.truncf %12 : vector<408x128xf32> to vector<408x128xbf16>
    %14 = vector.extract_strided_slice %0 {offsets = [0, 2], sizes = [408, 1], strides = [1, 1]} : vector<408x5xi32> to vector<408x1xi32>
    %15 = vector.broadcast %14 : vector<408x1xi32> to vector<408x128xi32>
    %16 = arith.cmpi eq, %15, %1 : vector<408x128xi32>
    %17 = arith.extui %16 : vector<408x128xi1> to vector<408x128xi32>
    %18 = arith.sitofp %17 : vector<408x128xi32> to vector<408x128xf32>
    %19 = arith.truncf %18 : vector<408x128xf32> to vector<408x128xbf16>
    %20 = vector.extract_strided_slice %0 {offsets = [0, 3], sizes = [408, 1], strides = [1, 1]} : vector<408x5xi32> to vector<408x1xi32>
    %21 = vector.broadcast %20 : vector<408x1xi32> to vector<408x128xi32>
    %22 = arith.cmpi eq, %21, %1 : vector<408x128xi32>
    %23 = arith.extui %22 : vector<408x128xi1> to vector<408x128xi32>
    %24 = arith.sitofp %23 : vector<408x128xi32> to vector<408x128xf32>
    %25 = arith.truncf %24 : vector<408x128xf32> to vector<408x128xbf16>
    %26 = vector.extract_strided_slice %0 {offsets = [0, 4], sizes = [408, 1], strides = [1, 1]} : vector<408x5xi32> to vector<408x1xi32>
    %27 = vector.broadcast %26 : vector<408x1xi32> to vector<408x128xi32>
    %28 = arith.cmpi eq, %27, %1 : vector<408x128xi32>
    %29 = arith.extui %28 : vector<408x128xi1> to vector<408x128xi32>
    %30 = arith.sitofp %29 : vector<408x128xi32> to vector<408x128xf32>
    %31 = arith.truncf %30 : vector<408x128xf32> to vector<408x128xbf16>
    %32 = tpu.concatenate %7, %13, %19, %25, %31 in 1 : vector<408x128xbf16>, vector<408x128xbf16>, vector<408x128xbf16>, vector<408x128xbf16>, vector<408x128xbf16> -> vector<408x640xbf16>
    %c0_1 = arith.constant 0 : index
    %c0_2 = arith.constant 0 : index
    %33 = vector.load %arg2[%c0_1, %c0_2] : memref<640x32xbf16, #tpu.memory_space<vmem>>, vector<640x32xbf16>
    %cst = arith.constant dense<0.000000e+00> : vector<408x32xf32>
    %34 = tpu.matmul %32, %33, %cst {dimension_numbers = #tpu.dot_dimension_numbers<[1], [0], [0], [1], [0, 0, 1, 1], [], []>} : vector<408x640xbf16>, vector<640x32xbf16>, vector<408x32xf32> -> vector<408x32xf32>
    %c0_3 = arith.constant 0 : index
    %c0_4 = arith.constant 0 : index
    %35 = vector.load %arg3[%c0_3, %c0_4] : memref<1x32xf32, #tpu.memory_space<vmem>>, vector<1x32xf32>
    %36 = vector.broadcast %35 : vector<1x32xf32> to vector<408x32xf32>
    %37 = arith.addf %34, %36 : vector<408x32xf32>
    %cst_5 = arith.constant 0.000000e+00 : f32
    %38 = vector.broadcast %cst_5 : f32 to vector<408x32xf32>
    %39 = arith.maximumf %37, %38 : vector<408x32xf32>
    %40 = vector.shape_cast %39 : vector<408x32xf32> to vector<24x17x32xf32>
    %cst_6 = arith.constant dense<0xFF800000> : vector<24x32xf32>
    %41 = vector.multi_reduction <maximumf>, %40, %cst_6 [1] : vector<24x17x32xf32> to vector<24x32xf32>
    %42 = arith.truncf %41 : vector<24x32xf32> to vector<24x32xbf16>
    %c0_7 = arith.constant 0 : index
    %c0_8 = arith.constant 0 : index
    %43 = vector.load %arg4[%c0_7, %c0_8] : memref<32x64xbf16, #tpu.memory_space<vmem>>, vector<32x64xbf16>
    %cst_9 = arith.constant dense<0.000000e+00> : vector<24x64xf32>
    %44 = tpu.matmul %42, %43, %cst_9 {dimension_numbers = #tpu.dot_dimension_numbers<[1], [0], [0], [1], [0, 0, 1, 1], [], []>} : vector<24x32xbf16>, vector<32x64xbf16>, vector<24x64xf32> -> vector<24x64xf32>
    %c0_10 = arith.constant 0 : index
    %c0_11 = arith.constant 0 : index
    %45 = vector.load %arg5[%c0_10, %c0_11] : memref<1x64xf32, #tpu.memory_space<vmem>>, vector<1x64xf32>
    %46 = vector.broadcast %45 : vector<1x64xf32> to vector<24x64xf32>
    %47 = arith.addf %44, %46 : vector<24x64xf32>
    %48 = vector.extract_strided_slice %47 {offsets = [0, 0], sizes = [24, 32], strides = [1, 1]} : vector<24x64xf32> to vector<24x32xf32>
    %cst_12 = arith.constant 0.000000e+00 : f32
    %49 = vector.broadcast %cst_12 : f32 to vector<24x32xf32>
    %50 = arith.maximumf %48, %49 : vector<24x32xf32>
    %51 = vector.extract_strided_slice %47 {offsets = [0, 32], sizes = [24, 32], strides = [1, 1]} : vector<24x64xf32> to vector<24x32xf32>
    %52 = arith.negf %51 : vector<24x32xf32>
    %53 = math.exp %52 : vector<24x32xf32>
    %cst_13 = arith.constant 1.000000e+00 : f32
    %54 = vector.broadcast %cst_13 : f32 to vector<24x32xf32>
    %55 = arith.addf %54, %53 : vector<24x32xf32>
    %56 = arith.divf %54, %55 : vector<24x32xf32>
    %57 = arith.mulf %56, %50 : vector<24x32xf32>
    %cst_14 = arith.constant 1.000000e+00 : f32
    %58 = vector.broadcast %cst_14 : f32 to vector<24x32xf32>
    %59 = arith.subf %58, %56 : vector<24x32xf32>
    %60 = arith.mulf %59, %41 : vector<24x32xf32>
    %61 = arith.addf %57, %60 : vector<24x32xf32>
    %c0_15 = arith.constant 0 : index
    %c0_16 = arith.constant 0 : index
    %62 = vector.load %arg6[%c0_15, %c0_16] : memref<24x32xf32, #tpu.memory_space<vmem>>, vector<24x32xf32>
    tpu.vector_store %arg6[%c0_15, %c0_16], %61 {strides = array<i32>} : memref<24x32xf32, #tpu.memory_space<vmem>>, vector<24x32xf32>,
    return
  }
  func.func @transform_0(%arg0: i32) -> (i32, i32) {
    %c0_i32 = arith.constant 0 : i32
    %c0_i32_0 = arith.constant 0 : i32
    return %arg0, %c0_i32 : i32, i32
  }
  func.func @transform_1(%arg0: i32) -> (i32, i32) {
    %c0_i32 = arith.constant 0 : i32
    %c0_i32_0 = arith.constant 0 : i32
    %c0_i32_1 = arith.constant 0 : i32
    return %c0_i32, %c0_i32_0 : i32, i32
  }
  func.func @transform_2(%arg0: i32) -> (i32, i32) {
    %c0_i32 = arith.constant 0 : i32
    %c0_i32_0 = arith.constant 0 : i32
    %c0_i32_1 = arith.constant 0 : i32
    return %c0_i32, %c0_i32_0 : i32, i32
  }
  func.func @transform_3(%arg0: i32) -> (i32, i32) {
    %c0_i32 = arith.constant 0 : i32
    %c0_i32_0 = arith.constant 0 : i32
    %c0_i32_1 = arith.constant 0 : i32
    return %c0_i32, %c0_i32_0 : i32, i32
  }
  func.func @transform_4(%arg0: i32) -> (i32, i32) {
    %c0_i32 = arith.constant 0 : i32
    %c0_i32_0 = arith.constant 0 : i32
    %c0_i32_1 = arith.constant 0 : i32
    return %c0_i32, %c0_i32_0 : i32, i32
  }
  func.func @transform_5(%arg0: i32) -> (i32, i32) {
    %c0_i32 = arith.constant 0 : i32
    %c0_i32_0 = arith.constant 0 : i32
    return %arg0, %c0_i32 : i32, i32
  }
}

</mosaic_0001>

<bundles_post_ra>
// kernel: tpu_custom_call.1
= control target key start
LH: loop header
LB: loop body
LE: loop exit
PB: predicated region body
PF: predicated region fallthrough
CT: control target
= control target key end

     0   :  { %10 = vsyncpa [#allocation3], 0  ;;  %s13908_s0 = inlined_call_operand.hbm [shape: s32[816,5], index: 0, kind: input, shape index: {}]   ;;  %s13909_s1 = inlined_call_operand.hbm [shape: bf16[640,32], index: 1, kind: input, shape index: {}]   ;;  %s13910_s2 = inlined_call_operand.hbm [shape: f32[1,32], index: 2, kind: input, shape index: {}]   ;;  %s13911_s3 = inlined_call_operand.hbm [shape: bf16[32,64], index: 3, kind: input, shape index: {}]   ;;  %s13912_s4 = inlined_call_operand.hbm [shape: f32[1,64], index: 4, kind: input, shape index: {}]   ;;  %s13913_s5 = inlined_call_operand.hbm [shape: f32[48,32], index: 5, kind: output, shape index: {}]  }
   0x1   :  { %12 = vsyncpa [#allocation3 + $0x1], 0 }
   0x2   :  { %13 = vsyncpa [#allocation6], 0 }
   0x3   :  { %14 = vsyncpa [#allocation9], 0 }
   0x4   :  { %15 = vsyncpa [#allocation4], 0 }
   0x5   :  { %17 = vsyncpa [#allocation4 + $0x1], 0  ;;  %s10593_s18 = smov 0   ;;  %s10595_s19 = smov 0  }
   0x6   :  { %s10597_s20 = smov 0   ;;  %s10599_s21 = smov 0  }
   0x7 LB: > { %s10614_s22 = sadd.s32 4294967295, %s10540_s21   ;;  %s9105_s23 = sadd.s32 4294967294, %s10540_s21   ;;  %s10540_s21 = sphi %s10599_s21, %s14099_s21   ;;  %s10536_s20 = sphi %s10597_s20, %s14098_s20   ;;  %s10532_s19 = sphi %s10595_s19, %s14097_s19   ;;  %s10528_s18 = sphi %s10593_s18, %s14096_s18  }
   0x8   : > { %p43_p0 = scmp.ne.s32.totalorder %s10532_s19, %s10528_s18  ;;  %p13914_p1 = scmp.eq.s32.totalorder %s10614_s22, 0 }
   0x9   : > { %p157_p3 = scmp.eq.s32.totalorder %s9105_s23, 1  ;;  %p9106_p5 = scmp.ge.s32.totalorder %s10540_s21, 1 }
   0xa   : > { %p10623_p4 = por %p13914_p1, %p43_p0  ;;  %p164_p7 = scmp.lt.s32.totalorder %s10540_s21, 3 }
   0xb   : > { %p10628_p6 = por %p157_p3, %p43_p0  ;;  %s10542_s27 = smov [#allocation5]  }
   0xc   : > { %s13943_s24 = scalar_select %p10623_p4, 1, 0 }
   0xd   : > { %s13944_s25 = scalar_select %p10628_p6, 1, 0 }
   0xe   : > { %p10633_p8 = pnand %p9106_p5, %p164_p7  ;;  %s176_s28 = sshll.u32 %s10542_s27, 4  ;;  %s10637_s28 = int_to_ptr.vmem [resolvable:$true] %s176_s28 }
   0xf   : > { %s10543_s30 = smov [#allocation8]   ;;  %s10544_s7 = smov [#allocation7]  }
  0x10   : > { %s13945_s26 = scalar_select %p10633_p8, 1, 0 }
  0x11   : > { %p10018_p9 = pneg %p10633_p8  ;;  %s200_s6 = sshll.u32 %s10543_s30, 4  ;;  %s10648_s6 = int_to_ptr.vmem [resolvable:$true] %s200_s6 }
  0x12   : > { %s10650_s8 = sshll.u32 %s10544_s7, 4  ;;  %s10324_s11 = scalar_lea.hbm %s13909_s1, 5120  ;;  %s191_s8 = int_to_ptr.vmem [resolvable:$true] %s10650_s8 }
  0x13   : > { %p10644_p11 = pnand %p10018_p9, %p13914_p1  ;;  %p10325_p12 = scmp.ne.s32.totalorder %s13909_s1, %s10324_s11 }
  0x14   : > { %p10331_p5 = scmp.lt.u32.totalorder %s10324_s11, %s13909_s1 }
  0x15   : > { %p10660_p13 = pneg %p10644_p11 }
  0x17   : > { %p10327_p0 = pnand %p10660_p13, %p10325_p12 }
  0x19   : > { %p10328_p3 = pneg %p10327_p0 }
  0x1b   : > { %p10333_p7 = pnand %p10331_p5, %p10328_p3 }
  0x1d   : > { %10336 = shalt.err (!%p10333_p7)
}
  0x1e   : > { %s10337_s17 = scalar_lea.vmem %s10637_s28, 5120  ;;  %p10345_p2 = scmp.lt.s32.totalorder %s10637_s28, %s10637_s28 }
  0x1f   : > { %p10338_p9 = scmp.ne.s32.totalorder %s10637_s28, %s10337_s17  ;;  %p10346_p6 = scmp.lt.s32.totalorder %s10337_s17, %s10337_s17 }
  0x21   : > { %p10340_p10 = pnand %p10338_p9, %p10660_p13  ;;  %p10347_p12 = por %p10346_p6, %p10345_p2 }
  0x23   : > { %p10341_p1 = pneg %p10340_p10 }
  0x25   : > { %p10348_p0 = pnand %p10347_p12, %p10341_p1 }
  0x27   : > { %10351 = shalt.err (!%p10348_p0)
}
  0x28   : > { %s10545_s23 = smov 64   ;;  %s10546_s27 = smov 4  }
  0x29   : > { %10021 = dma.hbm_to_vmem [thread:$0]  (!%p10644_p11), %s13909_s1, 5120, %s10637_s28, [#allocation6], %s10545_s23, %s10545_s23, %s10546_s27  }
  0x2a   : > { %s10352_s11 = scalar_lea.hbm %s13911_s3, 256 }
  0x2b   : > { %p10353_p2 = scmp.ne.s32.totalorder %s13911_s3, %s10352_s11  ;;  %p10359_p10 = scmp.lt.u32.totalorder %s10352_s11, %s13911_s3 }
  0x2d   : > { %p10355_p1 = pnand %p10353_p2, %p10660_p13 }
  0x2f   : > { %p10356_p6 = pneg %p10355_p1 }
  0x31   : > { %p10361_p3 = pnand %p10359_p10, %p10356_p6 }
  0x33   : > { %10364 = shalt.err (!%p10361_p3)
}
  0x34   : > { %s10365_s28 = scalar_lea.vmem %s10648_s6, 256  ;;  %p10373_p12 = scmp.lt.s32.totalorder %s10648_s6, %s10648_s6 }
  0x35   : > { %p10366_p5 = scmp.ne.s32.totalorder %s10648_s6, %s10365_s28  ;;  %p10374_p0 = scmp.lt.s32.totalorder %s10365_s28, %s10365_s28 }
  0x37   : > { %p10368_p7 = pnand %p10366_p5, %p10660_p13  ;;  %p10375_p2 = por %p10374_p0, %p10373_p12 }
  0x39   : > { %p10369_p9 = pneg %p10368_p7 }
  0x3b   : > { %p10376_p1 = pnand %p10375_p2, %p10369_p9 }
  0x3d   : > { %10379 = shalt.err (!%p10376_p1)
}
  0x3e   : > { %10027 = dma.hbm_to_vmem [thread:$0]  (!%p10644_p11), %s13911_s3, 256, %s10648_s6, [#allocation9], %s10545_s23, %s10545_s23, %s10546_s27  }
  0x3f   : > { %s10380_s10 = scalar_lea.hbm %s13910_s2, 16 }
  0x40   : > { %p10381_p6 = scmp.ne.s32.totalorder %s13910_s2, %s10380_s10  ;;  %p10387_p5 = scmp.lt.u32.totalorder %s10380_s10, %s13910_s2 }
  0x42   : > { %p10383_p10 = pnand %p10381_p6, %p10660_p13 }
  0x44   : > { %p10384_p3 = pneg %p10383_p10 }
  0x46   : > { %p10389_p7 = pnand %p10387_p5, %p10384_p3 }
  0x48   : > { %10392 = shalt.err (!%p10389_p7)
}
  0x49   : > { %s10393_s16 = scalar_lea.vmem %s191_s8, 16  ;;  %s10400_s6 = scalar_lea.vmem %s191_s8, 32 }
  0x4a   : > { %p10394_p9 = scmp.ne.s32.totalorder %s191_s8, %s10393_s16  ;;  %p10401_p2 = scmp.lt.s32.totalorder %s191_s8, %s191_s8 }
  0x4b   : > { %p10402_p1 = scmp.lt.s32.totalorder %s10400_s6, %s10393_s16 }
  0x4c   : > { %p10396_p12 = pnand %p10394_p9, %p10660_p13 }
  0x4d   : > { %p10403_p4 = por %p10402_p1, %p10401_p2 }
  0x4e   : > { %p10397_p0 = pneg %p10396_p12 }
  0x50   : > { %p10404_p8 = pnand %p10403_p4, %p10397_p0 }
  0x52   : > { %10407 = shalt.err (!%p10404_p8)
}
  0x53   : > { %10024 = dma.hbm_to_vmem [thread:$0]  (!%p10644_p11), %s13910_s2, 16, %s191_s8, [#allocation6]  }
  0x54   : > { %s10547_s28 = smov [#allocation10]   ;;  %s10408_s9 = scalar_lea.hbm %s13912_s4, 16 }
  0x55   : > { %s214_s17 = sshll.u32 %s10547_s28, 4  ;;  %p10409_p6 = scmp.ne.s32.totalorder %s13912_s4, %s10408_s9  ;;  %s215_s17 = int_to_ptr.vmem [resolvable:$true] %s214_s17 }
  0x56   : > { %p10415_p10 = scmp.lt.u32.totalorder %s10408_s9, %s13912_s4 }
  0x57   : > { %p10411_p4 = pnand %p10409_p6, %p10660_p13 }
  0x59   : > { %p10412_p8 = pneg %p10411_p4 }
  0x5b   : > { %p10417_p3 = pnand %p10415_p10, %p10412_p8 }
  0x5d   : > { %10420 = shalt.err (!%p10417_p3)
}
  0x5e   : > { %s10421_s8 = scalar_lea.vmem %s215_s17, 16  ;;  %s10428_s15 = scalar_lea.vmem %s215_s17, 32 }
  0x5f   : > { %p10422_p5 = scmp.ne.s32.totalorder %s215_s17, %s10421_s8  ;;  %p10429_p12 = scmp.lt.s32.totalorder %s215_s17, %s215_s17 }
  0x60   : > { %p10430_p0 = scmp.lt.s32.totalorder %s10428_s15, %s10421_s8 }
  0x61   : > { %p10424_p7 = pnand %p10422_p5, %p10660_p13 }
  0x62   : > { %p10431_p2 = por %p10430_p0, %p10429_p12 }
  0x63   : > { %p10425_p9 = pneg %p10424_p7 }
  0x65   : > { %p10432_p1 = pnand %p10431_p2, %p10425_p9 }
  0x67   : > { %10435 = shalt.err (!%p10432_p1)
}
  0x68   : > { %10030 = dma.hbm_to_vmem [thread:$0]  (!%p10644_p11), %s13912_s4, 16, %s215_s17, [#allocation9]  }
  0x69   : > { %s10742_s14 = sadd.s32 1, %s10540_s21   ;;  %s30_s23 = sadd.s32 1, %s10536_s20 }
  0x6a   : > { %s27_s29 = ssub.s32 %s10540_s21, %s10742_s14  ;;  %p37_p13 = scmp.ne.s32.totalorder %s10536_s20, %s10532_s19 }
  0x6b   : > { %p28_p6 = scmp.eq.s32.totalorder %s27_s29, 0  ;;  %p38_p4 = scmp.eq.s32.totalorder %s10540_s21, 0 }
  0x6c   : > { %p13948_p8 = scmp.eq.s32.totalorder %s10614_s22, 1  ;;  %p10043_p3 = scmp.lt.s32.totalorder %s10540_s21, 2 }
  0x6d   : > { %s10758_s28 = scalar_select %p28_p6, %s10536_s20, %s30_s23  }
  0x6e   : > { %p10752_p10 = por %p13948_p8, %p37_p13  ;;  %p39_p5 = por %p38_p4, %p37_p13 }
  0x6f   : > { %s225_s30 = sand.u32 1, %s10536_s20   ;;  %s9733_s17 = smul.u32 6528, %s10540_s21 }
  0x70   : > { %s9995_s7 = smul.u32 408, %s225_s30  ;;  %p10762_p11 = pnand %p10043_p3, %p39_p5 }
  0x71   : > { %s10769_s12 = scalar_lea.hbm %s13908_s0, %s9733_s17  ;;  %s10773_s15 = scalar_lea.sflag [#allocation3], %s225_s30 }
  0x72   : > { %s229_s13 = scalar_lea.vmem [#allocation2], %s9995_s7  ;;  %s10436_s16 = scalar_lea.hbm %s10769_s12, 6528 }
  0x73   : > { %s236_s8 = sshll.u32 %s229_s13, 4  ;;  %p10437_p7 = scmp.ne.s32.totalorder %s10769_s12, %s10436_s16  ;;  %s10771_s8 = int_to_ptr.vmem [resolvable:$true] %s236_s8 }
  0x74   : > { %p10438_p9 = pneg %p10762_p11  ;;  %s10441_s29 = scalar_lea.hbm %s13908_s0, 13056 }
  0x75   : > { %p10442_p2 = scmp.lt.u32.totalorder %s10769_s12, %s13908_s0  ;;  %p10443_p1 = scmp.lt.u32.totalorder %s10441_s29, %s10436_s16 }
  0x76   : > { %p10439_p12 = pnand %p10438_p9, %p10437_p7  ;;  %p10445_p6 = scmp.lt.u32.totalorder %s10436_s16, %s10769_s12 }
  0x77   : > { %p10444_p13 = por %p10443_p1, %p10442_p2 }
  0x78   : > { %p10440_p0 = pneg %p10439_p12 }
  0x79   : > { %p10446_p4 = por %p10445_p6, %p10444_p13 }
  0x7b   : > { %p10447_p8 = pnand %p10446_p4, %p10440_p0 }
  0x7d   : > { %10450 = shalt.err (!%p10447_p8)
}
  0x7e   : > { %s10451_s30 = scalar_lea.vmem %s10771_s8, 6528  ;;  %s10548_s7 = smov [#allocation2]  }
  0x7f   : > { %p10452_p3 = scmp.ne.s32.totalorder %s10771_s8, %s10451_s30  ;;  %s10456_s11 = sshll.u32 %s10548_s7, 4  ;;  %s10457_s11 = int_to_ptr.vmem [resolvable:$false] %s10456_s11 }
  0x80   : > { %s10458_s13 = scalar_lea.vmem %s10457_s11, 13056  ;;  %p10459_p12 = scmp.lt.s32.totalorder %s10771_s8, %s10457_s11 }
  0x81   : > { %p10454_p5 = pnand %p10452_p3, %p10438_p9  ;;  %p10460_p2 = scmp.lt.s32.totalorder %s10458_s13, %s10451_s30 }
  0x83   : > { %p10455_p7 = pneg %p10454_p5  ;;  %p10461_p1 = por %p10460_p2, %p10459_p12 }
  0x85   : > { %p10462_p13 = pnand %p10461_p1, %p10455_p7 }
  0x87   : > { %10465 = shalt.err (!%p10462_p13)
}
  0x88   : > { %s10549_s16 = smov 128   ;;  %s10550_s6 = smov 8  }
  0x89   : > { %10034 = dma.hbm_to_vmem [thread:$0]  (!%p10762_p11), %s10769_s12, 6528, %s10771_s8, %s10773_s15, %s10549_s16, %s10549_s16, %s10550_s6  }
  0x8a   : > { %p13951_p9 = scmp.ne.s32.totalorder %s13945_s26, 0 }
  0x8c   : > { %248 = sbr.rel (%p13951_p9) target bundleno = 1964 (0x7ac), region = 40 }
  0x93   : > { %s10804_s23 = sand.u32 1, %s10532_s19   ;;  %p13952_p0 = scmp.ne.s32.totalorder %s13943_s24, 0 }
  0x94   : > { %s9996_s29 = smul.u32 408, %s10804_s23  ;;  %s251_s17 = scalar_lea.sflag [#allocation3], %s10804_s23 }
  0x96   : > { %s10808_s10 = scalar_lea.vmem [#allocation2], %s9996_s29 }
  0x97   : > { %10511 = dma.done.wait (%p13952_p0), %s251_s17, 6528  }
  0x98   : > { %10513 = vsyncadd (%p13952_p0), %s251_s17, 4294960768  ;;  %p13953_p11 = scmp.eq.s32.totalorder %s10614_s22, 0 }
  0x9a   : > { %10515 = dma.done.wait (%p13953_p11), [#allocation6], 5136   ;;  %p13954_p6 = pmov %p13953_p11 }
  0x9c   : > { %10517 = vsyncadd (%p13954_p6), [#allocation6], 4294962160  ;;  %p13955_p4 = pmov %p13954_p6 }
  0x9e   : > { %10519 = dma.done.wait (%p13955_p4), [#allocation9], 272   ;;  %p13956_p8 = pmov %p13955_p4 }
  0x9f   : > { %v13917_v0 = vmov 0   ;;  %v10827_v1 = vld [vmem:[%s10808_s10 + $0x10] sm:$0xff]  ;;  %v10830_v2 = vld [vmem:[%s10808_s10] sm:$0xff]  ;;  %v10835_v3 = vld [vmem:[%s10808_s10 + $0x18] sm:$0xff]  ;;  %v13919_v24 = vmov 3   ;;  %v13921_v38 = vmov 1  }
  0xa0   : > { %10521 = vsyncadd (%p13956_p8), [#allocation9], 4294967024  ;;  %10101 = vset.pattern.permute.xlu1 %v13917_v0  ;;  %10100 = vset.pattern.permute.xlu0 %v13917_v0  ;;  %v10838_v4 = vld [vmem:[%s10808_s10 + $0x8] sm:$0xff]  ;;  %v10846_v6 = vld [vmem:[%s10808_s10 + $0x20] sm:$0xff]  ;;  %v13923_v50 = vmov 2   ;;  %s10558_s24 = smov 32  }
  0xa1   : > { %9849 = vmatprep.subr.bf16.mxu1 %v13917_v0  ;;  %2340 = vmatprep.subr.bf16.mxu0 %v13917_v0  ;;  %v10843_v5 = vld [vmem:[%s10808_s10 + $0x28] sm:$0xff]  ;;  %v10851_v7 = vld [vmem:[%s10808_s10 + $0x38] sm:$0xff]  ;;  %v10854_v8 = vld [vmem:[%s10808_s10 + $0x30] sm:$0xff]  ;;  %s10559_s26 = smov 96   ;;  %s9997_s9 = smul.u32 24, %s10804_s23 }
  0xa2   : > { %360 = vperm.xlu1 %10101, %v10827_v1   ;;  %354 = vperm.xlu0 %10100, %v10830_v2   ;;  %v10857_v9 = vld [vmem:[%s10808_s10 + $0x48] sm:$0xff]  ;;  %v10861_v10 = vld [vmem:[#allocation5 + $0x80] sm:$0xff]   ;;  %v10864_v11 = vld [vmem:[%s10808_s10 + $0x40] sm:$0xff]  ;;  %s9734_s15 = smul.u32 384, %s10614_s22  ;;  %s8981_s22 = scalar_lea.sflag [#allocation4], %s10804_s23 }
  0xa3   : > { %9865 = vmatpush1.bf16.msra.mxu1 %v10861_v10  ;;  %v10868_v12 = vld [vmem:[%s10808_s10 + $0x58] sm:$0xff]  ;;  %v10871_v13 = vld [vmem:[%s10808_s10 + $0x50] sm:$0xff]  ;;  %v10880_v15 = vld [vmem:[%s10808_s10 + $0x68] sm:$0xff]  ;;  %s296_s12 = scalar_lea.vmem [#allocation11], %s9997_s9  ;;  %s10560_s16 = smov [#allocation11]  }
  0xa4   : > { %9850 = vmatprep.subr.bf16.mxu1 %v13917_v0  ;;  %v10876_v14 = vld [vmem:[#allocation5 + $0x88] sm:$0xff]   ;;  %v10888_v17 = vld [vmem:[#allocation5 + $0x90] sm:$0xff]   ;;  %v10895_v19 = vld [vmem:[%s10808_s10 + $0x70] sm:$0xff]  ;;  %s8994_s8 = sshll.u32 %s296_s12, 4  ;;  %s13862_s11 = scalar_lea.hbm %s13913_s5, %s9734_s15  ;;  %s13856_s8 = int_to_ptr.vmem [resolvable:$true] %s8994_s8 }
  0xa5   : > { %v10883_v16 = vld [vmem:[%s10808_s10 + $0x60] sm:$0xff]  ;;  %v10892_v18 = vld [vmem:[%s10808_s10 + $0x78] sm:$0xff]  ;;  %v10900_v20 = vld [vmem:[#allocation5 + $0x98] sm:$0xff]   ;;  %s10466_s13 = scalar_lea.vmem %s13856_s8, 384  ;;  %s10470_s6 = sshll.u32 %s10560_s16, 4  ;;  %s10471_s6 = int_to_ptr.vmem [resolvable:$false] %s10470_s6 }
  0xa6   : > { %363 = vperm.xlu1 %10101, %v10835_v3   ;;  %357 = vperm.xlu0 %10100, %v10838_v4   ;;  %v10904_v21 = vld [vmem:[%s10808_s10 + $0x88] sm:$0xff]  ;;  %v10909_v22 = vld [vmem:[#allocation5 + $0xa0] sm:$0xff]   ;;  %v10918_v25 = vld [vmem:[#allocation5 + $0xa8] sm:$0xff]   ;;  %p10467_p3 = scmp.ne.s32.totalorder %s13856_s8, %s10466_s13  ;;  %s10472_s29 = scalar_lea.vmem %s10471_s6, 768 }
  0xa7   : > { %9866 = vmatpush1.bf16.msra.mxu1 %v10876_v14  ;;  %v10913_v23 = vld [vmem:[%s10808_s10 + $0x98] sm:$0xff]  ;;  %v10923_v26 = vld [vmem:[%s10808_s10 + $0xa8] sm:$0xff]  ;;  %v11029_v58 = vld [vmem:[%s10808_s10 + $0x80] sm:$0xff]  ;;  %p10473_p12 = scmp.lt.s32.totalorder %s13856_s8, %s10471_s6  ;;  %p10474_p2 = scmp.lt.s32.totalorder %s10472_s29, %s10466_s13 }
  0xa8   : > { %9851 = vmatprep.subr.bf16.mxu1 %v13917_v0  ;;  %v10927_v27 = vld [vmem:[#allocation5 + $0xb0] sm:$0xff]   ;;  %v10932_v28 = vld [vmem:[%s10808_s10 + $0xb8] sm:$0xff]  ;;  %v10936_v29 = vld [vmem:[#allocation5 + $0xb8] sm:$0xff]   ;;  %p10468_p5 = pnand %p10467_p3, %p10752_p10 }
  0xa9   : > { %v10942_v30 = vld [vmem:[#allocation5 + $0xc0] sm:$0xff]   ;;  %v10946_v31 = vld [vmem:[%s10808_s10 + $0xc8] sm:$0xff]  ;;  %v10952_v33 = vld [vmem:[#allocation5 + $0xc8] sm:$0xff]   ;;  %p10475_p1 = por %p10474_p2, %p10473_p12 }
  0xaa   : > { %369 = vperm.xlu1 %10101, %v10843_v5   ;;  %366 = vperm.xlu0 %10100, %v10846_v6   ;;  %v10219_v32 = vld [vmem:[#allocation5] sm:$0xff]   ;;  %v10221_v35 = vld [vmem:[#allocation5 + $0x8] sm:$0xff]   ;;  %v10962_v36 = vld [vmem:[#allocation5 + $0xd0] sm:$0xff]   ;;  %p10469_p7 = pneg %p10468_p5 }
  0xab   : > { %9867 = vmatpush1.bf16.msra.mxu1 %v10888_v17  ;;  %2341 = vmatpush1.bf16.msra.mxu0 %v10219_v32  ;;  %v10956_v34 = vld [vmem:[%s10808_s10 + $0xd8] sm:$0xff]  ;;  %v10223_v37 = vld [vmem:[#allocation5 + $0x10] sm:$0xff]   ;;  %v10969_v39 = vld [vmem:[#allocation5 + $0xd8] sm:$0xff]  }
  0xac   : > { %9852 = vmatprep.subr.bf16.mxu1 %v13917_v0  ;;  %2342 = vmatprep.subr.bf16.mxu0 %v13917_v0  ;;  %13957 = vst [vmem:[#allocation16_spill] sm:$0xff] %v10969_v39  ;;  %v10225_v40 = vld [vmem:[#allocation5 + $0x18] sm:$0xff]   ;;  %v10979_v42 = vld [vmem:[#allocation5 + $0xe0] sm:$0xff]   ;;  %v10989_v45 = vld [vmem:[#allocation5 + $0xe8] sm:$0xff]   ;;  %p10476_p13 = pnand %p10475_p1, %p10469_p7 }
  0xad   : > { %v10974_v41 = vld [vmem:[%s10808_s10 + $0xe8] sm:$0xff]  ;;  %13958 = vst [vmem:[#allocation17_spill] sm:$0xff] %v10979_v42  ;;  %v10227_v43 = vld [vmem:[#allocation5 + $0x20] sm:$0xff]   ;;  %13959 = vst [vmem:[#allocation18_spill] sm:$0xff] %v10989_v45 }
  0xae   : > { %375 = vperm.xlu1 %10101, %v10851_v7   ;;  %372 = vperm.xlu0 %10100, %v10854_v8   ;;  %v10984_v44 = vld [vmem:[%s10808_s10 + $0xf8] sm:$0xff]  ;;  %v10995_v47 = vld [vmem:[%s10808_s10 + $0x108] sm:$0xff]  ;;  %v11032_v59 = vld [vmem:[%s10808_s10 + $0x140] sm:$0xff] }
  0xaf   : > { %9868 = vmatpush1.bf16.msra.mxu1 %v10900_v20  ;;  %2343 = vmatpush1.bf16.msra.mxu0 %v10221_v35  ;;  %v10229_v46 = vld [vmem:[#allocation5 + $0x28] sm:$0xff]   ;;  %v11000_v48 = vld [vmem:[#allocation5 + $0xf0] sm:$0xff]   ;;  %v11011_v52 = vld [vmem:[#allocation5 + $0xf8] sm:$0xff]  }
  0xb0   : > { %9853 = vmatprep.subr.bf16.mxu1 %v13917_v0  ;;  %2344 = vmatprep.subr.bf16.mxu0 %v13917_v0  ;;  %13960 = vst [vmem:[#allocation19_spill] sm:$0xff] %v11000_v48  ;;  %v10231_v49 = vld [vmem:[#allocation5 + $0x30] sm:$0xff]   ;;  %v11005_v51 = vld [vmem:[%s10808_s10 + $0x118] sm:$0xff]  ;;  %13961 = vst [vmem:[#allocation20_spill] sm:$0xff] %v11011_v52 }
  0xb1   : > { %v10233_v53 = vld [vmem:[#allocation5 + $0x38] sm:$0xff]   ;;  %v10234_v55 = vld [vmem:[#allocation5 + $0x40] sm:$0xff]   ;;  %v10235_v57 = vld [vmem:[#allocation5 + $0x48] sm:$0xff]  }
  0xb2   : > { %381 = vperm.xlu1 %10101, %v10857_v9   ;;  %378 = vperm.xlu0 %10100, %v10864_v11   ;;  %v11015_v54 = vld [vmem:[%s10808_s10 + $0x128] sm:$0xff]  ;;  %v11022_v56 = vld [vmem:[%s10808_s10 + $0x138] sm:$0xff]  ;;  %v346_v63 = vld [vmem:[%s10808_s10 + $0x170] sm:$0xff] }
  0xb3   : > { %9869 = vmatpush1.bf16.msra.mxu1 %v10909_v22  ;;  %2345 = vmatpush1.bf16.msra.mxu0 %v10223_v37  ;;  %13962 = vst [vmem:[#allocation21_spill] sm:$0xff] %v11015_v54  ;;  %13963 = vst [vmem:[#allocation22_spill] sm:$0xff] %v11022_v56  ;;  %v10236_v60 = vld [vmem:[#allocation5 + $0x50] sm:$0xff]   ;;  %v11040_v61 = vld [vmem:[%s10808_s10 + $0x158] sm:$0xff] }
  0xb4   : > { %9854 = vmatprep.subr.bf16.mxu1 %v13917_v0  ;;  %2346 = vmatprep.subr.bf16.mxu0 %v13917_v0  ;;  %v10237_v62 = vld [vmem:[#allocation5 + $0x58] sm:$0xff]   ;;  %v10240_v37 = vld [vmem:[#allocation5 + $0x70] sm:$0xff]  }
  0xb5   : > { %v11057_v32 = vld [vmem:[%s10808_s10 + $0x190] sm:$0xff] }
  0xb6   : > { %387 = vperm.xlu1 %10101, %v10868_v12   ;;  %384 = vperm.xlu0 %10100, %v10871_v13   ;;  %v11061_v35 = vld [vmem:[%s10808_s10 + $0x90] sm:$0xff] }
  0xb7   : > { %9870 = vmatpush1.bf16.msra.mxu1 %v10918_v25  ;;  %2347 = vmatpush1.bf16.msra.mxu0 %v10225_v40  ;;  %v10241_v40 = vld [vmem:[#allocation5 + $0x78] sm:$0xff]  }
  0xb8   : > { %9855 = vmatprep.subr.bf16.mxu1 %v13917_v0  ;;  %2348 = vmatprep.subr.bf16.mxu0 %v13917_v0 }
  0xba   : > { %393 = vperm.xlu1 %10101, %v10880_v15   ;;  %390 = vperm.xlu0 %10100, %v10883_v16  }
  0xbb   : > { %9871 = vmatpush1.bf16.msra.mxu1 %v10927_v27  ;;  %2349 = vmatpush1.bf16.msra.mxu0 %v10227_v43 }
  0xbc   : > { %9856 = vmatprep.subr.bf16.mxu1 %v13917_v0  ;;  %2350 = vmatprep.subr.bf16.mxu0 %v13917_v0 }
  0xbe   : > { %399 = vperm.xlu1 %10101, %v10892_v18   ;;  %396 = vperm.xlu0 %10100, %v10895_v19  }
  0xbf   : > { %9872 = vmatpush1.bf16.msra.mxu1 %v10936_v29  ;;  %2351 = vmatpush1.bf16.msra.mxu0 %v10229_v46 }
  0xc0   : > { %9857 = vmatprep.subr.bf16.mxu1 %v13917_v0  ;;  %2352 = vmatprep.subr.bf16.mxu0 %v13917_v0 }
  0xc2   : > { %405 = vperm.xlu1 %10101, %v10904_v21   ;;  %10104 = vset.pattern.permute.xlu0 %v13919_v24 }
  0xc3   : > { %1395 = vperm.xlu0 %10104, %v10892_v18   ;;  %9873 = vmatpush1.bf16.msra.mxu1 %v10942_v30 }
  0xc4   : > { %9858 = vmatprep.subr.bf16.mxu1 %v13917_v0  ;;  %2353 = vmatpush1.bf16.msra.mxu0 %v10231_v49 }
  0xc5   : > { %2354 = vmatprep.subr.bf16.mxu0 %v13917_v0 }
  0xc6   : > { %411 = vperm.xlu1 %10101, %v10913_v23  }
  0xc7   : > { %1401 = vperm.xlu0 %10104, %v10904_v21   ;;  %9874 = vmatpush1.bf16.msra.mxu1 %v10952_v33 }
  0xc8   : > { %9859 = vmatprep.subr.bf16.mxu1 %v13917_v0  ;;  %2355 = vmatpush1.bf16.msra.mxu0 %v10233_v53 }
  0xc9   : > { %2356 = vmatprep.subr.bf16.mxu0 %v13917_v0 }
  0xca   : > { %417 = vperm.xlu1 %10101, %v10923_v26  }
  0xcb   : > { %1407 = vperm.xlu0 %10104, %v10913_v23   ;;  %9875 = vmatpush1.bf16.msra.mxu1 %v10962_v36 }
  0xcc   : > { %9860 = vmatprep.subr.bf16.mxu1 %v13917_v0  ;;  %2357 = vmatpush1.bf16.msra.mxu0 %v10234_v55 }
  0xcd   : > { %2358 = vmatprep.subr.bf16.mxu0 %v13917_v0 }
  0xce   : > { %423 = vperm.xlu1 %10101, %v10932_v28  }
  0xcf   : > { %1413 = vperm.xlu0 %10104, %v10923_v26   ;;  %9876 = vmatpush1.bf16.msra.mxu1 %v10969_v39 }
  0xd0   : > { %9861 = vmatprep.subr.bf16.mxu1 %v13917_v0  ;;  %2359 = vmatpush1.bf16.msra.mxu0 %v10235_v57  ;;  %v11133_v57 = vld [vmem:[%s10808_s10 + $0xc0] sm:$0xff] }
  0xd1   : > { %2360 = vmatprep.subr.bf16.mxu0 %v13917_v0 }
  0xd2   : > { %429 = vperm.xlu1 %10101, %v10946_v31  }
  0xd3   : > { %1419 = vperm.xlu0 %10104, %v10932_v28   ;;  %9877 = vmatpush1.bf16.msra.mxu1 %v10979_v42  ;;  %v11201_v42 = vld [vmem:[%s10808_s10 + $0x178] sm:$0xff] }
  0xd4   : > { %9862 = vmatprep.subr.bf16.mxu1 %v13917_v0  ;;  %2361 = vmatpush1.bf16.msra.mxu0 %v10236_v60  ;;  %13978 = vst [vmem:[#allocation34_spill] sm:$0xff] %v11201_v42 }
  0xd5   : > { %2362 = vmatprep.subr.bf16.mxu0 %v13917_v0 }
  0xd6   : > { %435 = vperm.xlu1 %10101, %v10956_v34  }
  0xd7   : > { %1425 = vperm.xlu0 %10104, %v10946_v31   ;;  %9878 = vmatpush1.bf16.msra.mxu1 %v10989_v45 }
  0xd8   : > { %9863 = vmatprep.subr.bf16.mxu1 %v13917_v0  ;;  %2363 = vmatpush1.bf16.msra.mxu0 %v10237_v62 }
  0xd9   : > { %2364 = vmatprep.subr.bf16.mxu0 %v13917_v0 }
  0xda   : > { %10102 = vset.pattern.permute.xlu1 %v13921_v38 }
  0xdb   : > { %689 = vperm.xlu1 %10102, %v10838_v4   ;;  %1431 = vperm.xlu0 %10104, %v10956_v34   ;;  %v11050_v4 = vld [vmem:[%s10808_s10 + $0x188] sm:$0xff] }
  0xdc   : > { %9879 = vmatpush1.bf16.msra.mxu1 %v11000_v48  ;;  %v11192_v48 = vld [vmem:[%s10808_s10 + $0x168] sm:$0xff] }
  0xdd   : > { %9864 = vmatprep.subr.bf16.mxu1 %v13917_v0 }
  0xdf   : > { %692 = vperm.xlu1 %10102, %v10827_v1   ;;  %1437 = vperm.xlu0 %10104, %v10974_v41   ;;  %v10238_v1 = vld [vmem:[#allocation5 + $0x60] sm:$0xff]  }
  0xe0   : > { %9880 = vmatpush1.bf16.msra.mxu1 %v11011_v52  ;;  %2365 = vmatpush1.bf16.msra.mxu0 %v10238_v1 }
  0xe1   : > { %2366 = vmatprep.subr.bf16.mxu0 %v13917_v0 }
  0xe3   : > { %10103 = vset.pattern.permute.xlu1 %v13919_v24  ;;  %1443 = vperm.xlu0 %10104, %v10984_v44  }
  0xe4   : > { %1392 = vperm.xlu1 %10103, %v10895_v19  }
  0xe7   : > { %1449 = vperm.xlu0 %10104, %v10995_v47  }
  0xe8   : > { %10105 = vset.pattern.permute.xlu1 %v13923_v50 }
  0xe9   : > { %1060 = vperm.xlu1 %10105, %v10895_v19  }
  0xeb   : > { %1455 = vperm.xlu0 %10104, %v11005_v51  }
  0xed   : > { %1063 = vperm.xlu1 %10105, %v10892_v18  }
  0xef   : > { %1461 = vperm.xlu0 %10104, %v11015_v54  }
  0xf1   : > { %10106 = vset.pattern.permute.xlu1 %v13921_v38 }
  0xf2   : > { %701 = vperm.xlu1 %10106, %v10843_v5   ;;  %v10239_v5 = vld [vmem:[#allocation5 + $0x68] sm:$0xff]  }
  0xf3   : > { %1467 = vperm.xlu0 %10104, %v11022_v56   ;;  %2367 = vmatpush1.bf16.msra.mxu0 %v10239_v5 }
  0xf4   : > { %2368 = vmatprep.subr.bf16.mxu0 %v13917_v0 }
  0xf6   : > { %10107 = vset.pattern.permute.xlu1 %v13919_v24 }
  0xf7   : > { %1398 = vperm.xlu1 %10107, %v11029_v58   ;;  %10145 = vset.pattern.permute.xlu0 %v13923_v50 }
  0xf8   : > { %1138 = vperm.xlu0 %10145, %v11032_v59   ;;  %2369 = vmatpush1.bf16.msra.mxu0 %v10240_v37  ;;  %v11150_v37 = vld [vmem:[%s10808_s10 + $0xe0] sm:$0xff] }
  0xf9   : > { %2370 = vmatprep.subr.bf16.mxu0 %v13917_v0 }
  0xfb   : > { %10108 = vset.pattern.permute.xlu1 %v13923_v50 }
  0xfc   : > { %1066 = vperm.xlu1 %10108, %v11029_v58   ;;  %1147 = vperm.xlu0 %10145, %v11040_v61  }
  0xfd   : > { %2371 = vmatpush1.bf16.msra.mxu0 %v10241_v40 }
  0xfe   : > { %2580 = vmatprep.subr.bf16.mxu0 %v13917_v0 }
 0x100   : > { %1069 = vperm.xlu1 %10108, %v10904_v21   ;;  %1156 = vperm.xlu0 %10145, %v346_v63   ;;  %v11143_v63 = vld [vmem:[%s10808_s10 + $0xd0] sm:$0xff] }
 0x104   : > { %10109 = vset.pattern.permute.xlu1 %v13921_v38  ;;  %1165 = vperm.xlu0 %10145, %v11050_v4  }
 0x105   : > { %707 = vperm.xlu1 %10109, %v10851_v7  }
 0x108   : > { %1168 = vperm.xlu0 %10145, %v11057_v32  }
 0x109   : > { %10110 = vset.pattern.permute.xlu1 %v13919_v24 }
 0x10a   : > { %1404 = vperm.xlu1 %10110, %v11061_v35  }
 0x10c   : > { %10166 = vset.pattern.permute.xlu0 %v13921_v38 }
 0x10d   : > { %686 = vperm.xlu0 %10166, %v10830_v2   ;;  %v11079_v2 = vld [vmem:[%s10808_s10 + $0xa0] sm:$0xff] }
 0x10e   : > { %10111 = vset.pattern.permute.xlu1 %v13923_v50 }
 0x10f   : > { %1072 = vperm.xlu1 %10111, %v11061_v35  }
 0x111   : > { %695 = vperm.xlu0 %10166, %v10835_v3  }
 0x113   : > { %1075 = vperm.xlu1 %10111, %v10913_v23  }
 0x115   : > { %698 = vperm.xlu0 %10166, %v10846_v6  }
 0x117   : > { %10112 = vset.pattern.permute.xlu1 %v13921_v38 }
 0x118   : > { %713 = vperm.xlu1 %10112, %v10857_v9  }
 0x119   : > { %704 = vperm.xlu0 %10166, %v10854_v8  }
 0x11c   : > { %10113 = vset.pattern.permute.xlu1 %v13919_v24 }
 0x11d   : > { %1410 = vperm.xlu1 %10113, %v11079_v2   ;;  %710 = vperm.xlu0 %10166, %v10864_v11  }
 0x121   : > { %v11084_v7 = vpop.permute.xlu1 %360  ;;  %10114 = vset.pattern.permute.xlu1 %v13923_v50  ;;  %716 = vperm.xlu0 %10166, %v10871_v13   ;;  %v11088_v3 = vpop.permute.xlu0 %354 }
 0x122   : > { %1078 = vperm.xlu1 %10114, %v11079_v2  }
 0x125   : > { %v11091_v6 = vpop.permute.xlu1 %363  ;;  %722 = vperm.xlu0 %10166, %v10883_v16   ;;  %v11094_v8 = vpop.permute.xlu0 %357  ;;  %v11110_v16 = vld [vmem:[%s10808_s10 + $0xb0] sm:$0xff] }
 0x126   : > { %1081 = vperm.xlu1 %10114, %v10923_v26  }
 0x129   : > { %v11097_v9 = vpop.permute.xlu1 %369  ;;  %728 = vperm.xlu0 %10166, %v10895_v19   ;;  %v11100_v11 = vpop.permute.xlu0 %366 }
 0x12a   : > { %10115 = vset.pattern.permute.xlu1 %v13921_v38 }
 0x12b   : > { %719 = vperm.xlu1 %10115, %v10868_v12  }
 0x12d   : > { %v11104_v13 = vpop.permute.xlu1 %375  ;;  %734 = vperm.xlu0 %10166, %v11029_v58   ;;  %v11107_v43 = vpop.permute.xlu0 %372 }
 0x12f   : > { %10116 = vset.pattern.permute.xlu1 %v13919_v24 }
 0x130   : > { %1416 = vperm.xlu1 %10116, %v11110_v16  }
 0x131   : > { %v11114_v19 = vpop.permute.xlu1 %381  ;;  %740 = vperm.xlu0 %10166, %v11061_v35   ;;  %v11117_v46 = vpop.permute.xlu0 %378 }
 0x134   : > { %10117 = vset.pattern.permute.xlu1 %v13923_v50 }
 0x135   : > { %v11120_v12 = vpop.permute.xlu1 %387  ;;  %1084 = vperm.xlu1 %10117, %v11110_v16   ;;  %746 = vperm.xlu0 %10166, %v11079_v2   ;;  %v11124_v49 = vpop.permute.xlu0 %384 }
 0x139   : > { %v11126_v53 = vpop.permute.xlu1 %393  ;;  %1087 = vperm.xlu1 %10117, %v10932_v28   ;;  %752 = vperm.xlu0 %10166, %v11110_v16   ;;  %v11130_v55 = vpop.permute.xlu0 %390 }
 0x13a   : > { %13964 = vst [vmem:[#allocation23_spill] sm:$0xff] %v11130_v55 }
 0x13d   : > { %v11135_v60 = vpop.permute.xlu1 %399  ;;  %10118 = vset.pattern.permute.xlu1 %v13921_v38  ;;  %758 = vperm.xlu0 %10166, %v11133_v57   ;;  %v11139_v62 = vpop.permute.xlu0 %396  ;;  %v11166_v38 = vld [vmem:[%s10808_s10 + $0x110] sm:$0xff] }
 0x13e   : > { %13965 = vst [vmem:[#allocation24_spill] sm:$0xff] %v11135_v60  ;;  %13966 = vst [vmem:[#allocation25_spill] sm:$0xff] %v11139_v62  ;;  %725 = vperm.xlu1 %10118, %v10880_v15   ;;  %v11182_v62 = vld [vmem:[%s10808_s10 + $0x150] sm:$0xff] }
 0x141   : > { %v11145_v1 = vpop.permute.xlu1 %405  ;;  %764 = vperm.xlu0 %10166, %v11143_v63  }
 0x142   : > { %13967 = vst [vmem:[#allocation26_spill] sm:$0xff] %v11145_v1  ;;  %10119 = vset.pattern.permute.xlu1 %v13919_v24  ;;  %v1396_v5 = vpop.permute.xlu0 %1395 }
 0x143   : > { %1422 = vperm.xlu1 %10119, %v11133_v57  }
 0x145   : > { %v11153_v40 = vpop.permute.xlu1 %411  ;;  %770 = vperm.xlu0 %10166, %v11150_v37  }
 0x146   : > { %13968 = vst [vmem:[#allocation27_spill] sm:$0xff] %v11153_v40  ;;  %v11156_v0 = vpop.permute.xlu0 %1401 }
 0x147   : > { %10120 = vset.pattern.permute.xlu1 %v13923_v50  ;;  %v13971_v50 = vmov 1  }
 0x148   : > { %1090 = vperm.xlu1 %10120, %v11133_v57  }
 0x149   : > { %v11160_v15 = vpop.permute.xlu1 %417  ;;  %779 = vperm.xlu0 %10166, %v10984_v44  }
 0x14a   : > { %13969 = vst [vmem:[#allocation28_spill] sm:$0xff] %v11160_v15  ;;  %v11163_v24 = vpop.permute.xlu0 %1407 }
 0x14c   : > { %1093 = vperm.xlu1 %10120, %v10946_v31  }
 0x14d   : > { %v11169_v40 = vpop.permute.xlu1 %423  ;;  %788 = vperm.xlu0 %10166, %v11166_v38  }
 0x14e   : > { %13970 = vst [vmem:[#allocation29_spill] sm:$0xff] %v11169_v40  ;;  %v11172_v1 = vpop.permute.xlu0 %1413  ;;  %v13974_v40 = vmov 3  }
 0x150   : > { %10121 = vset.pattern.permute.xlu1 %v13971_v50 }
 0x151   : > { %v11175_v56 = vpop.permute.xlu1 %429  ;;  %731 = vperm.xlu1 %10121, %v10892_v18   ;;  %797 = vperm.xlu0 %10166, %v11015_v54   ;;  %v13976_v18 = vmov 2  }
 0x152   : > { %13972 = vst [vmem:[#allocation30_spill] sm:$0xff] %v11175_v56  ;;  %v11179_v15 = vpop.permute.xlu0 %1419 }
 0x155   : > { %v11184_v60 = vpop.permute.xlu1 %435  ;;  %10122 = vset.pattern.permute.xlu1 %v13974_v40  ;;  %812 = vperm.xlu0 %10166, %v11182_v62  }
 0x156   : > { %13973 = vst [vmem:[#allocation31_spill] sm:$0xff] %v11184_v60  ;;  %1428 = vperm.xlu1 %10122, %v11143_v63   ;;  %v11189_v52 = vpop.permute.xlu0 %1425  ;;  %v13934_v60 = vlaneseq }
 0x157   : > { %13975 = vst [vmem:[#allocation32_spill] sm:$0xff] %v11189_v52 }
 0x158   : > { %v11211_v54 = vand.u32 127, %v13934_v60  ;;  %v13935_v60 = vmov 1.0|1.0  }
 0x159   : > { %821 = vperm.xlu0 %10166, %v11192_v48  }
 0x15a   : > { %10123 = vset.pattern.permute.xlu1 %v13976_v18  ;;  %v11196_v56 = vpop.permute.xlu1 %689  ;;  %v11198_v45 = vpop.permute.xlu0 %1431  ;;  %vm1517_vm0 = vcmp.eq.s32.totalorder %v1396_v5, %v11211_v54  ;;  %vm1519_vm6 = vcmp.eq.s32.totalorder %v11156_v0, %v11211_v54  ;;  %vm1521_vm12 = vcmp.eq.s32.totalorder %v11163_v24, %v11211_v54  ;;  %vm506_vm13 = vcmp.eq.s32.totalorder %v11088_v3, %v11211_v54 }
 0x15b   : > { %13977 = vst [vmem:[#allocation33_spill] sm:$0xff] %v11198_v45  ;;  %1096 = vperm.xlu1 %10123, %v11143_v63   ;;  %vm507_vm14 = vcmp.eq.s32.totalorder %v11094_v8, %v11211_v54 }
 0x15d   : > { %827 = vperm.xlu0 %10166, %v11201_v42   ;;  %v13979_v42 = vmov 0  }
 0x15e   : > { %v11205_v39 = vpop.permute.xlu1 %692  ;;  %v11207_v52 = vpop.permute.xlu0 %1437 }
 0x15f   : > { %1099 = vperm.xlu1 %10123, %v10956_v34  }
 0x161   : > { %833 = vperm.xlu0 %10166, %v11050_v4  }
 0x162   : > { %v11214_v55 = vpop.permute.xlu0 %1443 }
 0x163   : > { %10124 = vset.pattern.permute.xlu1 %v13971_v50  ;;  %v1393_v45 = vpop.permute.xlu1 %1392 }
 0x164   : > { %737 = vperm.xlu1 %10124, %v10904_v21   ;;  %vm1516_vm1 = vcmp.eq.s32.totalorder %v1393_v45, %v11211_v54 }
 0x165   : > { %10180 = vset.pattern.permute.xlu0 %v13979_v42  ;;  %vm9546_vm2 = vmpackc.low %vm1517_vm0, %vm1516_vm1 }
 0x166   : > { %402 = vperm.xlu0 %10180, %v11029_v58   ;;  %9547 = vmatprep.mubr.msk.bf16.mxu1 %vm9546_vm2, %v13935_v60  ;;  %v11223_v4 = vpop.permute.xlu0 %1449  ;;  %vm9416_vm1 = vmpackc.low %vm507_vm14, %vm506_vm13  ;;  %vm508_vm13 = vcmp.eq.s32.totalorder %v11084_v7, %v11211_v54 }
 0x167   : > { %13980 = vst [vmem:[#allocation35_spill] sm:$0xff] %v11223_v4  ;;  %v13982_v4 = vmov 1.0|1.0  }
 0x168   : > { %10125 = vset.pattern.permute.xlu1 %v13974_v40  ;;  %v1061_v5 = vpop.permute.xlu1 %1060 }
 0x169   : > { %1434 = vperm.xlu1 %10125, %v11150_v37   ;;  %vm1184_vm3 = vcmp.eq.s32.totalorder %v1061_v5, %v11211_v54 }
 0x16a   : > { %408 = vperm.xlu0 %10180, %v11061_v35   ;;  %v11228_v21 = vpop.permute.xlu0 %1455 }
 0x16c   : > { %v1064_v45 = vpop.permute.xlu1 %1063 }
 0x16d   : > { %vm1185_vm4 = vcmp.eq.s32.totalorder %v1064_v45, %v11211_v54  ;;  %10126 = vset.pattern.permute.xlu1 %v13976_v18 }
 0x16e   : > { %vm9548_vm5 = vmpackc.low %vm1185_vm4, %vm1184_vm3  ;;  %1102 = vperm.xlu1 %10126, %v11150_v37   ;;  %414 = vperm.xlu0 %10180, %v11079_v2   ;;  %v11235_v60 = vpop.permute.xlu0 %1461  ;;  %vm839_vm3 = vcmp.eq.s32.totalorder %v11196_v56, %v11211_v54 }
 0x16f   : > { %13981 = vst [vmem:[#allocation36_spill] sm:$0xff] %v11235_v60  ;;  %9549 = vmatmul.mubr.msk.bf16.vlgmr.msra.gmra.mrb[0].mxu1 %vm9548_vm5, %v13982_v4  ;;  %v11254_v60 = vld [vmem:[%s10808_s10 + $0xf0] sm:$0xff]  ;;  %vm840_vm5 = vcmp.eq.s32.totalorder %v11205_v39, %v11211_v54 }
 0x171   : > { %v11238_v35 = vpop.permute.xlu1 %701 }
 0x172   : > { %1105 = vperm.xlu1 %10126, %v10974_v41   ;;  %420 = vperm.xlu0 %10180, %v11110_v16   ;;  %v11242_v5 = vpop.permute.xlu0 %1467 }
 0x173   : > { %13983 = vst [vmem:[#allocation37_spill] sm:$0xff] %v11242_v5 }
 0x176   : > { %10127 = vset.pattern.permute.xlu1 %v13971_v50  ;;  %v1399_v45 = vpop.permute.xlu1 %1398  ;;  %426 = vperm.xlu0 %10180, %v11133_v57  }
 0x177   : > { %vm1518_vm7 = vcmp.eq.s32.totalorder %v1399_v45, %v11211_v54  ;;  %743 = vperm.xlu1 %10127, %v10913_v23   ;;  %v11250_v2 = vpop.permute.xlu0 %1138 }
 0x178   : > { %13984 = vst [vmem:[#allocation38_spill] sm:$0xff] %v11250_v2  ;;  %vm9550_vm8 = vmpackc.low %vm1519_vm6, %vm1518_vm7 }
 0x179   : > { %9551 = vmatprep.mubr.msk.bf16.mxu1 %vm9550_vm8, %v13982_v4 }
 0x17a   : > { %432 = vperm.xlu0 %10180, %v11143_v63   ;;  %v11269_v63 = vld [vmem:[%s10808_s10 + $0x100] sm:$0xff] }
 0x17b   : > { %10128 = vset.pattern.permute.xlu1 %v13974_v40  ;;  %v1067_v0 = vpop.permute.xlu1 %1066  ;;  %v11258_v5 = vpop.permute.xlu0 %1147 }
 0x17c   : > { %13985 = vst [vmem:[#allocation39_spill] sm:$0xff] %v11258_v5  ;;  %1440 = vperm.xlu1 %10128, %v11254_v60   ;;  %vm1186_vm9 = vcmp.eq.s32.totalorder %v1067_v0, %v11211_v54 }
 0x17e   : > { %441 = vperm.xlu0 %10180, %v10974_v41  }
 0x17f   : > { %v1070_v23 = vpop.permute.xlu1 %1069  ;;  %v11262_v45 = vpop.permute.xlu0 %1156 }
 0x180   : > { %13986 = vst [vmem:[#allocation40_spill] sm:$0xff] %v11262_v45  ;;  %vm1187_vm10 = vcmp.eq.s32.totalorder %v1070_v23, %v11211_v54  ;;  %10129 = vset.pattern.permute.xlu1 %v13976_v18  ;;  %v11285_v45 = vld [vmem:[%s10808_s10 + $0x130] sm:$0xff] }
 0x181   : > { %vm9552_vm11 = vmpackc.low %vm1187_vm10, %vm1186_vm9  ;;  %1108 = vperm.xlu1 %10129, %v11254_v60   ;;  %vm509_vm10 = vcmp.eq.s32.totalorder %v11091_v6, %v11211_v54 }
 0x182   : > { %9553 = vmatmul.mubr.msk.bf16.gmra.mrb[4].mxu1 %vm9552_vm11, %v13982_v4  ;;  %450 = vperm.xlu0 %10180, %v11269_v63   ;;  %vm9420_vm14 = vmpackc.low %vm509_vm10, %vm508_vm13  ;;  %vm513_vm10 = vcmp.eq.s32.totalorder %v11104_v13, %v11211_v54 }
 0x183   : > { %v11273_v5 = vpop.permute.xlu0 %1165 }
 0x184   : > { %v11275_v2 = vpop.permute.xlu1 %707 }
 0x185   : > { %1111 = vperm.xlu1 %10129, %v10984_v44  }
 0x186   : > { %459 = vperm.xlu0 %10180, %v11005_v51  }
 0x187   : > { %v11279_v0 = vpop.permute.xlu0 %1168 }
 0x189   : > { %10130 = vset.pattern.permute.xlu1 %v13971_v50  ;;  %v1405_v23 = vpop.permute.xlu1 %1404 }
 0x18a   : > { %vm1520_vm15 = vcmp.eq.s32.totalorder %v1405_v23, %v11211_v54  ;;  %749 = vperm.xlu1 %10130, %v10923_v26   ;;  %468 = vperm.xlu0 %10180, %v11285_v45  }
 0x18b   : > { %vm9554_vm0 = vmpackc.low %vm1521_vm12, %vm1520_vm15  ;;  %vm843_vm15 = vcmp.eq.s32.totalorder %v11238_v35, %v11211_v54 }
 0x18c   : > { %9555 = vmatprep.mubr.msk.bf16.mxu1 %vm9554_vm0, %v13982_v4  ;;  %v687_v24 = vpop.permute.xlu0 %686 }
 0x18d   : > { %vm838_vm2 = vcmp.eq.s32.totalorder %v687_v24, %v11211_v54 }
 0x18e   : > { %10131 = vset.pattern.permute.xlu1 %v13974_v40  ;;  %v1073_v3 = vpop.permute.xlu1 %1072  ;;  %vm9414_vm4 = vmpackc.low %vm839_vm3, %vm838_vm2  ;;  %474 = vperm.xlu0 %10180, %v11032_v59   ;;  %vm511_vm2 = vcmp.eq.s32.totalorder %v11097_v9, %v11211_v54  ;;  %vm510_vm3 = vcmp.eq.s32.totalorder %v11100_v11, %v11211_v54  ;;  %v13987_v11 = vld [vmem:[#allocation23_spill] sm:$0xff] }
 0x18f   : > { %1446 = vperm.xlu1 %10131, %v11269_v63   ;;  %9415 = vmatprep.mubr.msk.bf16.mxu0 %vm9414_vm4, %v13982_v4  ;;  %vm1188_vm8 = vcmp.eq.s32.totalorder %v1073_v3, %v11211_v54  ;;  %v11466_v3 = vld [vmem:[%s10808_s10 + $0x8] sm:$0xff] }
 0x190   : > { %9417 = vmatmul.mubr.msk.bf16.vlgmr.msra.gmra.mrb[0].mxu0 %vm9416_vm1, %v13982_v4  ;;  %v696_v26 = vpop.permute.xlu0 %695  ;;  %vm1523_vm1 = vcmp.eq.s32.totalorder %v11172_v1, %v11211_v54  ;;  %v13992_v1 = vld [vmem:[#allocation18_spill] sm:$0xff] }
 0x191   : > { %vm841_vm6 = vcmp.eq.s32.totalorder %v696_v26, %v11211_v54  ;;  %2581 = vmatpush1.bf16.msra.mxu0 %v10861_v10  ;;  %v13994_v26 = vld [vmem:[#allocation20_spill] sm:$0xff] }
 0x192   : > { %vm9418_vm7 = vmpackc.low %vm841_vm6, %vm840_vm5  ;;  %v1076_v56 = vpop.permute.xlu1 %1075  ;;  %483 = vperm.xlu0 %10180, %v11040_v61   ;;  %2582 = vmatprep.subr.bf16.mxu0 %v13979_v42 }
 0x193   : > { %vm1189_vm9 = vcmp.eq.s32.totalorder %v1076_v56, %v11211_v54  ;;  %10132 = vset.pattern.permute.xlu1 %v13976_v18  ;;  %9419 = vmatprep.mubr.msk.bf16.mxu0 %vm9418_vm7, %v13982_v4  ;;  %vm9424_vm7 = vmpackc.low %vm511_vm2, %vm510_vm3  ;;  %vm515_vm3 = vcmp.eq.s32.totalorder %v11114_v19, %v11211_v54  ;;  %v13995_v56 = vld [vmem:[#allocation24_spill] sm:$0xff] }
 0x194   : > { %vm9556_vm11 = vmpackc.low %vm1189_vm9, %vm1188_vm8  ;;  %1114 = vperm.xlu1 %10132, %v11269_v63   ;;  %v699_v10 = vpop.permute.xlu0 %698  ;;  %vm845_vm8 = vcmp.eq.s32.totalorder %v11275_v2, %v11211_v54  ;;  %v13993_v2 = vld [vmem:[#allocation19_spill] sm:$0xff] }
 0x195   : > { %vm842_vm12 = vcmp.eq.s32.totalorder %v699_v10, %v11211_v54  ;;  %9557 = vmatmul.mubr.msk.bf16.gmra.mrb[8].mxu1 %vm9556_vm11, %v13982_v4  ;;  %2583 = vmatpush1.bf16.msra.mxu0 %v10876_v14  ;;  %vm512_vm11 = vcmp.eq.s32.totalorder %v11107_v43, %v11211_v54  ;;  %v13988_v43 = vld [vmem:[#allocation21_spill] sm:$0xff] }
 0x196   : > { %504 = vperm.xlu0 %10180, %v11057_v32   ;;  %2584 = vmatprep.subr.bf16.mxu0 %v13979_v42  ;;  %vm9422_vm0 = vmpackc.low %vm843_vm15, %vm842_vm12  ;;  %v13996_v10 = vld [vmem:[#allocation25_spill] sm:$0xff] }
 0x197   : > { %v714_v39 = vpop.permute.xlu1 %713  ;;  %vm9428_vm13 = vmpackc.low %vm513_vm10, %vm512_vm11 }
 0x198   : > { %1117 = vperm.xlu1 %10132, %v10995_v47   ;;  %9421 = vmatmul.mubr.msk.bf16.gmra.mrb[4].mxu0 %vm9420_vm14, %v13982_v4  ;;  %v705_v6 = vpop.permute.xlu0 %704 }
 0x199   : > { %9423 = vmatprep.mubr.msk.bf16.mxu0 %vm9422_vm0, %v13982_v4  ;;  %2585 = vmatpush1.bf16.msra.mxu0 %v10888_v17  ;;  %vm844_vm4 = vcmp.eq.s32.totalorder %v705_v6, %v11211_v54  ;;  %vm847_vm0 = vcmp.eq.s32.totalorder %v714_v39, %v11211_v54 }
 0x19a   : > { %10184 = vset.pattern.permute.xlu0 %v13974_v40  ;;  %2586 = vmatprep.subr.bf16.mxu0 %v13979_v42  ;;  %vm9426_vm9 = vmpackc.low %vm845_vm8, %vm844_vm4  ;;  %vm514_vm4 = vcmp.eq.s32.totalorder %v11117_v46, %v11211_v54  ;;  %v13990_v46 = vld [vmem:[#allocation32_spill] sm:$0xff] }
 0x19b   : > { %1476 = vperm.xlu0 %10184, %v11182_v62   ;;  %vm9432_vm8 = vmpackc.low %vm515_vm3, %vm514_vm4  ;;  %vm519_vm3 = vcmp.eq.s32.totalorder %v11126_v53, %v11211_v54  ;;  %vm518_vm4 = vcmp.eq.s32.totalorder %v13987_v11, %v11211_v54 }
 0x19c   : > { %10133 = vset.pattern.permute.xlu1 %v13971_v50  ;;  %v1411_v14 = vpop.permute.xlu1 %1410  ;;  %v711_v47 = vpop.permute.xlu0 %710 }
 0x19d   : > { %vm1522_vm5 = vcmp.eq.s32.totalorder %v1411_v14, %v11211_v54  ;;  %755 = vperm.xlu1 %10133, %v10932_v28   ;;  %2587 = vmatpush1.bf16.msra.mxu0 %v10900_v20  ;;  %vm846_vm12 = vcmp.eq.s32.totalorder %v711_v47, %v11211_v54  ;;  %v13997_v14 = vld [vmem:[#allocation22_spill] sm:$0xff]  ;;  %v11482_v47 = vld [vmem:[%s10808_s10 + $0x18] sm:$0xff] }
 0x19e   : > { %vm9558_vm6 = vmpackc.low %vm1523_vm1, %vm1522_vm5  ;;  %2588 = vmatprep.subr.bf16.mxu0 %v13979_v42 }
 0x19f   : > { %9559 = vmatprep.mubr.msk.bf16.mxu1 %vm9558_vm6, %v13982_v4  ;;  %1485 = vperm.xlu0 %10184, %v11192_v48   ;;  %vm9430_vm2 = vmpackc.low %vm847_vm0, %vm846_vm12  ;;  %vm517_vm12 = vcmp.eq.s32.totalorder %v11120_v12, %v11211_v54 }
 0x1a0   : > { %9425 = vmatmul.mubr.msk.bf16.gmra.mrb[8].mxu0 %vm9424_vm7, %v13982_v4  ;;  %v717_v17 = vpop.permute.xlu0 %716  ;;  %vm1525_vm7 = vcmp.eq.s32.totalorder %v11179_v15, %v11211_v54 }
 0x1a1   : > { %10134 = vset.pattern.permute.xlu1 %v13974_v40  ;;  %v1079_v28 = vpop.permute.xlu1 %1078  ;;  %9427 = vmatprep.mubr.msk.bf16.mxu0 %vm9426_vm9, %v13982_v4  ;;  %vm848_vm5 = vcmp.eq.s32.totalorder %v717_v17, %v11211_v54  ;;  %v13998_v17 = vld [vmem:[#allocation33_spill] sm:$0xff] }
 0x1a2   : > { %1452 = vperm.xlu1 %10134, %v11166_v38   ;;  %2589 = vmatpush1.bf16.msra.mxu0 %v10909_v22  ;;  %vm1190_vm14 = vcmp.eq.s32.totalorder %v1079_v28, %v11211_v54 }
 0x1a3   : > { %2590 = vmatprep.subr.bf16.mxu0 %v13979_v42 }
 0x1a4   : > { %v11358_v20 = vpop.permute.xlu0 %722 }
 0x1a5   : > { %v1082_v32 = vpop.permute.xlu1 %1081 }
 0x1a6   : > { %vm1191_vm15 = vcmp.eq.s32.totalorder %v1082_v32, %v11211_v54  ;;  %10135 = vset.pattern.permute.xlu1 %v13976_v18  ;;  %2591 = vmatpush1.bf16.msra.mxu0 %v10918_v25  ;;  %v11493_v32 = vld [vmem:[%s10808_s10 + $0x28] sm:$0xff] }
 0x1a7   : > { %vm9560_vm1 = vmpackc.low %vm1191_vm15, %vm1190_vm14  ;;  %1120 = vperm.xlu1 %10135, %v11166_v38   ;;  %2592 = vmatprep.subr.bf16.mxu0 %v13979_v42 }
 0x1a8   : > { %9429 = vmatmul.mubr.msk.bf16.gmra.mrb[12].mxu0 %vm9428_vm13, %v13982_v4  ;;  %9561 = vmatmul.mubr.msk.bf16.gmra.mrb[12].mxu1 %vm9560_vm1, %v13982_v4  ;;  %v11370_v22 = vpop.permute.xlu0 %728  ;;  %vm516_vm13 = vcmp.eq.s32.totalorder %v11124_v49, %v11211_v54  ;;  %v13991_v49 = vld [vmem:[#allocation17_spill] sm:$0xff] }
 0x1a9   : > { %9431 = vmatprep.mubr.msk.bf16.mxu0 %vm9430_vm2, %v13982_v4  ;;  %vm9436_vm14 = vmpackc.low %vm517_vm12, %vm516_vm13  ;;  %vm850_vm2 = vcmp.eq.s32.totalorder %v11358_v20, %v11211_v54 }
 0x1aa   : > { %v720_v7 = vpop.permute.xlu1 %719  ;;  %2593 = vmatpush1.bf16.msra.mxu0 %v10927_v27 }
 0x1ab   : > { %1123 = vperm.xlu1 %10135, %v11005_v51   ;;  %2594 = vmatprep.subr.bf16.mxu0 %v13979_v42  ;;  %vm849_vm6 = vcmp.eq.s32.totalorder %v720_v7, %v11211_v54  ;;  %v11502_v7 = vld [vmem:[%s10808_s10 + $0x38] sm:$0xff] }
 0x1ac   : > { %v11380_v25 = vpop.permute.xlu0 %734  ;;  %vm9434_vm9 = vmpackc.low %vm849_vm6, %vm848_vm5 }
 0x1ae   : > { %2595 = vmatpush1.bf16.msra.mxu0 %v10936_v29  ;;  %v11397_v29 = vld [vmem:[%s10808_s10 + $0x120] sm:$0xff] }
 0x1af   : > { %10136 = vset.pattern.permute.xlu1 %v13971_v50  ;;  %v1417_v27 = vpop.permute.xlu1 %1416  ;;  %2596 = vmatprep.subr.bf16.mxu0 %v13979_v42 }
 0x1b0   : > { %vm1524_vm10 = vcmp.eq.s32.totalorder %v1417_v27, %v11211_v54  ;;  %761 = vperm.xlu1 %10136, %v10946_v31   ;;  %9433 = vmatmul.mubr.msk.bf16.gmra.mrb[16].mxu0 %vm9432_vm8, %v13982_v4  ;;  %v11392_v51 = vpop.permute.xlu0 %740  ;;  %vm1527_vm8 = vcmp.eq.s32.totalorder %v13990_v46, %v11211_v54  ;;  %v13999_v46 = vld [vmem:[#allocation26_spill] sm:$0xff] }
 0x1b1   : > { %vm9562_vm11 = vmpackc.low %vm1525_vm7, %vm1524_vm10  ;;  %9435 = vmatprep.mubr.msk.bf16.mxu0 %vm9434_vm9, %v13982_v4 }
 0x1b2   : > { %9563 = vmatprep.mubr.msk.bf16.mxu1 %vm9562_vm11, %v13982_v4  ;;  %2597 = vmatpush1.bf16.msra.mxu0 %v10942_v30  ;;  %vm9440_vm7 = vmpackc.low %vm519_vm3, %vm518_vm4  ;;  %vm1529_vm4 = vcmp.eq.s32.totalorder %v13998_v17, %v11211_v54 }
 0x1b3   : > { %2598 = vmatprep.subr.bf16.mxu0 %v13979_v42 }
 0x1b4   : > { %10137 = vset.pattern.permute.xlu1 %v13974_v40  ;;  %v1085_v31 = vpop.permute.xlu1 %1084  ;;  %v11406_v8 = vpop.permute.xlu0 %746 }
 0x1b5   : > { %1458 = vperm.xlu1 %10137, %v11397_v29   ;;  %vm1192_vm15 = vcmp.eq.s32.totalorder %v1085_v31, %v11211_v54 }
 0x1b6   : > { %2599 = vmatpush1.bf16.msra.mxu0 %v10952_v33 }
 0x1b7   : > { %2600 = vmatprep.subr.bf16.mxu0 %v13979_v42 }
 0x1b8   : > { %v1088_v30 = vpop.permute.xlu1 %1087  ;;  %9437 = vmatmul.mubr.msk.bf16.gmra.mrb[20].mxu0 %vm9436_vm14, %v13982_v4  ;;  %v11412_v9 = vpop.permute.xlu0 %752  ;;  %vm852_vm14 = vcmp.eq.s32.totalorder %v11370_v22, %v11211_v54 }
 0x1b9   : > { %vm1193_vm0 = vcmp.eq.s32.totalorder %v1088_v30, %v11211_v54  ;;  %10138 = vset.pattern.permute.xlu1 %v13976_v18  ;;  %v11510_v30 = vld [vmem:[%s10808_s10 + $0x48] sm:$0xff] }
 0x1ba   : > { %vm9564_vm1 = vmpackc.low %vm1193_vm0, %vm1192_vm15  ;;  %1126 = vperm.xlu1 %10138, %v11397_v29   ;;  %2601 = vmatpush1.bf16.msra.mxu0 %v10962_v36  ;;  %v13989_v36 = vld [vmem:[#allocation16_spill] sm:$0xff]  ;;  %vm521_vm15 = vcmp.eq.s32.totalorder %v13995_v56, %v11211_v54  ;;  %vm520_vm0 = vcmp.eq.s32.totalorder %v13996_v10, %v11211_v54  ;;  %v10274_v56 = vld [vmem:[%s10808_s10 + $0x108] sm:$0xff] }
 0x1bb   : > { %9565 = vmatmul.mubr.msk.bf16.gmra.mrb[16].mxu1 %vm9564_vm1, %v13982_v4  ;;  %2602 = vmatprep.subr.bf16.mxu0 %v13979_v42  ;;  %vm9444_vm3 = vmpackc.low %vm521_vm15, %vm520_vm0  ;;  %vm1531_vm15 = vcmp.eq.s32.totalorder %v11207_v52, %v11211_v54  ;;  %v14001_v10 = vld [vmem:[#allocation28_spill] sm:$0xff] }
 0x1bc   : > { %v11423_v33 = vpop.permute.xlu0 %758 }
 0x1bd   : > { %v726_v13 = vpop.permute.xlu1 %725 }
 0x1be   : > { %vm851_vm5 = vcmp.eq.s32.totalorder %v726_v13, %v11211_v54  ;;  %1129 = vperm.xlu1 %10138, %v13988_v43   ;;  %2603 = vmatpush1.bf16.msra.mxu0 %v13989_v36  ;;  %v11521_v13 = vld [vmem:[%s10808_s10 + $0x148] sm:$0xff] }
 0x1bf   : > { %vm9438_vm6 = vmpackc.low %vm851_vm5, %vm850_vm2  ;;  %2604 = vmatprep.subr.bf16.mxu0 %v13979_v42 }
 0x1c0   : > { %9439 = vmatprep.mubr.msk.bf16.mxu0 %vm9438_vm6, %v13982_v4  ;;  %v11434_v19 = vpop.permute.xlu0 %764 }
 0x1c1   : > { %9441 = vmatmul.mubr.msk.bf16.gmra.mrb[24].mxu0 %vm9440_vm7, %v13982_v4 }
 0x1c2   : > { %10139 = vset.pattern.permute.xlu1 %v13971_v50  ;;  %v1423_v12 = vpop.permute.xlu1 %1422  ;;  %2605 = vmatpush1.bf16.msra.mxu0 %v13991_v49 }
 0x1c3   : > { %vm1526_vm9 = vcmp.eq.s32.totalorder %v1423_v12, %v11211_v54  ;;  %767 = vperm.xlu1 %10139, %v10956_v34   ;;  %2606 = vmatprep.subr.bf16.mxu0 %v13979_v42  ;;  %v11454_v34 = vld [vmem:[%s10808_s10 + $0x180] sm:$0xff]  ;;  %v10556_v12 = vmov 4  }
 0x1c4   : > { %vm9566_vm10 = vmpackc.low %vm1527_vm8, %vm1526_vm9  ;;  %v11444_v53 = vpop.permute.xlu0 %770  ;;  %1494 = vperm.xlu0 %10184, %v11454_v34  }
 0x1c5   : > { %9567 = vmatprep.mubr.msk.bf16.mxu1 %vm9566_vm10, %v13982_v4  ;;  %vm854_vm10 = vcmp.eq.s32.totalorder %v11380_v25, %v11211_v54 }
 0x1c6   : > { %2607 = vmatpush1.bf16.msra.mxu0 %v13992_v1 }
 0x1c7   : > { %10140 = vset.pattern.permute.xlu1 %v13974_v40  ;;  %v1091_v15 = vpop.permute.xlu1 %1090  ;;  %2608 = vmatprep.subr.bf16.mxu0 %v13979_v42 }
 0x1c8   : > { %1464 = vperm.xlu1 %10140, %v11285_v45   ;;  %v11451_v35 = vpop.permute.xlu0 %779  ;;  %vm1194_vm11 = vcmp.eq.s32.totalorder %v1091_v15, %v11211_v54  ;;  %1353 = vperm.xlu0 %10184, %v11466_v3   ;;  %v10269_v15 = vld [vmem:[%s10808_s10 + $0x30] sm:$0xff] }
 0x1ca   : > { %2609 = vmatpush1.bf16.msra.mxu0 %v13993_v2  ;;  %v14000_v2 = vld [vmem:[#allocation27_spill] sm:$0xff] }
 0x1cb   : > { %v1094_v23 = vpop.permute.xlu1 %1093  ;;  %2610 = vmatprep.subr.bf16.mxu0 %v13979_v42 }
 0x1cc   : > { %vm1195_vm12 = vcmp.eq.s32.totalorder %v1094_v23, %v11211_v54  ;;  %10141 = vset.pattern.permute.xlu1 %v13976_v18  ;;  %v11462_v24 = vpop.permute.xlu0 %788  ;;  %1359 = vperm.xlu0 %10184, %v11482_v47   ;;  %v10272_v23 = vld [vmem:[%s10808_s10 + $0x60] sm:$0xff] }
 0x1cd   : > { %vm9568_vm13 = vmpackc.low %vm1195_vm12, %vm1194_vm11  ;;  %1132 = vperm.xlu1 %10141, %v11285_v45  }
 0x1ce   : > { %9569 = vmatmul.mubr.msk.bf16.gmra.mrb[20].mxu1 %vm9568_vm13, %v13982_v4  ;;  %2611 = vmatpush1.bf16.msra.mxu0 %v13994_v26  ;;  %vm523_vm13 = vcmp.eq.s32.totalorder %v13999_v46, %v11211_v54  ;;  %v10273_v26 = vld [vmem:[%s10808_s10 + $0x78] sm:$0xff]  ;;  %v11630_v46 = vld [vmem:[%s10808_s10 + $0x170] sm:$0xff] }
 0x1d0   : > { %v732_v39 = vpop.permute.xlu1 %731  ;;  %v11477_v6 = vpop.permute.xlu0 %797  ;;  %1365 = vperm.xlu0 %10184, %v11493_v32  }
 0x1d1   : > { %vm853_vm1 = vcmp.eq.s32.totalorder %v732_v39, %v11211_v54  ;;  %1135 = vperm.xlu1 %10141, %v13997_v14   ;;  %v14002_v39 = vld [vmem:[#allocation35_spill] sm:$0xff] }
 0x1d2   : > { %vm9442_vm2 = vmpackc.low %vm853_vm1, %vm852_vm14  ;;  %v10275_v14 = vld [vmem:[%s10808_s10 + $0x98] sm:$0xff] }
 0x1d3   : > { %9443 = vmatprep.mubr.msk.bf16.mxu0 %vm9442_vm2, %v13982_v4 }
 0x1d4   : > { %9445 = vmatmul.mubr.msk.bf16.gmra.mrb[28].mxu0 %vm9444_vm3, %v13982_v4  ;;  %v11489_v28 = vpop.permute.xlu0 %812  ;;  %1371 = vperm.xlu0 %10184, %v11502_v7  }
 0x1d5   : > { %10142 = vset.pattern.permute.xlu1 %v13971_v50  ;;  %v1429_v20 = vpop.permute.xlu1 %1428 }
 0x1d6   : > { %vm1528_vm5 = vcmp.eq.s32.totalorder %v1429_v20, %v11211_v54  ;;  %773 = vperm.xlu1 %10142, %v10974_v41  }
 0x1d7   : > { %vm9570_vm6 = vmpackc.low %vm1529_vm4, %vm1528_vm5 }
 0x1d8   : > { %9571 = vmatprep.mubr.msk.bf16.mxu1 %vm9570_vm6, %v13982_v4  ;;  %v11499_v22 = vpop.permute.xlu0 %821  ;;  %1377 = vperm.xlu0 %10184, %v11510_v30   ;;  %vm856_vm6 = vcmp.eq.s32.totalorder %v11392_v51, %v11211_v54 }
 0x1da   : > { %10143 = vset.pattern.permute.xlu1 %v13979_v42  ;;  %v1097_v27 = vpop.permute.xlu1 %1096 }
 0x1db   : > { %438 = vperm.xlu1 %10143, %v11150_v37   ;;  %vm1196_vm7 = vcmp.eq.s32.totalorder %v1097_v27, %v11211_v54 }
 0x1dc   : > { %v11507_v31 = vpop.permute.xlu0 %827  ;;  %10199 = vset.pattern.permute.xlu0 %v10556_v12 }
 0x1dd   : > { %1685 = vperm.xlu0 %10199, %v11466_v3  }
 0x1de   : > { %v1100_v41 = vpop.permute.xlu1 %1099 }
 0x1df   : > { %vm1197_vm8 = vcmp.eq.s32.totalorder %v1100_v41, %v11211_v54  ;;  %10144 = vset.pattern.permute.xlu1 %v13974_v40  ;;  %v14003_v41 = vld [vmem:[#allocation29_spill] sm:$0xff] }
 0x1e0   : > { %vm9572_vm9 = vmpackc.low %vm1197_vm8, %vm1196_vm7  ;;  %1470 = vperm.xlu1 %10144, %v11032_v59   ;;  %v11517_v11 = vpop.permute.xlu0 %833 }
 0x1e1   : > { %9573 = vmatmul.mubr.msk.bf16.gmra.mrb[24].mxu1 %vm9572_vm9, %v13982_v4  ;;  %1700 = vperm.xlu0 %10199, %v10269_v15   ;;  %vm525_vm9 = vcmp.eq.s32.totalorder %v14000_v2, %v11211_v54  ;;  %v11661_v15 = vld [vmem:[%s10808_s10 + $0x158] sm:$0xff] }
 0x1e3   : > { %v738_v43 = vpop.permute.xlu1 %737 }
 0x1e4   : > { %vm855_vm11 = vcmp.eq.s32.totalorder %v738_v43, %v11211_v54  ;;  %1473 = vperm.xlu1 %10144, %v11521_v13   ;;  %v10278_v43 = vld [vmem:[%s10808_s10 + $0xf8] sm:$0xff] }
 0x1e5   : > { %vm9446_vm12 = vmpackc.low %vm855_vm11, %vm854_vm10  ;;  %v403_v36 = vpop.permute.xlu0 %402 }
 0x1e6   : > { %vm522_vm14 = vcmp.eq.s32.totalorder %v403_v36, %v11211_v54  ;;  %9447 = vmatprep.mubr.msk.bf16.mxu0 %vm9446_vm12, %v13982_v4  ;;  %vm1533_vm12 = vcmp.eq.s32.totalorder %v11214_v55, %v11211_v54 }
 0x1e7   : > { %vm9448_vm0 = vmpackc.low %vm523_vm13, %vm522_vm14 }
 0x1e8   : > { %10146 = vset.pattern.permute.xlu1 %v13976_v18  ;;  %v1435_v59 = vpop.permute.xlu1 %1434  ;;  %9449 = vmatmul.mubr.msk.bf16.gmra.mrb[32].mxu0 %vm9448_vm0, %v13982_v4 }
 0x1e9   : > { %vm1530_vm1 = vcmp.eq.s32.totalorder %v1435_v59, %v11211_v54  ;;  %1141 = vperm.xlu1 %10146, %v11521_v13   ;;  %v409_v49 = vpop.permute.xlu0 %408  ;;  %v14005_v59 = vld [vmem:[#allocation30_spill] sm:$0xff] }
 0x1ea   : > { %vm9574_vm2 = vmpackc.low %vm1531_vm15, %vm1530_vm1  ;;  %vm524_vm7 = vcmp.eq.s32.totalorder %v409_v49, %v11211_v54  ;;  %v11654_v49 = vld [vmem:[%s10808_s10 + $0x140] sm:$0xff] }
 0x1eb   : > { %9575 = vmatprep.mubr.msk.bf16.mxu1 %vm9574_vm2, %v13982_v4  ;;  %vm9452_vm11 = vmpackc.low %vm525_vm9, %vm524_vm7  ;;  %vm858_vm2 = vcmp.eq.s32.totalorder %v11406_v8, %v11211_v54 }
 0x1ed   : > { %10147 = vset.pattern.permute.xlu1 %v13971_v50  ;;  %v1103_v25 = vpop.permute.xlu1 %1102 }
 0x1ee   : > { %776 = vperm.xlu1 %10147, %v11254_v60   ;;  %vm1198_vm3 = vcmp.eq.s32.totalorder %v1103_v25, %v11211_v54  ;;  %v11644_v25 = vld [vmem:[%s10808_s10 + $0x138] sm:$0xff] }
 0x1f1   : > { %v1106_v52 = vpop.permute.xlu1 %1105 }
 0x1f2   : > { %vm1199_vm4 = vcmp.eq.s32.totalorder %v1106_v52, %v11211_v54  ;;  %10148 = vset.pattern.permute.xlu1 %v13979_v42 }
 0x1f3   : > { %vm9576_vm5 = vmpackc.low %vm1199_vm4, %vm1198_vm3  ;;  %444 = vperm.xlu1 %10148, %v11254_v60   ;;  %v10270_v60 = vld [vmem:[%s10808_s10 + $0x40] sm:$0xff] }
 0x1f4   : > { %9577 = vmatmul.mubr.msk.bf16.gmra.mrb[28].mxu1 %vm9576_vm5, %v13982_v4  ;;  %1706 = vperm.xlu0 %10199, %v10270_v60   ;;  %vm527_vm5 = vcmp.eq.s32.totalorder %v14001_v10, %v11211_v54  ;;  %v11699_v10 = vld [vmem:[%s10808_s10 + $0x68] sm:$0xff] }
 0x1f6   : > { %v744_v1 = vpop.permute.xlu1 %743 }
 0x1f7   : > { %vm857_vm8 = vcmp.eq.s32.totalorder %v744_v1, %v11211_v54  ;;  %447 = vperm.xlu1 %10148, %v10984_v44   ;;  %v11565_v44 = vld [vmem:[%s10808_s10 + $0x58] sm:$0xff] }
 0x1f8   : > { %vm9450_vm10 = vmpackc.low %vm857_vm8, %vm856_vm6  ;;  %1715 = vperm.xlu0 %10199, %v11565_v44   ;;  %vm1535_vm8 = vcmp.eq.s32.totalorder %v14002_v39, %v11211_v54 }
 0x1f9   : > { %9451 = vmatprep.mubr.msk.bf16.mxu0 %vm9450_vm10, %v13982_v4 }
 0x1fa   : > { %9453 = vmatmul.mubr.msk.bf16.gmra.mrb[36].mxu0 %vm9452_vm11, %v13982_v4 }
 0x1fb   : > { %10149 = vset.pattern.permute.xlu1 %v13974_v40  ;;  %v1441_v51 = vpop.permute.xlu1 %1440 }
 0x1fc   : > { %vm1532_vm13 = vcmp.eq.s32.totalorder %v1441_v51, %v11211_v54  ;;  %1479 = vperm.xlu1 %10149, %v11040_v61   ;;  %1718 = vperm.xlu0 %10199, %v10272_v23   ;;  %v415_v61 = vpop.permute.xlu0 %414  ;;  %v11678_v23 = vld [vmem:[%s10808_s10 + $0x128] sm:$0xff] }
 0x1fd   : > { %vm9578_vm14 = vmpackc.low %vm1533_vm12, %vm1532_vm13  ;;  %vm526_vm3 = vcmp.eq.s32.totalorder %v415_v61, %v11211_v54 }
 0x1fe   : > { %9579 = vmatprep.mubr.msk.bf16.mxu1 %vm9578_vm14, %v13982_v4  ;;  %vm9456_vm7 = vmpackc.low %vm527_vm5, %vm526_vm3  ;;  %vm860_vm14 = vcmp.eq.s32.totalorder %v11412_v9, %v11211_v54 }
 0x200   : > { %10150 = vset.pattern.permute.xlu1 %v13976_v18  ;;  %v1109_v55 = vpop.permute.xlu1 %1108  ;;  %1727 = vperm.xlu0 %10199, %v10273_v26   ;;  %v421_v27 = vpop.permute.xlu0 %420  ;;  %v14008_v26 = vld [vmem:[#allocation37_spill] sm:$0xff] }
 0x201   : > { %1144 = vperm.xlu1 %10150, %v11182_v62   ;;  %vm1200_vm15 = vcmp.eq.s32.totalorder %v1109_v55, %v11211_v54 }
 0x204   : > { %v1112_v3 = vpop.permute.xlu1 %1111  ;;  %1730 = vperm.xlu0 %10199, %v11029_v58   ;;  %v11594_v58 = vld [vmem:[%s10808_s10 + $0x160] sm:$0xff]  ;;  %v427_v36 = vpop.permute.xlu0 %426 }
 0x205   : > { %vm1201_vm0 = vcmp.eq.s32.totalorder %v1112_v3, %v11211_v54  ;;  %10151 = vset.pattern.permute.xlu1 %v13971_v50  ;;  %v14007_v3 = vld [vmem:[#allocation31_spill] sm:$0xff] }
 0x206   : > { %vm9580_vm1 = vmpackc.low %vm1201_vm0, %vm1200_vm15  ;;  %782 = vperm.xlu1 %10151, %v11269_v63   ;;  %vm528_vm15 = vcmp.eq.s32.totalorder %v421_v27, %v11211_v54 }
 0x207   : > { %9581 = vmatmul.mubr.msk.bf16.gmra.mrb[32].mxu1 %vm9580_vm1, %v13982_v4  ;;  %vm529_vm1 = vcmp.eq.s32.totalorder %v14003_v41, %v11211_v54  ;;  %v10242_v41 = vld [vmem:[#allocation5 + $0x100] sm:$0xff]  }
 0x208   : > { %1739 = vperm.xlu0 %10199, %v10275_v14   ;;  %vm9460_vm3 = vmpackc.low %vm529_vm1, %vm528_vm15  ;;  %v433_v60 = vpop.permute.xlu0 %432  ;;  %9773 = vmatprep.subr.bf16.mxu1 %v10242_v41 }
 0x209   : > { %v750_v62 = vpop.permute.xlu1 %749  ;;  %9774 = vmatpush3.bf16.msra.mxu1 %v10242_v41  ;;  %v14010_v41 = vld [vmem:[#allocation39_spill] sm:$0xff] }
 0x20a   : > { %vm859_vm4 = vcmp.eq.s32.totalorder %v750_v62, %v11211_v54  ;;  %785 = vperm.xlu1 %10151, %v10274_v56  }
 0x20b   : > { %vm9454_vm6 = vmpackc.low %vm859_vm4, %vm858_vm2  ;;  %vm1537_vm4 = vcmp.eq.s32.totalorder %v11228_v21, %v11211_v54 }
 0x20c   : > { %9455 = vmatprep.mubr.msk.bf16.mxu0 %vm9454_vm6, %v13982_v4  ;;  %1748 = vperm.xlu0 %10199, %v11110_v16   ;;  %v10276_v16 = vld [vmem:[%s10808_s10 + $0xd8] sm:$0xff] }
 0x20d   : > { %9457 = vmatmul.mubr.msk.bf16.gmra.mrb[40].mxu0 %vm9456_vm7, %v13982_v4 }
 0x20e   : > { %10152 = vset.pattern.permute.xlu1 %v13979_v42  ;;  %v1447_v8 = vpop.permute.xlu1 %1446 }
 0x20f   : > { %vm1534_vm9 = vcmp.eq.s32.totalorder %v1447_v8, %v11211_v54  ;;  %453 = vperm.xlu1 %10152, %v10274_v56   ;;  %v11694_v56 = vld [vmem:[%s10808_s10 + $0x188] sm:$0xff]  ;;  %v442_v8 = vpop.permute.xlu0 %441 }
 0x210   : > { %vm9582_vm10 = vmpackc.low %vm1535_vm8, %vm1534_vm9  ;;  %1754 = vperm.xlu0 %10199, %v11133_v57  }
 0x211   : > { %9583 = vmatprep.mubr.msk.bf16.mxu1 %vm9582_vm10, %v13982_v4  ;;  %vm862_vm10 = vcmp.eq.s32.totalorder %v11423_v33, %v11211_v54  ;;  %v14006_v33 = vld [vmem:[#allocation36_spill] sm:$0xff] }
 0x213   : > { %10153 = vset.pattern.permute.xlu1 %v13974_v40  ;;  %v1115_v17 = vpop.permute.xlu1 %1114  ;;  %v11711_v14 = vpop.permute.xlu0 %450 }
 0x214   : > { %1482 = vperm.xlu1 %10153, %v11594_v58   ;;  %vm1202_vm11 = vcmp.eq.s32.totalorder %v1115_v17, %v11211_v54  ;;  %1763 = vperm.xlu0 %10199, %v10276_v16  }
 0x217   : > { %v1118_v20 = vpop.permute.xlu1 %1117 }
 0x218   : > { %vm1203_vm12 = vcmp.eq.s32.totalorder %v1118_v20, %v11211_v54  ;;  %10154 = vset.pattern.permute.xlu1 %v13976_v18  ;;  %1766 = vperm.xlu0 %10199, %v11150_v37  }
 0x219   : > { %vm9584_vm13 = vmpackc.low %vm1203_vm12, %vm1202_vm11  ;;  %1150 = vperm.xlu1 %10154, %v11594_v58   ;;  %vm530_vm11 = vcmp.eq.s32.totalorder %v427_v36, %v11211_v54  ;;  %v10244_v36 = vld [vmem:[#allocation5 + $0x110] sm:$0xff]  }
 0x21a   : > { %9585 = vmatmul.mubr.msk.bf16.gmra.mrb[36].mxu1 %vm9584_vm13, %v13982_v4  ;;  %vm531_vm13 = vcmp.eq.s32.totalorder %v14005_v59, %v11211_v54 }
 0x21b   : > { %vm9464_vm15 = vmpackc.low %vm531_vm13, %vm530_vm11 }
 0x21c   : > { %v756_v57 = vpop.permute.xlu1 %755  ;;  %1775 = vperm.xlu0 %10199, %v10278_v43   ;;  %v11733_v43 = vld [vmem:[%s10808_s10 + $0x190] sm:$0xff] }
 0x21d   : > { %vm861_vm0 = vcmp.eq.s32.totalorder %v756_v57, %v11211_v54  ;;  %1153 = vperm.xlu1 %10154, %v11192_v48   ;;  %v10277_v48 = vld [vmem:[%s10808_s10 + $0x118] sm:$0xff]  ;;  %v11723_v57 = vpop.permute.xlu0 %459 }
 0x21e   : > { %vm9458_vm2 = vmpackc.low %vm861_vm0, %vm860_vm14  ;;  %vm1539_vm0 = vcmp.eq.s32.totalorder %v14006_v33, %v11211_v54  ;;  %v10245_v33 = vld [vmem:[#allocation5 + $0x118] sm:$0xff]  }
 0x21f   : > { %9459 = vmatprep.mubr.msk.bf16.mxu0 %vm9458_vm2, %v13982_v4 }
 0x220   : > { %9461 = vmatmul.mubr.msk.bf16.gmra.mrb[44].mxu0 %vm9460_vm3, %v13982_v4  ;;  %1778 = vperm.xlu0 %10199, %v11269_v63   ;;  %v14004_v63 = vld [vmem:[#allocation34_spill] sm:$0xff] }
 0x221   : > { %10155 = vset.pattern.permute.xlu1 %v13971_v50  ;;  %v1453_v9 = vpop.permute.xlu1 %1452 }
 0x222   : > { %vm1536_vm5 = vcmp.eq.s32.totalorder %v1453_v9, %v11211_v54  ;;  %791 = vperm.xlu1 %10155, %v10277_v48  }
 0x223   : > { %vm9586_vm6 = vmpackc.low %vm1537_vm4, %vm1536_vm5 }
 0x224   : > { %9587 = vmatprep.mubr.msk.bf16.mxu1 %vm9586_vm6, %v13982_v4  ;;  %1787 = vperm.xlu0 %10199, %v10277_v48   ;;  %vm864_vm6 = vcmp.eq.s32.totalorder %v11434_v19, %v11211_v54  ;;  %v11730_v48 = vpop.permute.xlu0 %468 }
 0x226   : > { %10156 = vset.pattern.permute.xlu1 %v13979_v42  ;;  %v1121_v37 = vpop.permute.xlu1 %1120 }
 0x227   : > { %456 = vperm.xlu1 %10156, %v11166_v38   ;;  %vm1204_vm7 = vcmp.eq.s32.totalorder %v1121_v37, %v11211_v54  ;;  %v10243_v37 = vld [vmem:[#allocation5 + $0x108] sm:$0xff]  }
 0x228   : > { %1790 = vperm.xlu0 %10199, %v11397_v29   ;;  %9775 = vmatprep.subr.bf16.mxu1 %v10243_v37 }
 0x229   : > { %9776 = vmatpush3.bf16.msra.mxu1 %v10243_v37  ;;  %v11790_v37 = vld [vmem:[%s10808_s10 + $0x150] sm:$0xff] }
 0x22a   : > { %v1124_v21 = vpop.permute.xlu1 %1123  ;;  %9777 = vmatprep.subr.bf16.mxu1 %v10244_v36 }
 0x22b   : > { %vm1205_vm8 = vcmp.eq.s32.totalorder %v1124_v21, %v11211_v54  ;;  %10157 = vset.pattern.permute.xlu1 %v13974_v40 }
 0x22c   : > { %vm9588_vm9 = vmpackc.low %vm1205_vm8, %vm1204_vm7  ;;  %1488 = vperm.xlu1 %10157, %v11630_v46   ;;  %1799 = vperm.xlu0 %10199, %v11644_v25   ;;  %vm532_vm7 = vcmp.eq.s32.totalorder %v433_v60, %v11211_v54  ;;  %v10246_v60 = vld [vmem:[#allocation5 + $0x120] sm:$0xff]  }
 0x22d   : > { %9589 = vmatmul.mubr.msk.bf16.gmra.mrb[40].mxu1 %vm9588_vm9, %v13982_v4  ;;  %vm533_vm9 = vcmp.eq.s32.totalorder %v14007_v3, %v11211_v54 }
 0x22e   : > { %vm9468_vm11 = vmpackc.low %vm533_vm9, %vm532_vm7  ;;  %9778 = vmatpush3.bf16.msra.mxu1 %v10244_v36 }
 0x22f   : > { %v762_v38 = vpop.permute.xlu1 %761  ;;  %9779 = vmatprep.subr.bf16.mxu1 %v10245_v33 }
 0x230   : > { %vm863_vm12 = vcmp.eq.s32.totalorder %v762_v38, %v11211_v54  ;;  %1491 = vperm.xlu1 %10157, %v14004_v63   ;;  %1802 = vperm.xlu0 %10199, %v11654_v49   ;;  %v11740_v38 = vpop.permute.xlu0 %474 }
 0x231   : > { %vm9462_vm14 = vmpackc.low %vm863_vm12, %vm862_vm10  ;;  %vm1541_vm12 = vcmp.eq.s32.totalorder %v14008_v26, %v11211_v54  ;;  %v10248_v26 = vld [vmem:[#allocation5 + $0x130] sm:$0xff]  }
 0x232   : > { %9463 = vmatprep.mubr.msk.bf16.mxu0 %vm9462_vm14, %v13982_v4  ;;  %9780 = vmatpush3.bf16.msra.mxu1 %v10245_v33 }
 0x233   : > { %9465 = vmatmul.mubr.msk.bf16.gmra.mrb[48].mxu0 %vm9464_vm15, %v13982_v4  ;;  %9781 = vmatprep.subr.bf16.mxu1 %v10246_v60 }
 0x234   : > { %10158 = vset.pattern.permute.xlu1 %v13976_v18  ;;  %v1459_v52 = vpop.permute.xlu1 %1458  ;;  %1811 = vperm.xlu0 %10199, %v11661_v15  }
 0x235   : > { %vm1538_vm1 = vcmp.eq.s32.totalorder %v1459_v52, %v11211_v54  ;;  %1159 = vperm.xlu1 %10158, %v14004_v63  }
 0x236   : > { %vm9590_vm2 = vmpackc.low %vm1539_vm0, %vm1538_vm1  ;;  %9782 = vmatpush3.bf16.msra.mxu1 %v10246_v60 }
 0x237   : > { %9591 = vmatprep.mubr.msk.bf16.mxu1 %vm9590_vm2, %v13982_v4  ;;  %vm866_vm2 = vcmp.eq.s32.totalorder %v11444_v53, %v11211_v54 }
 0x238   : > { %1814 = vperm.xlu0 %10199, %v11594_v58  }
 0x239   : > { %10159 = vset.pattern.permute.xlu1 %v13971_v50  ;;  %v1127_v1 = vpop.permute.xlu1 %1126 }
 0x23a   : > { %794 = vperm.xlu1 %10159, %v11397_v29   ;;  %vm1206_vm3 = vcmp.eq.s32.totalorder %v1127_v1, %v11211_v54 }
 0x23c   : > { %1823 = vperm.xlu0 %10199, %v14004_v63   ;;  %v14009_v63 = vld [vmem:[#allocation38_spill] sm:$0xff] }
 0x23d   : > { %v1130_v2 = vpop.permute.xlu1 %1129 }
 0x23e   : > { %vm1207_vm4 = vcmp.eq.s32.totalorder %v1130_v2, %v11211_v54  ;;  %10160 = vset.pattern.permute.xlu1 %v13979_v42  ;;  %v11752_v2 = vpop.permute.xlu0 %483 }
 0x23f   : > { %vm9592_vm5 = vmpackc.low %vm1207_vm4, %vm1206_vm3  ;;  %462 = vperm.xlu1 %10160, %v11397_v29  }
 0x240   : > { %9593 = vmatmul.mubr.msk.bf16.gmra.mrb[44].mxu1 %vm9592_vm5, %v13982_v4  ;;  %10205 = vset.pattern.permute.xlu0 %v13974_v40  ;;  %vm535_vm5 = vcmp.eq.s32.totalorder %v442_v8, %v11211_v54  ;;  %v10249_v8 = vld [vmem:[#allocation5 + $0x138] sm:$0xff]  }
 0x241   : > { %1383 = vperm.xlu0 %10205, %v11565_v44  }
 0x242   : > { %v768_v51 = vpop.permute.xlu1 %767  ;;  %v11673_v55 = vpop.f32.mrb[0].mxu1 }
 0x243   : > { %vm865_vm8 = vcmp.eq.s32.totalorder %v768_v51, %v11211_v54  ;;  %465 = vperm.xlu1 %10160, %v11678_v23   ;;  %v2672_v29 = vpop.f32.mrb[1].mxu1  ;;  %v11760_v3 = vpop.permute.xlu0 %504 }
 0x244   : > { %vm9466_vm10 = vmpackc.low %vm865_vm8, %vm864_vm6  ;;  %v11683_v19 = vpop.f32.mrb[2].mxu1  ;;  %v10247_v29 = vld [vmem:[#allocation5 + $0x128] sm:$0xff]  }
 0x245   : > { %9467 = vmatprep.mubr.msk.bf16.mxu0 %vm9466_vm10, %v13982_v4  ;;  %v2675_v61 = vpop.f32.mrb[3].mxu1  ;;  %1389 = vperm.xlu0 %10205, %v11699_v10  }
 0x246   : > { %9469 = vmatmul.mubr.msk.bf16.gmra.mrb[52].mxu0 %vm9468_vm11, %v13982_v4  ;;  %vm1210_vm11 = vcmp.eq.s32.totalorder %v14009_v63, %v11211_v54  ;;  %9783 = vmatprep.subr.bf16.mxu1 %v10247_v29  ;;  %v11764_v61 = vld [vmem:[%s10808_s10] sm:$0xff] }
 0x247   : > { %10161 = vset.pattern.permute.xlu1 %v13974_v40  ;;  %v1465_v62 = vpop.permute.xlu1 %1464  ;;  %9784 = vmatpush3.bf16.msra.mxu1 %v10247_v29 }
 0x248   : > { %vm1540_vm13 = vcmp.eq.s32.totalorder %v1465_v62, %v11211_v54  ;;  %1497 = vperm.xlu1 %10161, %v11694_v56   ;;  %9785 = vmatprep.subr.bf16.mxu1 %v10248_v26  ;;  %v11770_v62 = vld [vmem:[%s10808_s10 + $0x10] sm:$0xff] }
 0x249   : > { %vm9594_vm14 = vmpackc.low %vm1541_vm12, %vm1540_vm13  ;;  %10208 = vset.pattern.permute.xlu0 %v10556_v12 }
 0x24a   : > { %9595 = vmatprep.mubr.msk.bf16.mxu1 %vm9594_vm14, %v13982_v4  ;;  %1826 = vperm.xlu0 %10208, %v11454_v34   ;;  %vm869_vm14 = vcmp.eq.s32.totalorder %v11451_v35, %v11211_v54 }
 0x24b   : > { %9786 = vmatpush3.bf16.msra.mxu1 %v10248_v26 }
 0x24c   : > { %10162 = vset.pattern.permute.xlu1 %v13976_v18  ;;  %v1133_v39 = vpop.permute.xlu1 %1132  ;;  %9787 = vmatprep.subr.bf16.mxu1 %v10249_v8 }
 0x24d   : > { %1162 = vperm.xlu1 %10162, %v11454_v34   ;;  %vm1208_vm15 = vcmp.eq.s32.totalorder %v1133_v39, %v11211_v54  ;;  %v1477_v39 = vpop.permute.xlu0 %1476 }
 0x24f   : > { %9788 = vmatpush3.bf16.msra.mxu1 %v10249_v8 }
 0x250   : > { %v1136_v44 = vpop.permute.xlu1 %1135 }
 0x251   : > { %vm1209_vm0 = vcmp.eq.s32.totalorder %v1136_v44, %v11211_v54  ;;  %10163 = vset.pattern.permute.xlu1 %v13971_v50  ;;  %v1486_v33 = vpop.permute.xlu0 %1485 }
 0x252   : > { %vm9596_vm1 = vmpackc.low %vm1209_vm0, %vm1208_vm15  ;;  %800 = vperm.xlu1 %10163, %v11285_v45  }
 0x253   : > { %9597 = vmatmul.mubr.msk.bf16.gmra.mrb[48].mxu1 %vm9596_vm1, %v13982_v4 }
 0x255   : > { %v774_v17 = vpop.permute.xlu1 %773  ;;  %v11715_v20 = vpop.f32.mrb[4].mxu1 }
 0x256   : > { %vm867_vm3 = vcmp.eq.s32.totalorder %v774_v17, %v11211_v54  ;;  %803 = vperm.xlu1 %10163, %v11644_v25   ;;  %v2680_v27 = vpop.f32.mrb[5].mxu1 }
 0x257   : > { %vm9470_vm4 = vmpackc.low %vm867_vm3, %vm866_vm2  ;;  %v11719_v16 = vpop.f32.mrb[6].mxu1 }
 0x258   : > { %9471 = vmatprep.mubr.msk.bf16.mxu0 %vm9470_vm4, %v13982_v4  ;;  %v2683_v45 = vpop.f32.mrb[7].mxu1  ;;  %vm1544_vm4 = vcmp.eq.s32.totalorder %v1477_v39, %v11211_v54 }
 0x25a   : > { %10164 = vset.pattern.permute.xlu1 %v13979_v42  ;;  %v439_v53 = vpop.permute.xlu1 %438 }
 0x25b   : > { %vm534_vm6 = vcmp.eq.s32.totalorder %v439_v53, %v11211_v54  ;;  %471 = vperm.xlu1 %10164, %v11644_v25  }
 0x25c   : > { %vm9472_vm7 = vmpackc.low %vm535_vm5, %vm534_vm6 }
 0x25d   : > { %9473 = vmatmul.mubr.msk.bf16.gmra.mrb[56].mxu0 %vm9472_vm7, %v13982_v4  ;;  %vm1213_vm7 = vcmp.eq.s32.totalorder %v14010_v41, %v11211_v54 }
 0x25f   : > { %10165 = vset.pattern.permute.xlu1 %v13974_v40  ;;  %v1471_v9 = vpop.permute.xlu1 %1470 }
 0x260   : > { %1500 = vperm.xlu1 %10165, %v11733_v43   ;;  %vm1542_vm8 = vcmp.eq.s32.totalorder %v1471_v9, %v11211_v54 }
 0x263   : > { %v1474_v21 = vpop.permute.xlu1 %1473 }
 0x264   : > { %vm1543_vm9 = vcmp.eq.s32.totalorder %v1474_v21, %v11211_v54  ;;  %10167 = vset.pattern.permute.xlu1 %v13971_v50 }
 0x265   : > { %vm9598_vm10 = vmpackc.low %vm1543_vm9, %vm1542_vm8  ;;  %806 = vperm.xlu1 %10167, %v11654_v49  }
 0x266   : > { %9599 = vmatprep.mubr.msk.bf16.mxu1 %vm9598_vm10, %v13982_v4 }
 0x268   : > { %v1142_v59 = vpop.permute.xlu1 %1141  ;;  %v11745_v25 = vpop.f32.mrb[8].mxu1 }
 0x269   : > { %vm1211_vm12 = vcmp.eq.s32.totalorder %v1142_v59, %v11211_v54  ;;  %809 = vperm.xlu1 %10167, %v11521_v13   ;;  %v2688_v52 = vpop.f32.mrb[9].mxu1 }
 0x26a   : > { %vm9600_vm13 = vmpackc.low %vm1211_vm12, %vm1210_vm11  ;;  %v11749_v49 = vpop.f32.mrb[10].mxu1 }
 0x26b   : > { %v2691_v1 = vpop.f32.mrb[11].mxu1  ;;  %9601 = vmatmul.mubr.msk.bf16.gmra.mrb[52].mxu1 %vm9600_vm13, %v13982_v4  ;;  %vm538_vm13 = vcmp.eq.s32.totalorder %v11711_v14, %v11211_v54 }
 0x26d   : > { %10168 = vset.pattern.permute.xlu1 %v13979_v42  ;;  %v777_v51 = vpop.permute.xlu1 %776 }
 0x26e   : > { %vm868_vm15 = vcmp.eq.s32.totalorder %v777_v51, %v11211_v54  ;;  %477 = vperm.xlu1 %10168, %v11521_v13  }
 0x26f   : > { %vm9474_vm0 = vmpackc.low %vm869_vm14, %vm868_vm15 }
 0x270   : > { %9475 = vmatprep.mubr.msk.bf16.mxu0 %vm9474_vm0, %v13982_v4  ;;  %vm1547_vm0 = vcmp.eq.s32.totalorder %v1486_v33, %v11211_v54 }
 0x272   : > { %10169 = vset.pattern.permute.xlu1 %v10556_v12  ;;  %v445_v35 = vpop.permute.xlu1 %444 }
 0x273   : > { %1682 = vperm.xlu1 %10169, %v11764_v61   ;;  %vm536_vm1 = vcmp.eq.s32.totalorder %v445_v35, %v11211_v54 }
 0x276   : > { %v448_v13 = vpop.permute.xlu1 %447 }
 0x277   : > { %vm537_vm2 = vcmp.eq.s32.totalorder %v448_v13, %v11211_v54  ;;  %1688 = vperm.xlu1 %10169, %v11770_v62  }
 0x278   : > { %vm9476_vm3 = vmpackc.low %vm537_vm2, %vm536_vm1 }
 0x279   : > { %9477 = vmatmul.mubr.msk.bf16.gmra.mrb[60].mxu0 %vm9476_vm3, %v13982_v4 }
 0x27b   : > { %v1480_v44 = vpop.permute.xlu1 %1479  ;;  %1691 = vperm.xlu1 %10169, %v11482_v47   ;;  %v11776_v17 = vpop.f32.mrb[12].mxu1 }
 0x27c   : > { %vm1545_vm5 = vcmp.eq.s32.totalorder %v1480_v44, %v11211_v54  ;;  %v2696_v27 = vpop.f32.mrb[13].mxu1 }
 0x27d   : > { %vm9602_vm6 = vmpackc.low %vm1545_vm5, %vm1544_vm4  ;;  %v11779_v45 = vpop.f32.mrb[14].mxu1  ;;  %v11842_v27 = vld [vmem:[%s10808_s10 + $0x50] sm:$0xff] }
 0x27e   : > { %v2699_v53 = vpop.f32.mrb[15].mxu1  ;;  %9603 = vmatprep.mubr.msk.bf16.mxu1 %vm9602_vm6, %v13982_v4  ;;  %vm872_vm6 = vcmp.eq.s32.totalorder %v11462_v24, %v11211_v54  ;;  %v11837_v24 = vld [vmem:[#allocation7] ss:$0 sm:$0xff] }
 0x27f   : > { %10170 = vset.pattern.permute.xlu1 %v13971_v50 }
 0x280   : > { %v1145_v47 = vpop.permute.xlu1 %1144  ;;  %815 = vperm.xlu1 %10170, %v11661_v15   ;;  %v11797_v15 = vld [vmem:[%s10808_s10 + $0x20] sm:$0xff] }
 0x281   : > { %vm1212_vm8 = vcmp.eq.s32.totalorder %v1145_v47, %v11211_v54 }
 0x282   : > { %vm9604_vm9 = vmpackc.low %vm1213_vm7, %vm1212_vm8 }
 0x283   : > { %9605 = vmatmul.mubr.msk.bf16.gmra.mrb[56].mxu1 %vm9604_vm9, %v13982_v4  ;;  %vm541_vm9 = vcmp.eq.s32.totalorder %v11723_v57, %v11211_v54 }
 0x284   : > { %10171 = vset.pattern.permute.xlu1 %v13979_v42 }
 0x285   : > { %v783_v9 = vpop.permute.xlu1 %782  ;;  %480 = vperm.xlu1 %10171, %v11790_v37  }
 0x286   : > { %vm870_vm10 = vcmp.eq.s32.totalorder %v783_v9, %v11211_v54 }
 0x289   : > { %v786_v21 = vpop.permute.xlu1 %785  ;;  %10172 = vset.pattern.permute.xlu1 %v10556_v12 }
 0x28a   : > { %vm871_vm11 = vcmp.eq.s32.totalorder %v786_v21, %v11211_v54  ;;  %1694 = vperm.xlu1 %10172, %v11797_v15  }
 0x28b   : > { %vm9478_vm12 = vmpackc.low %vm871_vm11, %vm870_vm10 }
 0x28c   : > { %9479 = vmatprep.mubr.msk.bf16.mxu0 %vm9478_vm12, %v13982_v4 }
 0x28e   : > { %v454_v36 = vpop.permute.xlu1 %453  ;;  %1697 = vperm.xlu1 %10172, %v11493_v32   ;;  %v11804_v63 = vpop.f32.mrb[16].mxu1 }
 0x28f   : > { %vm539_vm14 = vcmp.eq.s32.totalorder %v454_v36, %v11211_v54  ;;  %v2704_v59 = vpop.f32.mrb[17].mxu1 }
 0x290   : > { %vm9480_vm15 = vmpackc.low %vm539_vm14, %vm538_vm13  ;;  %v11807_v52 = vpop.f32.mrb[18].mxu1 }
 0x291   : > { %9481 = vmatmul.mubr.msk.bf16.gmra.mrb[64].mxu0 %vm9480_vm15, %v13982_v4  ;;  %v2707_v1 = vpop.f32.mrb[19].mxu1 }
 0x292   : > { %1703 = vperm.xlu1 %10172, %v11502_v7   ;;  %v11824_v7 = vld [vmem:[%s10808_s10 + $0x168] sm:$0xff]  ;;  %v10293_v1 = vld [vmem:[%s10808_s10 + $0x178] sm:$0xff] }
 0x293   : > { %v1483_v14 = vpop.permute.xlu1 %1482 }
 0x294   : > { %vm1546_vm1 = vcmp.eq.s32.totalorder %v1483_v14, %v11211_v54 }
 0x295   : > { %vm9606_vm2 = vmpackc.low %vm1547_vm0, %vm1546_vm1 }
 0x296   : > { %10173 = vset.pattern.permute.xlu1 %v13971_v50  ;;  %9607 = vmatprep.mubr.msk.bf16.mxu1 %vm9606_vm2, %v13982_v4  ;;  %vm875_vm2 = vcmp.eq.s32.totalorder %v11477_v6, %v11211_v54 }
 0x297   : > { %818 = vperm.xlu1 %10173, %v11594_v58  }
 0x298   : > { %v1151_v32 = vpop.permute.xlu1 %1150 }
 0x299   : > { %vm1214_vm3 = vcmp.eq.s32.totalorder %v1151_v32, %v11211_v54 }
 0x29b   : > { %10174 = vset.pattern.permute.xlu1 %v13979_v42 }
 0x29c   : > { %v1154_v60 = vpop.permute.xlu1 %1153  ;;  %486 = vperm.xlu1 %10174, %v11594_v58  }
 0x29d   : > { %vm1215_vm4 = vcmp.eq.s32.totalorder %v1154_v60, %v11211_v54 }
 0x29e   : > { %vm9608_vm5 = vmpackc.low %vm1215_vm4, %vm1214_vm3 }
 0x29f   : > { %9609 = vmatmul.mubr.msk.bf16.gmra.mrb[60].mxu1 %vm9608_vm5, %v13982_v4 }
 0x2a0   : > { %489 = vperm.xlu1 %10174, %v11824_v7  }
 0x2a1   : > { %v792_v51 = vpop.permute.xlu1 %791  ;;  %v11827_v29 = vpop.f32.mrb[20].mxu1 }
 0x2a2   : > { %vm873_vm7 = vcmp.eq.s32.totalorder %v792_v51, %v11211_v54  ;;  %v2712_v58 = vpop.f32.mrb[21].mxu1 }
 0x2a3   : > { %vm9482_vm8 = vmpackc.low %vm873_vm7, %vm872_vm6  ;;  %v11830_v35 = vpop.f32.mrb[22].mxu1 }
 0x2a4   : > { %10175 = vset.pattern.permute.xlu1 %v10556_v12  ;;  %9483 = vmatprep.mubr.msk.bf16.mxu0 %vm9482_vm8, %v13982_v4  ;;  %v2715_v26 = vpop.f32.mrb[23].mxu1 }
 0x2a5   : > { %1709 = vperm.xlu1 %10175, %v11510_v30  }
 0x2a6   : > { %v457_v13 = vpop.permute.xlu1 %456 }
 0x2a7   : > { %vm540_vm10 = vcmp.eq.s32.totalorder %v457_v13, %v11211_v54  ;;  %v2430_v39 = vpop.f32.mrb[28].mxu0 }
 0x2a8   : > { %vm9484_vm11 = vmpackc.low %vm541_vm9, %vm540_vm10  ;;  %v2431_v8 = vadd.f32 %v11837_v24, %v2430_v39  ;;  %v2432_v44 = vpop.f32.mrb[29].mxu0 }
 0x2a9   : > { %1712 = vperm.xlu1 %10175, %v11842_v27   ;;  %v2433_v53 = vpop.f32.mrb[30].mxu0  ;;  %9485 = vmatmul.mubr.msk.bf16.gmra.mrb[68].mxu0 %vm9484_vm11, %v13982_v4  ;;  %vm1219_vm11 = vcmp.eq.s32.totalorder %v11273_v5, %v11211_v54 }
 0x2aa   : > { %v2434_v57 = vadd.f32 %v11837_v24, %v2433_v53  ;;  %v2435_v30 = vpop.f32.mrb[31].mxu0  ;;  %v11848_v41 = vadd.f32 %v11673_v55, %v2431_v8  ;;  %v14011_v55 = vld [vmem:[#allocation40_spill] sm:$0xff] }
 0x2ab   : > { %v1489_v47 = vpop.permute.xlu1 %1488  ;;  %vm1216_vm15 = vcmp.eq.s32.totalorder %v14011_v55, %v11211_v54  ;;  %v10294_v8 = vld [vmem:[%s10808_s10 + $0x70] sm:$0xff] }
 0x2ac   : > { %v11851_v9 = vadd.f32 %v11683_v19, %v2434_v57  ;;  %vm1548_vm12 = vcmp.eq.s32.totalorder %v1489_v47, %v11211_v54 }
 0x2ad   : > { %10176 = vset.pattern.permute.xlu1 %v13971_v50 }
 0x2ae   : > { %824 = vperm.xlu1 %10176, %v11630_v46  }
 0x2af   : > { %v1492_v21 = vpop.permute.xlu1 %1491 }
 0x2b0   : > { %vm1549_vm13 = vcmp.eq.s32.totalorder %v1492_v21, %v11211_v54 }
 0x2b1   : > { %vm9610_vm14 = vmpackc.low %vm1549_vm13, %vm1548_vm12 }
 0x2b2   : > { %10177 = vset.pattern.permute.xlu1 %v13979_v42  ;;  %9611 = vmatprep.mubr.msk.bf16.mxu1 %vm9610_vm14, %v13982_v4 }
 0x2b3   : > { %492 = vperm.xlu1 %10177, %v11630_v46  }
 0x2b4   : > { %v1160_v19 = vpop.permute.xlu1 %1159  ;;  %v11862_v36 = vpop.f32.mrb[24].mxu1 }
 0x2b5   : > { %vm1217_vm0 = vcmp.eq.s32.totalorder %v1160_v19, %v11211_v54  ;;  %v2720_v59 = vpop.f32.mrb[25].mxu1 }
 0x2b6   : > { %vm9612_vm1 = vmpackc.low %vm1217_vm0, %vm1216_vm15  ;;  %v11865_v33 = vpop.f32.mrb[26].mxu1 }
 0x2b7   : > { %495 = vperm.xlu1 %10177, %v10293_v1   ;;  %v2723_v14 = vpop.f32.mrb[27].mxu1  ;;  %9613 = vmatmul.mubr.msk.bf16.gmra.mrb[64].mxu1 %vm9612_vm1, %v13982_v4  ;;  %vm544_vm1 = vcmp.eq.s32.totalorder %v11730_v48, %v11211_v54 }
 0x2b9   : > { %v795_v32 = vpop.permute.xlu1 %794 }
 0x2ba   : > { %vm874_vm3 = vcmp.eq.s32.totalorder %v795_v32, %v11211_v54 }
 0x2bb   : > { %vm9486_vm4 = vmpackc.low %vm875_vm2, %vm874_vm3  ;;  %10178 = vset.pattern.permute.xlu1 %v10556_v12  ;;  %v2438_v46 = vpop.f32.mrb[32].mxu0 }
 0x2bc   : > { %v2439_v60 = vadd.f32 %v11837_v24, %v2438_v46  ;;  %1721 = vperm.xlu1 %10178, %v11699_v10   ;;  %v2440_v51 = vpop.f32.mrb[33].mxu0  ;;  %9487 = vmatprep.mubr.msk.bf16.mxu0 %vm9486_vm4, %v13982_v4  ;;  %v1495_v10 = vpop.permute.xlu0 %1494  ;;  %vm1220_vm4 = vcmp.eq.s32.totalorder %v11279_v0, %v11211_v54 }
 0x2bd   : > { %v2441_v58 = vpop.f32.mrb[34].mxu0  ;;  %vm1550_vm8 = vcmp.eq.s32.totalorder %v1495_v10, %v11211_v54 }
 0x2be   : > { %v2442_v26 = vadd.f32 %v11837_v24, %v2441_v58  ;;  %v463_v13 = vpop.permute.xlu1 %462  ;;  %v2443_v39 = vpop.f32.mrb[35].mxu0  ;;  %v11878_v6 = vadd.f32 %v11715_v20, %v2439_v60  ;;  %v10296_v58 = vld [vmem:[%s10808_s10 + $0x90] sm:$0xff] }
 0x2bf   : > { %vm542_vm5 = vcmp.eq.s32.totalorder %v463_v13, %v11211_v54 }
 0x2c0   : > { %1724 = vperm.xlu1 %10178, %v10294_v8   ;;  %v11882_v44 = vadd.f32 %v11719_v16, %v2442_v26  ;;  %v11905_v14 = vpop.permute.xlu0 %1353 }
 0x2c2   : > { %v466_v53 = vpop.permute.xlu1 %465 }
 0x2c3   : > { %vm543_vm6 = vcmp.eq.s32.totalorder %v466_v53, %v11211_v54  ;;  %v10297_v53 = vld [vmem:[%s10808_s10 + $0xa0] sm:$0xff] }
 0x2c4   : > { %vm9488_vm7 = vmpackc.low %vm543_vm6, %vm542_vm5  ;;  %10179 = vset.pattern.permute.xlu1 %v13971_v50  ;;  %v11917_v51 = vpop.permute.xlu0 %1359 }
 0x2c5   : > { %830 = vperm.xlu1 %10179, %v11454_v34   ;;  %9489 = vmatmul.mubr.msk.bf16.gmra.mrb[72].mxu0 %vm9488_vm7, %v13982_v4  ;;  %vm9620_vm7 = vmpackc.low %vm1220_vm4, %vm1220_vm4  ;;  %vm880_vm4 = vcmp.eq.s32.totalorder %v11489_v28, %v11211_v54 }
 0x2c7   : > { %v1498_v20 = vpop.permute.xlu1 %1497  ;;  %v11890_v57 = vpop.f32.mrb[28].mxu1 }
 0x2c8   : > { %vm1551_vm9 = vcmp.eq.s32.totalorder %v1498_v20, %v11211_v54  ;;  %v2728_v16 = vpop.f32.mrb[29].mxu1  ;;  %v11930_v39 = vpop.permute.xlu0 %1365 }
 0x2c9   : > { %vm9614_vm10 = vmpackc.low %vm1551_vm9, %vm1550_vm8  ;;  %10181 = vset.pattern.permute.xlu1 %v13979_v42  ;;  %v11894_v30 = vpop.f32.mrb[30].mxu1 }
 0x2ca   : > { %498 = vperm.xlu1 %10181, %v11454_v34   ;;  %v2731_v47 = vpop.f32.mrb[31].mxu1  ;;  %9615 = vmatprep.mubr.msk.bf16.mxu1 %vm9614_vm10, %v13982_v4 }
 0x2cc   : > { %v1163_v21 = vpop.permute.xlu1 %1162  ;;  %v11940_v16 = vpop.permute.xlu0 %1371 }
 0x2cd   : > { %vm1218_vm12 = vcmp.eq.s32.totalorder %v1163_v21, %v11211_v54  ;;  %v2446_v55 = vpop.f32.mrb[36].mxu0 }
 0x2ce   : > { %vm9616_vm13 = vmpackc.low %vm1219_vm11, %vm1218_vm12  ;;  %v2447_v19 = vadd.f32 %v11837_v24, %v2446_v55  ;;  %501 = vperm.xlu1 %10181, %v11694_v56   ;;  %v2448_v42 = vpop.f32.mrb[37].mxu0  ;;  %v10295_v56 = vld [vmem:[%s10808_s10 + $0x88] sm:$0xff]  ;;  %vm546_vm11 = vcmp.eq.s32.totalorder %v11740_v38, %v11211_v54 }
 0x2cf   : > { %v2449_v59 = vpop.f32.mrb[38].mxu0  ;;  %9617 = vmatmul.mubr.msk.bf16.gmra.mrb[68].mxu1 %vm9616_vm13, %v13982_v4 }
 0x2d0   : > { %v2450_v34 = vadd.f32 %v11837_v24, %v2449_v59  ;;  %v2451_v1 = vpop.f32.mrb[39].mxu0  ;;  %v11908_v5 = vadd.f32 %v11745_v25, %v2447_v19  ;;  %v10298_v19 = vld [vmem:[%s10808_s10 + $0xa8] sm:$0xff] }
 0x2d1   : > { %v801_v32 = vpop.permute.xlu1 %800  ;;  %v10299_v1 = vld [vmem:[%s10808_s10 + $0xb8] sm:$0xff] }
 0x2d2   : > { %10182 = vset.pattern.permute.xlu1 %v10556_v12  ;;  %v11912_v46 = vadd.f32 %v11749_v49, %v2450_v34  ;;  %vm876_vm14 = vcmp.eq.s32.totalorder %v801_v32, %v11211_v54  ;;  %v11951_v34 = vpop.permute.xlu0 %1377 }
 0x2d3   : > { %1733 = vperm.xlu1 %10182, %v10295_v56  }
 0x2d5   : > { %v804_v60 = vpop.permute.xlu1 %803 }
 0x2d6   : > { %vm877_vm15 = vcmp.eq.s32.totalorder %v804_v60, %v11211_v54  ;;  %v1686_v56 = vpop.permute.xlu0 %1685 }
 0x2d7   : > { %vm9490_vm0 = vmpackc.low %vm877_vm15, %vm876_vm14  ;;  %1736 = vperm.xlu1 %10182, %v10296_v58   ;;  %vm1835_vm14 = vcmp.eq.s32.totalorder %v1686_v56, %v11211_v54 }
 0x2d8   : > { %9491 = vmatprep.mubr.msk.bf16.mxu0 %vm9490_vm0, %v13982_v4 }
 0x2da   : > { %v472_v25 = vpop.permute.xlu1 %471  ;;  %v11923_v49 = vpop.f32.mrb[32].mxu1 }
 0x2db   : > { %vm545_vm2 = vcmp.eq.s32.totalorder %v472_v25, %v11211_v54  ;;  %10183 = vset.pattern.permute.xlu1 %v13971_v50  ;;  %v2736_v26 = vpop.f32.mrb[33].mxu1 }
 0x2dc   : > { %vm9492_vm3 = vmpackc.low %vm545_vm2, %vm544_vm1  ;;  %836 = vperm.xlu1 %10183, %v11733_v43   ;;  %v11928_v13 = vpop.f32.mrb[34].mxu1 }
 0x2dd   : > { %9493 = vmatmul.mubr.msk.bf16.gmra.mrb[76].mxu0 %vm9492_vm3, %v13982_v4  ;;  %v2739_v8 = vpop.f32.mrb[35].mxu1 }
 0x2df   : > { %v1501_v48 = vpop.permute.xlu1 %1500 }
 0x2e0   : > { %vm1552_vm5 = vcmp.eq.s32.totalorder %v1501_v48, %v11211_v54  ;;  %10185 = vset.pattern.permute.xlu1 %v10556_v12  ;;  %v2454_v50 = vpop.f32.mrb[40].mxu0 }
 0x2e1   : > { %vm9618_vm6 = vmpackc.low %vm1552_vm5, %vm1552_vm5  ;;  %v2455_v43 = vadd.f32 %v11837_v24, %v2454_v50  ;;  %1742 = vperm.xlu1 %10185, %v10297_v53   ;;  %v2456_v10 = vpop.f32.mrb[41].mxu0 }
 0x2e2   : > { %v2457_v20 = vpop.f32.mrb[42].mxu0  ;;  %9619 = vmatprep.mubr.msk.bf16.mxu1 %vm9618_vm6, %v13982_v4 }
 0x2e3   : > { %v2458_v0 = vadd.f32 %v11837_v24, %v2457_v20  ;;  %v2459_v47 = vpop.f32.mrb[43].mxu0  ;;  %9621 = vmatmul.mubr.msk.bf16.gmra.mrb[72].mxu1 %vm9620_vm7, %v13982_v4  ;;  %v11945_v21 = vadd.f32 %v11776_v17, %v2455_v43  ;;  %v10300_v20 = vld [vmem:[%s10808_s10 + $0x8] sm:$0xff]  ;;  %vm549_vm7 = vcmp.eq.s32.totalorder %v11752_v2, %v11211_v54 }
 0x2e4   : > { %v807_v55 = vpop.permute.xlu1 %806  ;;  %v10301_v47 = vld [vmem:[%s10808_s10 + $0xc8] sm:$0xff] }
 0x2e5   : > { %1745 = vperm.xlu1 %10185, %v10298_v19   ;;  %v11949_v42 = vadd.f32 %v11779_v45, %v2458_v0  ;;  %vm878_vm8 = vcmp.eq.s32.totalorder %v807_v55, %v11211_v54 }
 0x2e8   : > { %v810_v59 = vpop.permute.xlu1 %809 }
 0x2e9   : > { %vm879_vm9 = vcmp.eq.s32.totalorder %v810_v59, %v11211_v54  ;;  %1751 = vperm.xlu1 %10185, %v10299_v1  }
 0x2ea   : > { %vm9494_vm10 = vmpackc.low %vm879_vm9, %vm878_vm8 }
 0x2eb   : > { %9495 = vmatprep.mubr.msk.bf16.mxu0 %vm9494_vm10, %v13982_v4 }
 0x2ed   : > { %v478_v17 = vpop.permute.xlu1 %477  ;;  %10186 = vset.pattern.permute.xlu1 %v13974_v40  ;;  %v11960_v45 = vpop.f32.mrb[36].mxu1 }
 0x2ee   : > { %vm547_vm12 = vcmp.eq.s32.totalorder %v478_v17, %v11211_v54  ;;  %1350 = vperm.xlu1 %10186, %v11764_v61   ;;  %v2744_v32 = vpop.f32.mrb[37].mxu1 }
 0x2ef   : > { %vm9496_vm13 = vmpackc.low %vm547_vm12, %vm546_vm11  ;;  %v11964_v60 = vpop.f32.mrb[38].mxu1 }
 0x2f0   : > { %9497 = vmatmul.mubr.msk.bf16.gmra.mrb[80].mxu0 %vm9496_vm13, %v13982_v4  ;;  %v2747_v58 = vpop.f32.mrb[39].mxu1 }
 0x2f2   : > { %10187 = vset.pattern.permute.xlu1 %v13976_v18  ;;  %v1683_v38 = vpop.permute.xlu1 %1682 }
 0x2f3   : > { %vm1834_vm15 = vcmp.eq.s32.totalorder %v1683_v38, %v11211_v54  ;;  %1018 = vperm.xlu1 %10187, %v11764_v61   ;;  %v2462_v25 = vpop.f32.mrb[44].mxu0 }
 0x2f4   : > { %vm9622_vm0 = vmpackc.low %vm1835_vm14, %vm1834_vm15  ;;  %v2463_v26 = vadd.f32 %v11837_v24, %v2462_v25  ;;  %v2464_v8 = vpop.f32.mrb[45].mxu0 }
 0x2f5   : > { %v2465_v48 = vpop.f32.mrb[46].mxu0  ;;  %9789 = vmatprep.mubr.msk.bf16.mxu1 %vm9622_vm0, %v13982_v4  ;;  %vm883_vm0 = vcmp.eq.s32.totalorder %v11499_v22, %v11211_v54 }
 0x2f6   : > { %v2466_v50 = vadd.f32 %v11837_v24, %v2465_v48  ;;  %v1689_v43 = vpop.permute.xlu1 %1688  ;;  %v2467_v53 = vpop.f32.mrb[47].mxu0  ;;  %v11975_v10 = vadd.f32 %v11804_v63, %v2463_v26  ;;  %v10302_v63 = vld [vmem:[%s10808_s10 + $0xd0] sm:$0xff] }
 0x2f7   : > { %1021 = vperm.xlu1 %10187, %v10300_v20   ;;  %vm1836_vm1 = vcmp.eq.s32.totalorder %v1689_v43, %v11211_v54  ;;  %v10303_v43 = vld [vmem:[%s10808_s10 + $0x18] sm:$0xff] }
 0x2f8   : > { %v11979_v61 = vadd.f32 %v11807_v52, %v2466_v50  ;;  %v1701_v50 = vpop.permute.xlu0 %1700 }
 0x2f9   : > { %vm1840_vm13 = vcmp.eq.s32.totalorder %v1701_v50, %v11211_v54 }
 0x2fa   : > { %v1692_v0 = vpop.permute.xlu1 %1691 }
 0x2fb   : > { %vm1837_vm2 = vcmp.eq.s32.totalorder %v1692_v0, %v11211_v54  ;;  %10188 = vset.pattern.permute.xlu1 %v10556_v12 }
 0x2fc   : > { %vm9624_vm3 = vmpackc.low %vm1837_vm2, %vm1836_vm1  ;;  %1757 = vperm.xlu1 %10188, %v10301_v47  }
 0x2fd   : > { %9790 = vmatmul.mubr.msk.bf16.vlgmr.msra.gmra.mrb[76].mxu1 %vm9624_vm3, %v13982_v4 }
 0x2ff   : > { %v816_v55 = vpop.permute.xlu1 %815 }
 0x300   : > { %vm881_vm5 = vcmp.eq.s32.totalorder %v816_v55, %v11211_v54  ;;  %1760 = vperm.xlu1 %10188, %v10302_v63   ;;  %v11990_v52 = vpop.f32.mrb[40].mxu1  ;;  %v10305_v55 = vld [vmem:[%s10808_s10 + $0xf0] sm:$0xff] }
 0x301   : > { %vm9498_vm6 = vmpackc.low %vm881_vm5, %vm880_vm4  ;;  %v2752_v19 = vpop.f32.mrb[41].mxu1 }
 0x302   : > { %9499 = vmatprep.mubr.msk.bf16.mxu0 %vm9498_vm6, %v13982_v4  ;;  %v11993_v59 = vpop.f32.mrb[42].mxu1 }
 0x303   : > { %v2755_v1 = vpop.f32.mrb[43].mxu1 }
 0x304   : > { %10189 = vset.pattern.permute.xlu1 %v13974_v40  ;;  %v481_v17 = vpop.permute.xlu1 %480 }
 0x305   : > { %vm548_vm8 = vcmp.eq.s32.totalorder %v481_v17, %v11211_v54  ;;  %1356 = vperm.xlu1 %10189, %v11770_v62  }
 0x306   : > { %vm9500_vm9 = vmpackc.low %vm549_vm7, %vm548_vm8  ;;  %v2470_v28 = vpop.f32.mrb[48].mxu0 }
 0x307   : > { %v2471_v32 = vadd.f32 %v11837_v24, %v2470_v28  ;;  %v2472_v56 = vpop.f32.mrb[49].mxu0  ;;  %9501 = vmatmul.mubr.msk.bf16.gmra.mrb[84].mxu0 %vm9500_vm9, %v13982_v4 }
 0x308   : > { %v2473_v58 = vpop.f32.mrb[50].mxu0 }
 0x309   : > { %v2474_v38 = vadd.f32 %v11837_v24, %v2473_v58  ;;  %10190 = vset.pattern.permute.xlu1 %v13976_v18  ;;  %v1695_v2 = vpop.permute.xlu1 %1694  ;;  %v2475_v25 = vpop.f32.mrb[51].mxu0  ;;  %v12005_v26 = vadd.f32 %v11827_v29, %v2471_v32 }
 0x30a   : > { %1024 = vperm.xlu1 %10190, %v11770_v62   ;;  %vm1838_vm10 = vcmp.eq.s32.totalorder %v1695_v2, %v11211_v54  ;;  %v10304_v62 = vld [vmem:[%s10808_s10 + $0xe8] sm:$0xff]  ;;  %v1707_v58 = vpop.permute.xlu0 %1706 }
 0x30b   : > { %v12009_v8 = vadd.f32 %v11830_v35, %v2474_v38  ;;  %vm1842_vm6 = vcmp.eq.s32.totalorder %v1707_v58, %v11211_v54 }
 0x30d   : > { %v1698_v48 = vpop.permute.xlu1 %1697 }
 0x30e   : > { %vm1839_vm11 = vcmp.eq.s32.totalorder %v1698_v48, %v11211_v54  ;;  %1027 = vperm.xlu1 %10190, %v10303_v43   ;;  %v1716_v25 = vpop.permute.xlu0 %1715 }
 0x30f   : > { %vm9626_vm12 = vmpackc.low %vm1839_vm11, %vm1838_vm10  ;;  %vm1845_vm9 = vcmp.eq.s32.totalorder %v1716_v25, %v11211_v54  ;;  %v10310_v25 = vld [vmem:[%s10808_s10 + $0x38] sm:$0xff] }
 0x310   : > { %9793 = vmatprep.mubr.msk.bf16.mxu1 %vm9626_vm12, %v13982_v4  ;;  %vm885_vm12 = vcmp.eq.s32.totalorder %v11507_v31, %v11211_v54 }
 0x311   : > { %v1704_v29 = vpop.permute.xlu1 %1703 }
 0x312   : > { %vm1841_vm14 = vcmp.eq.s32.totalorder %v1704_v29, %v11211_v54  ;;  %10191 = vset.pattern.permute.xlu1 %v10556_v12 }
 0x313   : > { %vm9628_vm15 = vmpackc.low %vm1841_vm14, %vm1840_vm13  ;;  %1769 = vperm.xlu1 %10191, %v10304_v62   ;;  %v12019_v35 = vpop.f32.mrb[44].mxu1  ;;  %v10307_v62 = vld [vmem:[%s10808_s10 + $0x108] sm:$0xff] }
 0x314   : > { %v2760_v53 = vpop.f32.mrb[45].mxu1  ;;  %9794 = vmatmul.mubr.msk.bf16.gmra.mrb[80].mxu1 %vm9628_vm15, %v13982_v4 }
 0x315   : > { %v12022_v20 = vpop.f32.mrb[46].mxu1 }
 0x316   : > { %v819_v0 = vpop.permute.xlu1 %818  ;;  %v2763_v47 = vpop.f32.mrb[47].mxu1 }
 0x317   : > { %vm882_vm1 = vcmp.eq.s32.totalorder %v819_v0, %v11211_v54  ;;  %1772 = vperm.xlu1 %10191, %v10305_v55   ;;  %v10308_v0 = vld [vmem:[%s10808_s10 + $0x110] sm:$0xff] }
 0x318   : > { %vm9502_vm2 = vmpackc.low %vm883_vm0, %vm882_vm1 }
 0x319   : > { %v2478_v63 = vpop.f32.mrb[52].mxu0  ;;  %9503 = vmatprep.mubr.msk.bf16.mxu0 %vm9502_vm2, %v13982_v4 }
 0x31a   : > { %v2479_v19 = vadd.f32 %v11837_v24, %v2478_v63  ;;  %v2480_v1 = vpop.f32.mrb[53].mxu0 }
 0x31b   : > { %10192 = vset.pattern.permute.xlu1 %v13974_v40  ;;  %v487_v17 = vpop.permute.xlu1 %486  ;;  %v2481_v28 = vpop.f32.mrb[54].mxu0 }
 0x31c   : > { %v2482_v32 = vadd.f32 %v11837_v24, %v2481_v28  ;;  %1362 = vperm.xlu1 %10192, %v11797_v15   ;;  %v2483_v22 = vpop.f32.mrb[55].mxu0  ;;  %v12034_v56 = vadd.f32 %v11862_v36, %v2479_v19  ;;  %vm550_vm3 = vcmp.eq.s32.totalorder %v487_v17, %v11211_v54  ;;  %v10309_v28 = vld [vmem:[%s10808_s10 + $0x30] sm:$0xff] }
 0x31d   : > { %v1719_v22 = vpop.permute.xlu0 %1718 }
 0x31e   : > { %v12037_v38 = vadd.f32 %v11865_v33, %v2482_v32  ;;  %v10306_v33 = vld [vmem:[%s10808_s10 + $0x28] sm:$0xff]  ;;  %vm1846_vm2 = vcmp.eq.s32.totalorder %v1719_v22, %v11211_v54 }
 0x31f   : > { %v490_v2 = vpop.permute.xlu1 %489 }
 0x320   : > { %vm551_vm4 = vcmp.eq.s32.totalorder %v490_v2, %v11211_v54  ;;  %10193 = vset.pattern.permute.xlu1 %v13976_v18 }
 0x321   : > { %vm9504_vm5 = vmpackc.low %vm551_vm4, %vm550_vm3  ;;  %1030 = vperm.xlu1 %10193, %v11797_v15  }
 0x322   : > { %9505 = vmatmul.mubr.msk.bf16.gmra.mrb[88].mxu0 %vm9504_vm5, %v13982_v4 }
 0x324   : > { %v1710_v36 = vpop.permute.xlu1 %1709 }
 0x325   : > { %vm1843_vm7 = vcmp.eq.s32.totalorder %v1710_v36, %v11211_v54  ;;  %1033 = vperm.xlu1 %10193, %v10306_v33  }
 0x326   : > { %vm9630_vm8 = vmpackc.low %vm1843_vm7, %vm1842_vm6  ;;  %v12047_v48 = vpop.f32.mrb[48].mxu1 }
 0x327   : > { %v2768_v50 = vpop.f32.mrb[49].mxu1  ;;  %9797 = vmatprep.mubr.msk.bf16.mxu1 %vm9630_vm8, %v13982_v4  ;;  %vm887_vm8 = vcmp.eq.s32.totalorder %v11517_v11, %v11211_v54 }
 0x328   : > { %v1713_v15 = vpop.permute.xlu1 %1712  ;;  %v12051_v43 = vpop.f32.mrb[50].mxu1 }
 0x329   : > { %vm1844_vm10 = vcmp.eq.s32.totalorder %v1713_v15, %v11211_v54  ;;  %10194 = vset.pattern.permute.xlu1 %v10556_v12  ;;  %v2771_v29 = vpop.f32.mrb[51].mxu1 }
 0x32a   : > { %vm9632_vm11 = vmpackc.low %vm1845_vm9, %vm1844_vm10  ;;  %1781 = vperm.xlu1 %10194, %v10307_v62  }
 0x32b   : > { %9798 = vmatmul.mubr.msk.bf16.gmra.mrb[84].mxu1 %vm9632_vm11, %v13982_v4 }
 0x32d   : > { %v825_v53 = vpop.permute.xlu1 %824 }
 0x32e   : > { %vm884_vm13 = vcmp.eq.s32.totalorder %v825_v53, %v11211_v54  ;;  %1784 = vperm.xlu1 %10194, %v10308_v0   ;;  %v10311_v53 = vld [vmem:[%s10808_s10 + $0x130] sm:$0xff] }
 0x32f   : > { %vm9506_vm14 = vmpackc.low %vm885_vm12, %vm884_vm13 }
 0x330   : > { %v2486_v47 = vpop.f32.mrb[56].mxu0  ;;  %9507 = vmatprep.mubr.msk.bf16.mxu0 %vm9506_vm14, %v13982_v4 }
 0x331   : > { %v2487_v55 = vadd.f32 %v11837_v24, %v2486_v47  ;;  %v2488_v63 = vpop.f32.mrb[57].mxu0  ;;  %v10312_v47 = vld [vmem:[%s10808_s10 + $0x40] sm:$0xff] }
 0x332   : > { %10195 = vset.pattern.permute.xlu1 %v13974_v40  ;;  %v493_v19 = vpop.permute.xlu1 %492  ;;  %v2489_v1 = vpop.f32.mrb[58].mxu0 }
 0x333   : > { %v2490_v17 = vadd.f32 %v11837_v24, %v2489_v1  ;;  %1368 = vperm.xlu1 %10195, %v10309_v28   ;;  %v2491_v31 = vpop.f32.mrb[59].mxu0  ;;  %v12067_v32 = vadd.f32 %v11890_v57, %v2487_v55  ;;  %vm552_vm15 = vcmp.eq.s32.totalorder %v493_v19, %v11211_v54  ;;  %v1728_v57 = vpop.permute.xlu0 %1727 }
 0x334   : > { %vm1849_vm5 = vcmp.eq.s32.totalorder %v1728_v57, %v11211_v54  ;;  %v10313_v57 = vld [vmem:[%s10808_s10 + $0x48] sm:$0xff] }
 0x335   : > { %v12070_v58 = vadd.f32 %v11894_v30, %v2490_v17 }
 0x336   : > { %v496_v2 = vpop.permute.xlu1 %495 }
 0x337   : > { %vm553_vm0 = vcmp.eq.s32.totalorder %v496_v2, %v11211_v54  ;;  %10196 = vset.pattern.permute.xlu1 %v13976_v18  ;;  %v1731_v55 = vpop.permute.xlu0 %1730 }
 0x338   : > { %vm9508_vm1 = vmpackc.low %vm553_vm0, %vm552_vm15  ;;  %1036 = vperm.xlu1 %10196, %v10309_v28   ;;  %vm1850_vm14 = vcmp.eq.s32.totalorder %v1731_v55, %v11211_v54 }
 0x339   : > { %9509 = vmatmul.mubr.msk.bf16.gmra.mrb[92].mxu0 %vm9508_vm1, %v13982_v4 }
 0x33b   : > { %v1722_v36 = vpop.permute.xlu1 %1721 }
 0x33c   : > { %vm1847_vm3 = vcmp.eq.s32.totalorder %v1722_v36, %v11211_v54  ;;  %1039 = vperm.xlu1 %10196, %v10310_v25   ;;  %v1740_v36 = vpop.permute.xlu0 %1739 }
 0x33d   : > { %vm9634_vm4 = vmpackc.low %vm1847_vm3, %vm1846_vm2  ;;  %vm1853_vm1 = vcmp.eq.s32.totalorder %v1740_v36, %v11211_v54 }
 0x33e   : > { %v12079_v30 = vpop.f32.mrb[52].mxu1  ;;  %9801 = vmatprep.mubr.msk.bf16.mxu1 %vm9634_vm4, %v13982_v4  ;;  %vm556_vm4 = vcmp.eq.s32.totalorder %v11760_v3, %v11211_v54 }
 0x33f   : > { %v1725_v33 = vpop.permute.xlu1 %1724  ;;  %v2776_v50 = vpop.f32.mrb[53].mxu1 }
 0x340   : > { %vm1848_vm6 = vcmp.eq.s32.totalorder %v1725_v33, %v11211_v54  ;;  %10197 = vset.pattern.permute.xlu1 %v10556_v12  ;;  %v12085_v15 = vpop.f32.mrb[54].mxu1  ;;  %v10314_v33 = vld [vmem:[%s10808_s10 + $0x148] sm:$0xff] }
 0x341   : > { %vm9636_vm7 = vmpackc.low %vm1849_vm5, %vm1848_vm6  ;;  %1793 = vperm.xlu1 %10197, %v11678_v23   ;;  %v2779_v29 = vpop.f32.mrb[55].mxu1 }
 0x342   : > { %9802 = vmatmul.mubr.msk.bf16.gmra.mrb[88].mxu1 %vm9636_vm7, %v13982_v4  ;;  %vm9516_vm7 = vmpackc.low %vm556_vm4, %vm556_vm4 }
 0x344   : > { %v831_v62 = vpop.permute.xlu1 %830 }
 0x345   : > { %vm886_vm9 = vcmp.eq.s32.totalorder %v831_v62, %v11211_v54  ;;  %1796 = vperm.xlu1 %10197, %v10311_v53  }
 0x346   : > { %vm9510_vm10 = vmpackc.low %vm887_vm8, %vm886_vm9 }
 0x347   : > { %9511 = vmatprep.mubr.msk.bf16.mxu0 %vm9510_vm10, %v13982_v4 }
 0x349   : > { %10198 = vset.pattern.permute.xlu1 %v13974_v40  ;;  %v499_v0 = vpop.permute.xlu1 %498 }
 0x34a   : > { %1374 = vperm.xlu1 %10198, %v10312_v47   ;;  %vm554_vm11 = vcmp.eq.s32.totalorder %v499_v0, %v11211_v54  ;;  %v1749_v0 = vpop.permute.xlu0 %1748 }
 0x34c   : > { %v2494_v23 = vpop.f32.mrb[60].mxu0 }
 0x34d   : > { %v2495_v63 = vadd.f32 %v11837_v24, %v2494_v23  ;;  %v502_v19 = vpop.permute.xlu1 %501  ;;  %v2496_v1 = vpop.f32.mrb[61].mxu0 }
 0x34e   : > { %vm555_vm12 = vcmp.eq.s32.totalorder %v502_v19, %v11211_v54  ;;  %10200 = vset.pattern.permute.xlu1 %v13976_v18  ;;  %v2497_v11 = vpop.f32.mrb[62].mxu0 }
 0x34f   : > { %vm9512_vm13 = vmpackc.low %vm555_vm12, %vm554_vm11  ;;  %v2498_v17 = vadd.f32 %v11837_v24, %v2497_v11  ;;  %1042 = vperm.xlu1 %10200, %v10312_v47   ;;  %v2499_v28 = vpop.f32.mrb[63].mxu0  ;;  %v12102_v31 = vadd.f32 %v11923_v49, %v2495_v63  ;;  %vm1856_vm11 = vcmp.eq.s32.totalorder %v1749_v0, %v11211_v54 }
 0x350   : > { %9513 = vmatmul.mubr.msk.bf16.gmra.mrb[96].mxu0 %vm9512_vm13, %v13982_v4 }
 0x351   : > { %v12107_v22 = vadd.f32 %v11928_v13, %v2498_v17 }
 0x352   : > { %v1734_v2 = vpop.permute.xlu1 %1733 }
 0x353   : > { %vm1851_vm15 = vcmp.eq.s32.totalorder %v1734_v2, %v11211_v54  ;;  %1045 = vperm.xlu1 %10200, %v10313_v57   ;;  %v10316_v2 = vld [vmem:[%s10808_s10 + $0x170] sm:$0xff] }
 0x354   : > { %vm9638_vm0 = vmpackc.low %vm1851_vm15, %vm1850_vm14  ;;  %vm1503_vm14 = vcmp.eq.s32.totalorder %v11905_v14, %v11211_v54 }
 0x355   : > { %9805 = vmatprep.mubr.msk.bf16.mxu1 %vm9638_vm0, %v13982_v4 }
 0x356   : > { %v1737_v49 = vpop.permute.xlu1 %1736  ;;  %v12113_v25 = vpop.f32.mrb[56].mxu1 }
 0x357   : > { %vm1852_vm2 = vcmp.eq.s32.totalorder %v1737_v49, %v11211_v54  ;;  %10201 = vset.pattern.permute.xlu1 %v10556_v12  ;;  %v2784_v13 = vpop.f32.mrb[57].mxu1  ;;  %v1755_v49 = vpop.permute.xlu0 %1754 }
 0x358   : > { %vm9640_vm3 = vmpackc.low %vm1853_vm1, %vm1852_vm2  ;;  %1805 = vperm.xlu1 %10201, %v10314_v33   ;;  %v12118_v50 = vpop.f32.mrb[58].mxu1  ;;  %vm1858_vm4 = vcmp.eq.s32.totalorder %v1755_v49, %v11211_v54 }
 0x359   : > { %v2787_v29 = vpop.f32.mrb[59].mxu1  ;;  %9806 = vmatmul.mubr.msk.bf16.gmra.mrb[92].mxu1 %vm9640_vm3, %v13982_v4 }
 0x35b   : > { %v837_v62 = vpop.permute.xlu1 %836  ;;  %v1764_v29 = vpop.permute.xlu0 %1763 }
 0x35c   : > { %vm888_vm5 = vcmp.eq.s32.totalorder %v837_v62, %v11211_v54  ;;  %1808 = vperm.xlu1 %10201, %v11790_v37  }
 0x35d   : > { %vm9514_vm6 = vmpackc.low %vm888_vm5, %vm888_vm5 }
 0x35e   : > { %9515 = vmatprep.mubr.msk.bf16.mxu0 %vm9514_vm6, %v13982_v4 }
 0x35f   : > { %9517 = vmatmul.mubr.msk.bf16.gmra.mrb[100].mxu0 %vm9516_vm7, %v13982_v4  ;;  %vm1861_vm7 = vcmp.eq.s32.totalorder %v1764_v29, %v11211_v54 }
 0x360   : > { %10202 = vset.pattern.permute.xlu1 %v13974_v40  ;;  %v1743_v53 = vpop.permute.xlu1 %1742 }
 0x361   : > { %1380 = vperm.xlu1 %10202, %v11842_v27   ;;  %vm1854_vm8 = vcmp.eq.s32.totalorder %v1743_v53, %v11211_v54 }
 0x364   : > { %v1746_v47 = vpop.permute.xlu1 %1745  ;;  %v2502_v23 = vpop.f32.mrb[64].mxu0 }
 0x365   : > { %vm1855_vm9 = vcmp.eq.s32.totalorder %v1746_v47, %v11211_v54  ;;  %v2503_v3 = vadd.f32 %v11837_v24, %v2502_v23  ;;  %10203 = vset.pattern.permute.xlu1 %v13976_v18  ;;  %v2504_v37 = vpop.f32.mrb[65].mxu0 }
 0x366   : > { %vm9642_vm10 = vmpackc.low %vm1855_vm9, %vm1854_vm8  ;;  %1048 = vperm.xlu1 %10203, %v11842_v27   ;;  %v2505_v55 = vpop.f32.mrb[66].mxu0  ;;  %v10315_v27 = vld [vmem:[%s10808_s10 + $0x58] sm:$0xff] }
 0x367   : > { %v2506_v63 = vadd.f32 %v11837_v24, %v2505_v55  ;;  %v2507_v19 = vpop.f32.mrb[67].mxu0  ;;  %9809 = vmatprep.mubr.msk.bf16.mxu1 %vm9642_vm10, %v13982_v4  ;;  %v12138_v1 = vadd.f32 %v11960_v45, %v2503_v3  ;;  %vm1505_vm10 = vcmp.eq.s32.totalorder %v11917_v51, %v11211_v54  ;;  %v1767_v51 = vpop.permute.xlu0 %1766 }
 0x368   : > { %v1752_v11 = vpop.permute.xlu1 %1751 }
 0x369   : > { %vm1857_vm12 = vcmp.eq.s32.totalorder %v1752_v11, %v11211_v54  ;;  %v12142_v17 = vadd.f32 %v11964_v60, %v2506_v63  ;;  %v10320_v11 = vld [vmem:[%s10808_s10 + $0x190] sm:$0xff] }
 0x36a   : > { %vm9644_vm13 = vmpackc.low %vm1857_vm12, %vm1856_vm11  ;;  %1051 = vperm.xlu1 %10203, %v10315_v27  }
 0x36b   : > { %9810 = vmatmul.mubr.msk.bf16.gmra.mrb[96].mxu1 %vm9644_vm13, %v13982_v4 }
 0x36d   : > { %v1351_v28 = vpop.permute.xlu1 %1350 }
 0x36e   : > { %vm1502_vm15 = vcmp.eq.s32.totalorder %v1351_v28, %v11211_v54  ;;  %10204 = vset.pattern.permute.xlu1 %v10556_v12 }
 0x36f   : > { %vm9518_vm0 = vmpackc.low %vm1503_vm14, %vm1502_vm15  ;;  %1817 = vperm.xlu1 %10204, %v11824_v7   ;;  %v10317_v7 = vld [vmem:[%s10808_s10 + $0x60] sm:$0xff] }
 0x370   : > { %9519 = vmatprep.mubr.msk.bf16.mxu0 %vm9518_vm0, %v13982_v4  ;;  %vm1862_vm0 = vcmp.eq.s32.totalorder %v1767_v51, %v11211_v54 }
 0x372   : > { %v1019_v45 = vpop.permute.xlu1 %1018  ;;  %v12152_v60 = vpop.f32.mrb[60].mxu1 }
 0x373   : > { %1820 = vperm.xlu1 %10204, %v10316_v2   ;;  %v2792_v36 = vpop.f32.mrb[61].mxu1  ;;  %vm1170_vm1 = vcmp.eq.s32.totalorder %v1019_v45, %v11211_v54 }
 0x374   : > { %v12155_v57 = vpop.f32.mrb[62].mxu1  ;;  %v1776_v36 = vpop.permute.xlu0 %1775 }
 0x375   : > { %14012 = vst [vmem:[#allocation23_spill] sm:$0xff] %v12155_v57  ;;  %v2795_v14 = vpop.f32.mrb[63].mxu1 }
 0x376   : > { %v1022_v13 = vpop.permute.xlu1 %1021 }
 0x377   : > { %vm1171_vm2 = vcmp.eq.s32.totalorder %v1022_v13, %v11211_v54  ;;  %10206 = vset.pattern.permute.xlu1 %v13974_v40 }
 0x378   : > { %vm9520_vm3 = vmpackc.low %vm1171_vm2, %vm1170_vm1  ;;  %1386 = vperm.xlu1 %10206, %v10317_v7  }
 0x379   : > { %9521 = vmatmul.mubr.msk.bf16.vlgmr.msra.gmra.mrb[0].mxu0 %vm9520_vm3, %v13982_v4  ;;  %vm1865_vm3 = vcmp.eq.s32.totalorder %v1776_v36, %v11211_v54 }
 0x37b   : > { %v1758_v33 = vpop.permute.xlu1 %1757 }
 0x37c   : > { %vm1859_vm5 = vcmp.eq.s32.totalorder %v1758_v33, %v11211_v54  ;;  %10207 = vset.pattern.permute.xlu1 %v13976_v18  ;;  %v2510_v62 = vpop.f32.mrb[68].mxu0  ;;  %v10318_v18 = vld [vmem:[%s10808_s10 + $0x68] sm:$0xff] }
 0x37d   : > { %vm9646_vm6 = vmpackc.low %vm1859_vm5, %vm1858_vm4  ;;  %v2511_v53 = vadd.f32 %v11837_v24, %v2510_v62  ;;  %1054 = vperm.xlu1 %10207, %v10317_v7   ;;  %v2512_v40 = vpop.f32.mrb[69].mxu0 }
 0x37e   : > { %v2513_v0 = vpop.f32.mrb[70].mxu0  ;;  %9813 = vmatprep.mubr.msk.bf16.mxu1 %vm9646_vm6, %v13982_v4  ;;  %vm1507_vm6 = vcmp.eq.s32.totalorder %v11930_v39, %v11211_v54 }
 0x37f   : > { %v2514_v47 = vadd.f32 %v11837_v24, %v2513_v0  ;;  %v1761_v23 = vpop.permute.xlu1 %1760  ;;  %v2515_v3 = vpop.f32.mrb[71].mxu0  ;;  %v12170_v37 = vadd.f32 %v11990_v52, %v2511_v53  ;;  %v10319_v52 = vld [vmem:[%s10808_s10 + $0x188] sm:$0xff] }
 0x380   : > { %vm1860_vm8 = vcmp.eq.s32.totalorder %v1761_v23, %v11211_v54 }
 0x381   : > { %vm9648_vm9 = vmpackc.low %vm1861_vm7, %vm1860_vm8  ;;  %1057 = vperm.xlu1 %10207, %v10318_v18   ;;  %v12175_v55 = vadd.f32 %v11993_v59, %v2514_v47 }
 0x382   : > { %9814 = vmatmul.mubr.msk.bf16.gmra.mrb[100].mxu1 %vm9648_vm9, %v13982_v4 }
 0x384   : > { %v1357_v63 = vpop.permute.xlu1 %1356 }
 0x385   : > { %vm1504_vm11 = vcmp.eq.s32.totalorder %v1357_v63, %v11211_v54  ;;  %10209 = vset.pattern.permute.xlu1 %v10556_v12 }
 0x386   : > { %vm9522_vm12 = vmpackc.low %vm1505_vm10, %vm1504_vm11  ;;  %1829 = vperm.xlu1 %10209, %v10319_v52  }
 0x387   : > { %9523 = vmatprep.mubr.msk.bf16.mxu0 %vm9522_vm12, %v13982_v4 }
 0x389   : > { %v1025_v19 = vpop.permute.xlu1 %1024 }
 0x38a   : > { %1832 = vperm.xlu1 %10209, %v10320_v11   ;;  %v12185_v59 = vpop.f32.mrb[64].mxu1  ;;  %vm1172_vm13 = vcmp.eq.s32.totalorder %v1025_v19, %v11211_v54 }
 0x38b   : > { %v2800_v27 = vpop.f32.mrb[65].mxu1 }
 0x38c   : > { %v12187_v28 = vpop.f32.mrb[66].mxu1 }
 0x38d   : > { %14013 = vst [vmem:[#allocation21_spill] sm:$0xff] %v12187_v28  ;;  %v1028_v45 = vpop.permute.xlu1 %1027  ;;  %v2803_v2 = vpop.f32.mrb[67].mxu1 }
 0x38e   : > { %vm1173_vm14 = vcmp.eq.s32.totalorder %v1028_v45, %v11211_v54 }
 0x38f   : > { %vm9524_vm15 = vmpackc.low %vm1173_vm14, %vm1172_vm13 }
 0x390   : > { %9525 = vmatmul.mubr.msk.bf16.gmra.mrb[4].mxu0 %vm9524_vm15, %v13982_v4 }
 0x392   : > { %v1770_v12 = vpop.permute.xlu1 %1769 }
 0x393   : > { %vm1863_vm1 = vcmp.eq.s32.totalorder %v1770_v12, %v11211_v54 }
 0x394   : > { %vm9650_vm2 = vmpackc.low %vm1863_vm1, %vm1862_vm0 }
 0x395   : > { %9817 = vmatprep.mubr.msk.bf16.mxu1 %vm9650_vm2, %v13982_v4  ;;  %vm1509_vm2 = vcmp.eq.s32.totalorder %v11940_v16, %v11211_v54 }
 0x396   : > { %v1773_v14 = vpop.permute.xlu1 %1772 }
 0x397   : > { %vm1864_vm4 = vcmp.eq.s32.totalorder %v1773_v14, %v11211_v54 }
 0x398   : > { %vm9652_vm5 = vmpackc.low %vm1865_vm3, %vm1864_vm4  ;;  %v2518_v49 = vpop.f32.mrb[72].mxu0 }
 0x399   : > { %v2519_v13 = vadd.f32 %v11837_v24, %v2518_v49  ;;  %v2520_v7 = vpop.f32.mrb[73].mxu0  ;;  %9818 = vmatmul.mubr.msk.bf16.gmra.mrb[104].mxu1 %vm9652_vm5, %v13982_v4 }
 0x39a   : > { %v2521_v33 = vpop.f32.mrb[74].mxu0 }
 0x39b   : > { %v2522_v29 = vadd.f32 %v11837_v24, %v2521_v33  ;;  %v1363_v62 = vpop.permute.xlu1 %1362  ;;  %v2523_v53 = vpop.f32.mrb[75].mxu0  ;;  %v12201_v40 = vadd.f32 %v12019_v35, %v2519_v13 }
 0x39c   : > { %vm1506_vm7 = vcmp.eq.s32.totalorder %v1363_v62, %v11211_v54  ;;  %v1779_v35 = vpop.permute.xlu0 %1778 }
 0x39d   : > { %vm9526_vm8 = vmpackc.low %vm1507_vm6, %vm1506_vm7  ;;  %v12207_v0 = vadd.f32 %v12022_v20, %v2522_v29  ;;  %vm1866_vm12 = vcmp.eq.s32.totalorder %v1779_v35, %v11211_v54 }
 0x39e   : > { %9527 = vmatprep.mubr.msk.bf16.mxu0 %vm9526_vm8, %v13982_v4 }
 0x39f   : > { %14014 = vst [vmem:[#allocation16_spill] sm:$0xff] %v12207_v0 }
 0x3a0   : > { %v1031_v47 = vpop.permute.xlu1 %1030  ;;  %v1788_v52 = vpop.permute.xlu0 %1787 }
 0x3a1   : > { %vm1174_vm9 = vcmp.eq.s32.totalorder %v1031_v47, %v11211_v54  ;;  %vm1869_vm15 = vcmp.eq.s32.totalorder %v1788_v52, %v11211_v54  ;;  %v12243_v47 = vld [vmem:[#allocation7] ss:$0 sm:$0xff] }
 0x3a2   : > { %v12210_v23 = vpop.f32.mrb[68].mxu1 }
 0x3a3   : > { %14015 = vst [vmem:[#allocation32_spill] sm:$0xff] %v12210_v23  ;;  %v2808_v3 = vpop.f32.mrb[69].mxu1 }
 0x3a4   : > { %v1034_v18 = vpop.permute.xlu1 %1033  ;;  %v12212_v63 = vpop.f32.mrb[70].mxu1 }
 0x3a5   : > { %14016 = vst [vmem:[#allocation17_spill] sm:$0xff] %v12212_v63  ;;  %vm1175_vm10 = vcmp.eq.s32.totalorder %v1034_v18, %v11211_v54  ;;  %v2811_v39 = vpop.f32.mrb[71].mxu1  ;;  %v1791_v16 = vpop.permute.xlu0 %1790 }
 0x3a6   : > { %vm9528_vm11 = vmpackc.low %vm1175_vm10, %vm1174_vm9  ;;  %vm1870_vm8 = vcmp.eq.s32.totalorder %v1791_v16, %v11211_v54 }
 0x3a7   : > { %9529 = vmatmul.mubr.msk.bf16.gmra.mrb[8].mxu0 %vm9528_vm11, %v13982_v4 }
 0x3a9   : > { %v1782_v20 = vpop.permute.xlu1 %1781 }
 0x3aa   : > { %vm1867_vm13 = vcmp.eq.s32.totalorder %v1782_v20, %v11211_v54 }
 0x3ab   : > { %vm9654_vm14 = vmpackc.low %vm1867_vm13, %vm1866_vm12 }
 0x3ac   : > { %9821 = vmatprep.mubr.msk.bf16.mxu1 %vm9654_vm14, %v13982_v4  ;;  %vm1511_vm14 = vcmp.eq.s32.totalorder %v11951_v34, %v11211_v54 }
 0x3ad   : > { %v1785_v19 = vpop.permute.xlu1 %1784 }
 0x3ae   : > { %vm1868_vm0 = vcmp.eq.s32.totalorder %v1785_v19, %v11211_v54 }
 0x3af   : > { %vm9656_vm1 = vmpackc.low %vm1869_vm15, %vm1868_vm0 }
 0x3b0   : > { %v2526_v11 = vpop.f32.mrb[76].mxu0  ;;  %9822 = vmatmul.mubr.msk.bf16.gmra.mrb[108].mxu1 %vm9656_vm1, %v13982_v4 }
 0x3b1   : > { %v2527_v27 = vadd.f32 %v11837_v24, %v2526_v11  ;;  %v2528_v45 = vpop.f32.mrb[77].mxu0 }
 0x3b2   : > { %v1369_v2 = vpop.permute.xlu1 %1368  ;;  %v2529_v51 = vpop.f32.mrb[78].mxu0 }
 0x3b3   : > { %vm1508_vm3 = vcmp.eq.s32.totalorder %v1369_v2, %v11211_v54  ;;  %v2530_v12 = vadd.f32 %v11837_v24, %v2529_v51  ;;  %v2531_v36 = vpop.f32.mrb[79].mxu0  ;;  %v12229_v14 = vadd.f32 %v12047_v48, %v2527_v27  ;;  %v1800_v24 = vpop.permute.xlu0 %1799 }
 0x3b4   : > { %vm9530_vm4 = vmpackc.low %vm1509_vm2, %vm1508_vm3  ;;  %vm1873_vm11 = vcmp.eq.s32.totalorder %v1800_v24, %v11211_v54 }
 0x3b5   : > { %9531 = vmatprep.mubr.msk.bf16.mxu0 %vm9530_vm4, %v13982_v4  ;;  %v12233_v49 = vadd.f32 %v12051_v43, %v2530_v12 }
 0x3b6   : > { %v12235_v13 = vpop.f32.mrb[72].mxu1 }
 0x3b7   : > { %14017 = vst [vmem:[#allocation18_spill] sm:$0xff] %v12235_v13  ;;  %v1037_v7 = vpop.permute.xlu1 %1036  ;;  %v2816_v33 = vpop.f32.mrb[73].mxu1 }
 0x3b8   : > { %v2817_v29 = vpop.f32.mrb[74].mxu1  ;;  %vm1176_vm5 = vcmp.eq.s32.totalorder %v1037_v7, %v11211_v54  ;;  %v1803_v35 = vpop.permute.xlu0 %1802 }
 0x3b9   : > { %v2818_v62 = vpop.f32.mrb[75].mxu1  ;;  %vm1874_vm4 = vcmp.eq.s32.totalorder %v1803_v35, %v11211_v54 }
 0x3bb   : > { %v1040_v53 = vpop.permute.xlu1 %1039 }
 0x3bc   : > { %vm1177_vm6 = vcmp.eq.s32.totalorder %v1040_v53, %v11211_v54  ;;  %v1812_v27 = vpop.permute.xlu0 %1811 }
 0x3bd   : > { %vm9532_vm7 = vmpackc.low %vm1177_vm6, %vm1176_vm5 }
 0x3be   : > { %9533 = vmatmul.mubr.msk.bf16.gmra.mrb[12].mxu0 %vm9532_vm7, %v13982_v4  ;;  %vm1877_vm7 = vcmp.eq.s32.totalorder %v1812_v27, %v11211_v54 }
 0x3c0   : > { %v1794_v48 = vpop.permute.xlu1 %1793  ;;  %v1815_v12 = vpop.permute.xlu0 %1814 }
 0x3c1   : > { %vm1871_vm9 = vcmp.eq.s32.totalorder %v1794_v48, %v11211_v54 }
 0x3c2   : > { %vm9658_vm10 = vmpackc.low %vm1871_vm9, %vm1870_vm8 }
 0x3c3   : > { %v2534_v43 = vpop.f32.mrb[80].mxu0  ;;  %9825 = vmatprep.mubr.msk.bf16.mxu1 %vm9658_vm10, %v13982_v4 }
 0x3c4   : > { %v2535_v3 = vadd.f32 %v12243_v47, %v2534_v43  ;;  %v1797_v18 = vpop.permute.xlu1 %1796  ;;  %v2536_v39 = vpop.f32.mrb[81].mxu0 }
 0x3c5   : > { %vm1872_vm12 = vcmp.eq.s32.totalorder %v1797_v18, %v11211_v54  ;;  %v2537_v20 = vpop.f32.mrb[82].mxu0  ;;  %v1824_v16 = vpop.permute.xlu0 %1823 }
 0x3c6   : > { %vm9660_vm13 = vmpackc.low %vm1873_vm11, %vm1872_vm12  ;;  %v2539_v52 = vpop.f32.mrb[83].mxu0  ;;  %v12249_v19 = vadd.f32 %v12079_v30, %v2535_v3  ;;  %v2538_v45 = vadd.f32 %v12243_v47, %v2537_v20 }
 0x3c7   : > { %9826 = vmatmul.mubr.msk.bf16.gmra.mrb[112].mxu1 %vm9660_vm13, %v13982_v4 }
 0x3c8   : > { %14018 = vst [vmem:[#allocation19_spill] sm:$0xff] %v12249_v19  ;;  %v12264_v33 = vadd.f32 %v12085_v15, %v2538_v45 }
 0x3c9   : > { %v1375_v11 = vpop.permute.xlu1 %1374  ;;  %v1384_v43 = vpop.permute.xlu0 %1383 }
 0x3ca   : > { %vm1510_vm15 = vcmp.eq.s32.totalorder %v1375_v11, %v11211_v54  ;;  %14019 = vst [vmem:[#allocation20_spill] sm:$0xff] %v12264_v33  ;;  %vm1513_vm10 = vcmp.eq.s32.totalorder %v1384_v43, %v11211_v54 }
 0x3cb   : > { %vm9534_vm0 = vmpackc.low %vm1511_vm14, %vm1510_vm15 }
 0x3cc   : > { %9535 = vmatprep.mubr.msk.bf16.mxu0 %vm9534_vm0, %v13982_v4  ;;  %vm1878_vm0 = vcmp.eq.s32.totalorder %v1815_v12, %v11211_v54 }
 0x3ce   : > { %v1043_v2 = vpop.permute.xlu1 %1042 }
 0x3cf   : > { %vm1178_vm1 = vcmp.eq.s32.totalorder %v1043_v2, %v11211_v54 }
 0x3d0   : > { %v12257_v51 = vpop.f32.mrb[76].mxu1 }
 0x3d1   : > { %v12259_v30 = vpop.f32.mrb[77].mxu1 }
 0x3d2   : > { %v1046_v36 = vpop.permute.xlu1 %1045  ;;  %v12261_v7 = vpop.f32.mrb[78].mxu1 }
 0x3d3   : > { %vm1179_vm2 = vcmp.eq.s32.totalorder %v1046_v36, %v11211_v54  ;;  %v12268_v34 = vpop.f32.mrb[79].mxu1 }
 0x3d4   : > { %vm9536_vm3 = vmpackc.low %vm1179_vm2, %vm1178_vm1 }
 0x3d5   : > { %9537 = vmatmul.mubr.msk.bf16.gmra.mrb[16].mxu0 %vm9536_vm3, %v13982_v4  ;;  %vm1881_vm3 = vcmp.eq.s32.totalorder %v1824_v16, %v11211_v54 }
 0x3d7   : > { %v1806_v29 = vpop.permute.xlu1 %1805 }
 0x3d8   : > { %vm1875_vm5 = vcmp.eq.s32.totalorder %v1806_v29, %v11211_v54 }
 0x3d9   : > { %vm9662_vm6 = vmpackc.low %vm1875_vm5, %vm1874_vm4 }
 0x3da   : > { %v2542_v62 = vpop.f32.mrb[84].mxu0  ;;  %9829 = vmatprep.mubr.msk.bf16.mxu1 %vm9662_vm6, %v13982_v4 }
 0x3db   : > { %v2543_v15 = vadd.f32 %v12243_v47, %v2542_v62  ;;  %v1809_v53 = vpop.permute.xlu1 %1808  ;;  %v2544_v24 = vpop.f32.mrb[85].mxu0 }
 0x3dc   : > { %vm1876_vm8 = vcmp.eq.s32.totalorder %v1809_v53, %v11211_v54  ;;  %v2545_v48 = vpop.f32.mrb[86].mxu0 }
 0x3dd   : > { %vm9664_vm9 = vmpackc.low %vm1877_vm7, %vm1876_vm8  ;;  %v2547_v3 = vpop.f32.mrb[87].mxu0  ;;  %v12278_v18 = vadd.f32 %v12113_v25, %v2543_v15  ;;  %v2546_v35 = vadd.f32 %v12243_v47, %v2545_v48 }
 0x3de   : > { %9830 = vmatmul.mubr.msk.bf16.gmra.mrb[116].mxu1 %vm9664_vm9, %v13982_v4 }
 0x3df   : > { %14020 = vst [vmem:[#allocation24_spill] sm:$0xff] %v12278_v18  ;;  %v12292_v45 = vadd.f32 %v12118_v50, %v2546_v35  ;;  %v1390_v50 = vpop.permute.xlu0 %1389 }
 0x3e0   : > { %v1381_v39 = vpop.permute.xlu1 %1380  ;;  %vm1515_vm6 = vcmp.eq.s32.totalorder %v1390_v50, %v11211_v54 }
 0x3e1   : > { %vm1512_vm11 = vcmp.eq.s32.totalorder %v1381_v39, %v11211_v54  ;;  %14021 = vst [vmem:[#allocation25_spill] sm:$0xff] %v12292_v45 }
 0x3e2   : > { %vm9538_vm12 = vmpackc.low %vm1513_vm10, %vm1512_vm11 }
 0x3e3   : > { %9539 = vmatprep.mubr.msk.bf16.mxu0 %vm9538_vm12, %v13982_v4 }
 0x3e5   : > { %v1049_v20 = vpop.permute.xlu1 %1048 }
 0x3e6   : > { %vm1180_vm13 = vcmp.eq.s32.totalorder %v1049_v20, %v11211_v54  ;;  %v1827_v20 = vpop.permute.xlu0 %1826 }
 0x3e7   : > { %v12285_v52 = vpop.f32.mrb[80].mxu1  ;;  %vm1882_vm12 = vcmp.eq.s32.totalorder %v1827_v20, %v11211_v54 }
 0x3e8   : > { %v12287_v11 = vpop.f32.mrb[81].mxu1 }
 0x3e9   : > { %v1052_v27 = vpop.permute.xlu1 %1051  ;;  %v12289_v25 = vpop.f32.mrb[82].mxu1 }
 0x3ea   : > { %vm1181_vm14 = vcmp.eq.s32.totalorder %v1052_v27, %v11211_v54  ;;  %v12296_v2 = vpop.f32.mrb[83].mxu1 }
 0x3eb   : > { %vm9540_vm15 = vmpackc.low %vm1181_vm14, %vm1180_vm13 }
 0x3ec   : > { %9541 = vmatmul.mubr.msk.bf16.gmra.mrb[20].mxu0 %vm9540_vm15, %v13982_v4 }
 0x3ee   : > { %v1818_v36 = vpop.permute.xlu1 %1817 }
 0x3ef   : > { %vm1879_vm1 = vcmp.eq.s32.totalorder %v1818_v36, %v11211_v54 }
 0x3f0   : > { %vm9666_vm2 = vmpackc.low %vm1879_vm1, %vm1878_vm0  ;;  %vm8425_vm1 = vcmask 253952  }
 0x3f1   : > { %9833 = vmatprep.mubr.msk.bf16.mxu1 %vm9666_vm2, %v13982_v4  ;;  %vm8421_vm2 = vcmask 261120  }
 0x3f2   : > { %v1821_v29 = vpop.permute.xlu1 %1820 }
 0x3f3   : > { %vm1880_vm4 = vcmp.eq.s32.totalorder %v1821_v29, %v11211_v54 }
 0x3f4   : > { %vm9668_vm5 = vmpackc.low %vm1881_vm3, %vm1880_vm4  ;;  %vm8770_vm3 = vcmask 1041409   ;;  %vm8772_vm4 = vcmask 1042434  }
 0x3f5   : > { %v2550_v62 = vpop.f32.mrb[88].mxu0  ;;  %9834 = vmatmul.mubr.msk.bf16.gmra.mrb[120].mxu1 %vm9668_vm5, %v13982_v4  ;;  %vm8774_vm5 = vcmask 1043459  }
 0x3f6   : > { %v2552_v15 = vpop.f32.mrb[89].mxu0  ;;  %v2551_v36 = vadd.f32 %v12243_v47, %v2550_v62 }
 0x3f7   : > { %v1387_v53 = vpop.permute.xlu1 %1386  ;;  %v12306_v12 = vpop.f32.mrb[90].mxu0 }
 0x3f8   : > { %vm1514_vm7 = vcmp.eq.s32.totalorder %v1387_v53, %v11211_v54  ;;  %v2555_v24 = vpop.f32.mrb[91].mxu0  ;;  %v12327_v50 = vadd.f32 %v12152_v60, %v2551_v36 }
 0x3f9   : > { %vm9542_vm8 = vmpackc.low %vm1515_vm6, %vm1514_vm7  ;;  %vm8776_vm6 = vcmask 1044484   ;;  %vm8778_vm7 = vcmask 1045509  }
 0x3fa   : > { %9543 = vmatprep.mubr.msk.bf16.mxu0 %vm9542_vm8, %v13982_v4  ;;  %14026 = vst [vmem:[#allocation28_spill] sm:$0xff] %v12327_v50  ;;  %vm8780_vm8 = vcmask 1046534  }
 0x3fc   : > { %v1055_v16 = vpop.permute.xlu1 %1054 }
 0x3fd   : > { %vm1182_vm9 = vcmp.eq.s32.totalorder %v1055_v16, %v11211_v54 }
 0x3fe   : > { %v12310_v48 = vpop.f32.mrb[84].mxu1 }
 0x3ff   : > { %14022 = vst [vmem:[#allocation22_spill] sm:$0xff] %v12310_v48  ;;  %v12312_v43 = vpop.f32.mrb[85].mxu1 }
 0x400   : > { %14023 = vst [vmem:[#allocation33_spill] sm:$0xff] %v12312_v43  ;;  %v1058_v3 = vpop.permute.xlu1 %1057  ;;  %v12314_v39 = vpop.f32.mrb[86].mxu1 }
 0x401   : > { %14024 = vst [vmem:[#allocation26_spill] sm:$0xff] %v12314_v39  ;;  %vm1183_vm10 = vcmp.eq.s32.totalorder %v1058_v3, %v11211_v54  ;;  %v12318_v35 = vpop.f32.mrb[87].mxu1  ;;  %v10557_v3 = vmov 1966171168  }
 0x402   : > { %14025 = vst [vmem:[#allocation27_spill] sm:$0xff] %v12318_v35  ;;  %vm9544_vm11 = vmpackc.low %vm1183_vm10, %vm1182_vm9  ;;  %v3164_v20 = vunpack.c.l.s4 %v10557_v3  ;;  %vm8782_vm9 = vcmask 1047559  }
 0x403   : > { %9545 = vmatmul.mubr.msk.bf16.gmra.mrb[24].mxu0 %vm9544_vm11, %v13982_v4 }
 0x404   : > { %v3165_v62 = vunpack.c.0.s8 %v3164_v20 }
 0x405   : > { %v1830_v27 = vpop.permute.xlu1 %1829 }
 0x406   : > { %vm1883_vm13 = vcmp.eq.s32.totalorder %v1830_v27, %v11211_v54  ;;  %v14027_v27 = vlaneseq }
 0x407   : > { %vm9670_vm14 = vmpackc.low %vm1883_vm13, %vm1882_vm12 }
 0x408   : > { %9837 = vmatprep.mubr.msk.bf16.mxu1 %vm9670_vm14, %v13982_v4  ;;  %v3167_v63 = vshrl.u32 %v14027_v27, 7 }
 0x409   : > { %v1833_v29 = vpop.permute.xlu1 %1832 }
 0x40a   : > { %vm1884_vm15 = vcmp.eq.s32.totalorder %v1833_v29, %v11211_v54  ;;  %v12336_v60 = vsub.s32 %v3165_v62, %v3167_v63 }
 0x40b   : > { %vm9672_vm0 = vmpackc.low %vm1884_vm15, %vm1884_vm15 }
 0x40c   : > { %v2558_v15 = vpop.f32.mrb[92].mxu0  ;;  %9838 = vmatmul.mubr.msk.bf16.gmra.mrb[124].mxu1 %vm9672_vm0, %v13982_v4 }
 0x40d   : > { %v2560_v53 = vpop.f32.mrb[93].mxu0 }
 0x40e   : > { %v12330_v24 = vpop.f32.mrb[94].mxu0 }
 0x40f   : > { %v2563_v16 = vpop.f32.mrb[95].mxu0 }
 0x415   : > { %v9803_v23 = vpop.f32.mrb[88].mxu1 }
 0x416   : > { %v2911_v13 = vadd.f32 %v9803_v23, %v11848_v41  ;;  %v12334_v54 = vpop.f32.mrb[89].mxu1 }
 0x417   : > { %14028 = vst [vmem:[#allocation35_spill] sm:$0xff] %v12334_v54  ;;  %v9804_v29 = vpop.f32.mrb[90].mxu1 }
 0x418   : > { %v3074_v36 = vmax.f32 %v2911_v13, 0.0  ;;  %v2914_v4 = vadd.f32 %v9804_v29, %v11851_v9  ;;  %v12339_v53 = vpop.f32.mrb[91].mxu1 }
 0x419   : > { %14029 = vst [vmem:[#allocation29_spill] sm:$0xff] %v12339_v53  ;;  %v2559_v53 = vadd.f32 %v12243_v47, %v2558_v15 }
 0x41a   : > { %v3848_v57 = vcombine.high %v3074_v36, %v3074_v36  ;;  %v3075_v16 = vmax.f32 %v2914_v4, 0.0  ;;  %v3855_v3 = vrot.slane %v3074_v36, %v12336_v60 }
 0x41c   : > { %v3862_v20 = vrot.slane %v3848_v57, %v12336_v60  ;;  %v3897_v27 = vcombine.high %v3075_v16, %v3075_v16  ;;  %v3904_v28 = vrot.slane %v3075_v16, %v12336_v60  ;;  %v3863_v13 = vcombine.high %v3855_v3, %v3855_v3 }
 0x41d   : > { %v3871_v35 = vrot.slane %v3855_v3, %v12336_v60 }
 0x41e   : > { %v3864_v41 = vcombine.high %v3862_v20, %v3862_v20  ;;  %v3911_v23 = vrot.slane %v3897_v27, %v12336_v60  ;;  %v3912_v54 = vcombine.high %v3904_v28, %v3904_v28  ;;  %v3920_v63 = vrot.slane %v3904_v28, %v12336_v60 }
 0x41f   : > { %v3878_v9 = vrot.slane %v3862_v20, %v12336_v60  ;;  %v3885_v48 = vrot.slane %v3863_v13, %v12336_v60 }
 0x420   : > { %v3892_v62 = vrot.slane %v3864_v41, %v12336_v60  ;;  %v3913_v29 = vcombine.high %v3911_v23, %v3911_v23  ;;  %v3927_v4 = vrot.slane %v3911_v23, %v12336_v60  ;;  %v3934_v36 = vrot.slane %v3912_v54, %v12336_v60 }
 0x421   : > { %v3942_v57 = vcombine.high %v3920_v63, %v3920_v63  ;;  %v3894_v41 = vcombine.high %v3878_v9, %v3878_v9 }
 0x422   : > { %v3896_v16 = vcombine.high %v3892_v62, %v3892_v62  ;;  %v12352_v50 = vrot.slane %v3913_v29, %v12336_v60  ;;  %v3943_v27 = vcombine.high %v3927_v4, %v3927_v4  ;;  %v3944_v39 = vcombine.high %v3934_v36, %v3934_v36 }
 0x423   : > { %v2566_v28 = vpop.f32.mrb[96].mxu0  ;;  %v6446_v20 = vcombine.low %v3934_v36, %v3942_v57  ;;  %v6385_v15 = vcombine.low %v3878_v9, %v3892_v62  ;;  %v6383_v9 = vcombine.low %v3871_v35, %v3885_v48 }
 0x424   : > { %v2568_v33 = vpop.f32.mrb[97].mxu0  ;;  %v6445_v45 = vcombine.low %v3896_v16, %v3920_v63  ;;  %v6447_v19 = vcombine.low %v3944_v39, %v3927_v4  ;;  %v6448_v23 = vcombine.low %v12352_v50, %v3943_v27  ;;  %v9689_v63 = vcombine.high %v3871_v35, %v3885_v48 }
 0x425   : > { %v2569_v54 = vpop.f32.mrb[98].mxu0  ;;  %v6462_v18 = vrot.slane %v6446_v20, %v12336_v60  ;;  %v12362_v33 = vadd.f32 %v12185_v59, %v2559_v53  ;;  %v6437_v39 = vrot.slane %v3894_v41, %v12336_v60  ;;  %v6413_v3 = vrot.slane %v6385_v15, %v12336_v60 }
 0x426   : > { %v2571_v29 = vpop.f32.mrb[99].mxu0  ;;  %v6455_v43 = vrot.slane %v6445_v45, %v12336_v60  ;;  %v6469_v0 = vrot.slane %v6447_v19, %v12336_v60  ;;  %v6476_v13 = vrot.slane %v6448_v23, %v12336_v60  ;;  %v6406_v45 = vrot.slane %v9689_v63, %v12336_v60 }
 0x427   : > { %14030 = vst [vmem:[#allocation34_spill] sm:$0xff] %v12362_v33  ;;  %v6444_v16 = vrot.slane %v6437_v39, %v12336_v60  ;;  %v12380_v35 = vadd.f32 %v12243_v47, %v12330_v24  ;;  %v12383_v20 = vrot.slane %v6383_v9, %v12336_v60  ;;  %v12387_v15 = vadd.f32 %v12243_v47, %v2566_v28 }
 0x428   : > { %v6477_v4 = vcombine.low %v6455_v43, %v6462_v18  ;;  %v6478_v36 = vcombine.low %v6469_v0, %v6476_v13  ;;  %v12375_v0 = vadd.f32 %v12243_v47, %v12306_v12  ;;  %v6415_v18 = vcombine.low %v6406_v45, %v6413_v3 }
 0x429   : > { %14033 = vst [vmem:[#allocation31_spill] sm:$0xff] %v12380_v35  ;;  %14034 = vst [vmem:[#allocation37_spill] sm:$0xff] %v12383_v20  ;;  %v3945_v29 = vcombine.high %v12352_v50, %v12352_v50  ;;  %v12393_v13 = vsel %vm8425_vm1, %v6444_v16, -inf }
 0x42a   : > { %v6485_v62 = vrot.slane %v6477_v4, %v12336_v60  ;;  %v6492_v57 = vrot.slane %v6478_v36, %v12336_v60  ;;  %14032 = vst [vmem:[#allocation36_spill] sm:$0xff] %v12375_v0  ;;  %14035 = vst [vmem:[#allocation38_spill] sm:$0xff] %v12387_v15  ;;  %v12397_v4 = vrot.slane %v6415_v18, %v12336_v60 }
 0x42b   : > { %14036 = vst [vmem:[#allocation39_spill] sm:$0xff] %v12393_v13 }
 0x42c   : > { %v9807_v19 = vpop.f32.mrb[92].mxu1  ;;  %v12370_v27 = vcombine.low %v6485_v62, %v6492_v57  ;;  %14037 = vst [vmem:[#allocation40_spill] sm:$0xff] %v12397_v4 }
 0x42d   : > { %v2927_v59 = vadd.f32 %v9807_v19, %v11908_v5  ;;  %v2918_v53 = vpop.f32.mrb[93].mxu1 }
 0x42e   : > { %14031 = vst [vmem:[#allocation30_spill] sm:$0xff] %v12370_v27  ;;  %v2919_v48 = vadd.f32 %v2918_v53, %v11878_v6  ;;  %v9808_v43 = vpop.f32.mrb[94].mxu1 }
 0x42f   : > { %v3078_v41 = vmax.f32 %v2927_v59, 0.0  ;;  %v2930_v5 = vadd.f32 %v9808_v43, %v11912_v46  ;;  %v2921_v23 = vpop.f32.mrb[95].mxu1  ;;  %v12400_v46 = vadd.f32 %v12243_v47, %v2569_v54 }
 0x430   : > { %v3076_v12 = vmax.f32 %v2919_v48, 0.0  ;;  %v2922_v6 = vadd.f32 %v2921_v23, %v11882_v44 }
 0x431   : > { %v4044_v24 = vcombine.high %v3078_v41, %v3078_v41  ;;  %v4051_v63 = vrot.slane %v3078_v41, %v12336_v60  ;;  %v3079_v39 = vmax.f32 %v2930_v5, 0.0  ;;  %14038 = vst [vmem:[#allocation41_spill] sm:$0xff] %v12400_v46 }
 0x432   : > { %v3946_v28 = vcombine.high %v3076_v12, %v3076_v12  ;;  %v3953_v36 = vrot.slane %v3076_v12, %v12336_v60  ;;  %v12403_v3 = vpop.f32.mrb[100].mxu0 }
 0x433   : > { %v4058_v44 = vrot.slane %v4044_v24, %v12336_v60  ;;  %v4059_v50 = vcombine.high %v4051_v63, %v4051_v63  ;;  %v4067_v9 = vrot.slane %v4051_v63, %v12336_v60  ;;  %v4093_v62 = vcombine.high %v3079_v39, %v3079_v39  ;;  %v2576_v57 = vpop.f32.mrb[101].mxu0 }
 0x434   : > { %v3960_v45 = vrot.slane %v3946_v28, %v12336_v60  ;;  %v3961_v19 = vcombine.high %v3953_v36, %v3953_v36  ;;  %v3969_v16 = vrot.slane %v3953_v36, %v12336_v60  ;;  %v4100_v54 = vrot.slane %v3079_v39, %v12336_v60  ;;  %v2577_v59 = vpop.f32.mrb[102].mxu0 }
 0x435   : > { %v4060_v53 = vcombine.high %v4058_v44, %v4058_v44  ;;  %v4074_v18 = vrot.slane %v4058_v44, %v12336_v60  ;;  %v4081_v48 = vrot.slane %v4059_v50, %v12336_v60  ;;  %v4107_v43 = vrot.slane %v4093_v62, %v12336_v60  ;;  %v2578_v41 = vpop.f32.mrb[103].mxu0 }
 0x436   : > { %v3962_v5 = vcombine.high %v3960_v45, %v3960_v45  ;;  %v3976_v23 = vrot.slane %v3960_v45, %v12336_v60  ;;  %v3983_v12 = vrot.slane %v3961_v19, %v12336_v60  ;;  %v3991_v24 = vcombine.high %v3969_v16, %v3969_v16 }
 0x437   : > { %v4088_v63 = vrot.slane %v4060_v53, %v12336_v60  ;;  %v6606_v28 = vcombine.low %v4067_v9, %v4081_v48  ;;  %v9692_v36 = vcombine.high %v4067_v9, %v4081_v48  ;;  %v6494_v39 = vcombine.low %v3945_v29, %v3969_v16 }
 0x438   : > { %v3990_v57 = vrot.slane %v3962_v5, %v12336_v60  ;;  %v3992_v59 = vcombine.high %v3976_v23, %v3976_v23  ;;  %v3993_v44 = vcombine.high %v3983_v12, %v3983_v12  ;;  %v6495_v13 = vcombine.low %v3983_v12, %v3991_v24 }
 0x439   : > { %v6608_v50 = vcombine.low %v4074_v18, %v4088_v63  ;;  %v9693_v27 = vcombine.high %v4074_v18, %v4088_v63  ;;  %v6616_v62 = vrot.slane %v6606_v28, %v12336_v60  ;;  %v6623_v41 = vrot.slane %v9692_v36, %v12336_v60 }
 0x43a   : > { %v3994_v45 = vcombine.high %v3990_v57, %v3990_v57  ;;  %v6496_v4 = vcombine.low %v3993_v44, %v3976_v23  ;;  %v6497_v19 = vcombine.low %v3990_v57, %v3992_v59  ;;  %v6504_v20 = vrot.slane %v6494_v39, %v12336_v60 }
 0x43b   : > { %v6630_v53 = vrot.slane %v6608_v50, %v12336_v60  ;;  %v6637_v29 = vrot.slane %v9693_v27, %v12336_v60  ;;  %v6638_v9 = vcombine.low %v6616_v62, %v6623_v41  ;;  %v6511_v16 = vrot.slane %v6495_v13, %v12336_v60 }
 0x43c   : > { %v6518_v48 = vrot.slane %v6496_v4, %v12336_v60  ;;  %v6525_v18 = vrot.slane %v6497_v19, %v12336_v60  ;;  %v4108_v5 = vcombine.high %v4100_v54, %v4100_v54  ;;  %v3077_v12 = vmax.f32 %v2922_v6, 0.0 }
 0x43d   : > { %v6639_v24 = vcombine.low %v6630_v53, %v6637_v29  ;;  %v6526_v63 = vcombine.low %v6504_v20, %v6511_v16  ;;  %v12426_v23 = vrot.slane %v3994_v45, %v12336_v60  ;;  %v4109_v28 = vcombine.high %v4107_v43, %v4107_v43 }
 0x43e   : > { %v6646_v36 = vrot.slane %v6638_v9, %v12336_v60  ;;  %v6527_v39 = vcombine.low %v6518_v48, %v6525_v18  ;;  %v4116_v27 = vrot.slane %v4100_v54, %v12336_v60  ;;  %v4123_v57 = vrot.slane %v4107_v43, %v12336_v60  ;;  %v9811_v13 = vpop.f32.mrb[96].mxu1 }
 0x43f   : > { %14039 = vst [vmem:[#allocation42_spill] sm:$0xff] %v12426_v23  ;;  %v6653_v4 = vrot.slane %v6639_v24, %v12336_v60  ;;  %v6534_v59 = vrot.slane %v6526_v63, %v12336_v60  ;;  %v4130_v6 = vrot.slane %v4108_v5, %v12336_v60  ;;  %v12435_v20 = vrot.slane %v4109_v28, %v12336_v60  ;;  %v2934_v44 = vpop.f32.mrb[97].mxu1 }
 0x440   : > { %v6541_v50 = vrot.slane %v6527_v39, %v12336_v60  ;;  %v4138_v62 = vcombine.high %v4116_v27, %v4116_v27  ;;  %v4139_v41 = vcombine.high %v4123_v57, %v4123_v57  ;;  %v6661_v45 = vrot.slane %v4116_v27, %v12336_v60  ;;  %v9812_v54 = vpop.f32.mrb[98].mxu1 }
 0x441   : > { %v6654_v19 = vcombine.low %v6646_v36, %v6653_v4  ;;  %v4140_v43 = vcombine.high %v4130_v6, %v4130_v6  ;;  %v3995_v53 = vcombine.high %v3077_v12, %v3077_v12  ;;  %v4002_v29 = vrot.slane %v3077_v12, %v12336_v60  ;;  %v2937_v9 = vpop.f32.mrb[99].mxu1 }
 0x442   : > { %v12440_v16 = vcombine.low %v6534_v59, %v6541_v50  ;;  %v6668_v18 = vrot.slane %v6661_v45, %v12336_v60  ;;  %v6669_v5 = vcombine.low %v4130_v6, %v4138_v62  ;;  %v12446_v63 = vcombine.low %v12435_v20, %v4139_v41 }
 0x443   : > { %v6670_v24 = vcombine.low %v4140_v43, %v4123_v57  ;;  %v4009_v28 = vrot.slane %v3995_v53, %v12336_v60  ;;  %v4010_v36 = vcombine.high %v4002_v29, %v4002_v29  ;;  %v12450_v39 = vsel %vm8421_vm2, %v6654_v19, -inf }
 0x444   : > { %14040 = vst [vmem:[#allocation43_spill] sm:$0xff] %v12440_v16  ;;  %v6679_v12 = vrot.slane %v6669_v5, %v12336_v60  ;;  %v12454_v27 = vsel %vm8425_vm1, %v6668_v18, -inf  ;;  %v4018_v4 = vrot.slane %v4002_v29, %v12336_v60  ;;  %v12461_v50 = vadd.f32 %v12243_v47, %v12403_v3 }
 0x445   : > { %v6686_v59 = vrot.slane %v6670_v24, %v12336_v60  ;;  %v4011_v6 = vcombine.high %v4009_v28, %v4009_v28  ;;  %v4032_v57 = vrot.slane %v4010_v36, %v12336_v60  ;;  %v4025_v62 = vrot.slane %v4009_v28, %v12336_v60 }
 0x446   : > { %14041 = vst [vmem:[#allocation44_spill] sm:$0xff] %v12461_v50  ;;  %v2943_v41 = vadd.f32 %v9811_v13, %v11975_v10  ;;  %v2935_v45 = vadd.f32 %v2934_v44, %v11945_v21  ;;  %v4141_v19 = vcombine.high %v12435_v20, %v12435_v20  ;;  %v2946_v3 = vadd.f32 %v9812_v54, %v11979_v61 }
 0x447   : > { %v12468_v43 = vcombine.low %v6679_v12, %v6686_v59  ;;  %v4039_v53 = vrot.slane %v4011_v6, %v12336_v60  ;;  %v6557_v29 = vcombine.low %v4018_v4, %v4032_v57  ;;  %v9690_v18 = vcombine.high %v4018_v4, %v4032_v57 }
 0x448   : > { %v3082_v5 = vmax.f32 %v2943_v41, 0.0  ;;  %v3080_v24 = vmax.f32 %v2935_v45, 0.0  ;;  %v2938_v36 = vadd.f32 %v2937_v9, %v11949_v42  ;;  %v6693_v21 = vrot.slane %v12446_v63, %v12336_v60 }
 0x449   : > { %v6559_v28 = vcombine.low %v4025_v62, %v4039_v53  ;;  %v9691_v48 = vcombine.high %v4025_v62, %v4039_v53  ;;  %v6567_v10 = vrot.slane %v6557_v29, %v12336_v60  ;;  %v6574_v13 = vrot.slane %v9690_v18, %v12336_v60 }
 0x44a   : > { %v4240_v20 = vcombine.high %v3082_v5, %v3082_v5  ;;  %v4247_v44 = vrot.slane %v3082_v5, %v12336_v60  ;;  %v4142_v12 = vcombine.high %v3080_v24, %v3080_v24  ;;  %v4149_v54 = vrot.slane %v3080_v24, %v12336_v60 }
 0x44b   : > { %v6581_v61 = vrot.slane %v6559_v28, %v12336_v60  ;;  %v6588_v42 = vrot.slane %v9691_v48, %v12336_v60  ;;  %v6589_v9 = vcombine.low %v6567_v10, %v6574_v13  ;;  %v3083_v4 = vmax.f32 %v2946_v3, 0.0 }
 0x44c   : > { %v4254_v59 = vrot.slane %v4240_v20, %v12336_v60  ;;  %v4255_v6 = vcombine.high %v4247_v44, %v4247_v44  ;;  %v4263_v63 = vrot.slane %v4247_v44, %v12336_v60  ;;  %v12485_v57 = vpop.f32.mrb[0].mxu0  ;;  %v4156_v41 = vrot.slane %v4142_v12, %v12336_v60 }
 0x44d   : > { %v6590_v62 = vcombine.low %v6581_v61, %v6588_v42  ;;  %v4157_v45 = vcombine.high %v4149_v54, %v4149_v54  ;;  %v4165_v53 = vrot.slane %v4149_v54, %v12336_v60  ;;  %v2616_v29 = vpop.f32.mrb[1].mxu0  ;;  %v6597_v18 = vrot.slane %v6589_v9, %v12336_v60 }
 0x44e   : > { %v4256_v48 = vcombine.high %v4254_v59, %v4254_v59  ;;  %v4270_v5 = vrot.slane %v4254_v59, %v12336_v60  ;;  %v4277_v24 = vrot.slane %v4255_v6, %v12336_v60  ;;  %v12492_v28 = vpop.f32.mrb[2].mxu0  ;;  %v4158_v13 = vcombine.high %v4156_v41, %v4156_v41 }
 0x44f   : > { %v6604_v10 = vrot.slane %v6590_v62, %v12336_v60  ;;  %v4172_v20 = vrot.slane %v4156_v41, %v12336_v60  ;;  %v4179_v44 = vrot.slane %v4157_v45, %v12336_v60  ;;  %v2619_v12 = vpop.f32.mrb[3].mxu0  ;;  %v4187_v9 = vcombine.high %v4165_v53, %v4165_v53 }
 0x450   : > { %v4284_v61 = vrot.slane %v4256_v48, %v12336_v60  ;;  %v6784_v42 = vcombine.low %v4263_v63, %v4277_v24  ;;  %v9696_v54 = vcombine.high %v4263_v63, %v4277_v24  ;;  %v12499_v59 = vrot.slane %v4158_v13, %v12336_v60 }
 0x451   : > { %v6605_v29 = vcombine.low %v6597_v18, %v6604_v10  ;;  %v4189_v6 = vcombine.high %v4179_v44, %v4179_v44  ;;  %v4188_v41 = vcombine.high %v4172_v20, %v4172_v20  ;;  %v6672_v12 = vcombine.low %v4141_v19, %v4165_v53 }
 0x452   : > { %v12502_v23 = vrot.slane %v6784_v42, %v12336_v60  ;;  %v6831_v62 = vcombine.low %v4270_v5, %v4284_v61  ;;  %v9697_v16 = vcombine.high %v4270_v5, %v4284_v61  ;;  %v6718_v46 = vcombine.low %v4179_v44, %v4187_v9 }
 0x453   : > { %v8511_v45 = vsel %vm8421_vm2, %v6605_v29, -inf  ;;  %v6719_v48 = vcombine.low %v4189_v6, %v4172_v20  ;;  %v6840_v18 = vrot.slane %v9696_v54, %v12336_v60  ;;  %v6700_v3 = vrot.slane %v6672_v12, %v12336_v60 }
 0x454   : > { %v8513_v63 = vmax.f32 %v8511_v45, %v12450_v39  ;;  %v6847_v24 = vrot.slane %v6831_v62, %v12336_v60  ;;  %v6854_v10 = vrot.slane %v9697_v16, %v12336_v60  ;;  %v6728_v13 = vrot.slane %v6718_v46, %v12336_v60 }
 0x455   : > { %v6735_v5 = vrot.slane %v6719_v48, %v12336_v60  ;;  %v4289_v61 = vcombine.high %v3083_v4, %v3083_v4  ;;  %v12512_v42 = vpop.f32.mrb[100].mxu1  ;;  %v4296_v39 = vrot.slane %v3083_v4, %v12336_v60  ;;  %v3081_v20 = vmax.f32 %v2938_v36, 0.0 }
 0x456   : > { %v8515_v19 = vmax.f32 %v8513_v63, %v12454_v27  ;;  %v6862_v53 = vcombine.low %v6840_v18, %v6847_v24  ;;  %v12516_v44 = vpop.f32.mrb[101].mxu1  ;;  %v6702_v54 = vcombine.low %v6693_v21, %v6700_v3  ;;  %v6720_v16 = vcombine.low %v12499_v59, %v4188_v41 }
 0x457   : > { %v12519_v9 = vcombine.low %v6728_v13, %v6735_v5  ;;  %v4303_v46 = vrot.slane %v4289_v61, %v12336_v60  ;;  %v12522_v29 = vpop.f32.mrb[102].mxu1  ;;  %v4304_v62 = vcombine.high %v4296_v39, %v4296_v39  ;;  %v4312_v45 = vrot.slane %v4296_v39, %v12336_v60 }
 0x458   : > { %v8516_v6 = vrot.slane %v8515_v19, 4  ;;  %v4190_v27 = vcombine.high %v12499_v59, %v12499_v59  ;;  %v12527_v4 = vpop.f32.mrb[103].mxu1  ;;  %v12530_v36 = vrot.slane %v6862_v53, %v12336_v60  ;;  %v6716_v21 = vrot.slane %v6702_v54, %v12336_v60 }
 0x459   : > { %v4305_v41 = vcombine.high %v4303_v46, %v4303_v46  ;;  %v4319_v12 = vrot.slane %v4303_v46, %v12336_v60  ;;  %v4326_v63 = vrot.slane %v4304_v62, %v12336_v60  ;;  %v4334_v18 = vcombine.high %v4312_v45, %v4312_v45 }
 0x45a   : > { %v8517_v48 = vmax.f32 %v8515_v19, %v8516_v6  ;;  %v4191_v24 = vcombine.high %v3081_v20, %v3081_v20  ;;  %v14042_v3 = vrot.slane %v12468_v43, %v12336_v60  ;;  %v4198_v61 = vrot.slane %v3081_v20, %v12336_v60 }
 0x45b   : > { %v12539_v59 = vrot.slane %v4305_v41, %v12336_v60  ;;  %v4335_v5 = vcombine.high %v4319_v12, %v4319_v12  ;;  %v4336_v39 = vcombine.high %v4326_v63, %v4326_v63  ;;  %v6833_v54 = vcombine.low %v4312_v45, %v4326_v63 }
 0x45c   : > { %v6717_v13 = vcombine.low %v14042_v3, %v6716_v21  ;;  %v8518_v53 = vrot.slane %v8517_v48, 2  ;;  %v6885_v46 = vrot.slane %v4334_v18, %v12336_v60  ;;  %v6758_v19 = vrot.slane %v12519_v9, %v12336_v60 }
 0x45d   : > { %v6894_v6 = vcombine.low %v12539_v59, %v4335_v5  ;;  %v4205_v62 = vrot.slane %v4191_v24, %v12336_v60  ;;  %v4206_v43 = vcombine.high %v4198_v61, %v4198_v61  ;;  %v6861_v41 = vrot.slane %v6833_v54, %v12336_v60 }
 0x45e   : > { %v8519_v21 = vmax.f32 %v8517_v48, %v8518_v53  ;;  %v6892_v3 = vrot.slane %v6885_v46, %v12336_v60  ;;  %v6893_v15 = vcombine.low %v4336_v39, %v4319_v12  ;;  %v4214_v45 = vrot.slane %v4198_v61, %v12336_v60 }
 0x45f   : > { %v6910_v20 = vrot.slane %v6894_v6, %v12336_v60  ;;  %v4207_v50 = vcombine.high %v4205_v62, %v4205_v62  ;;  %v4228_v63 = vrot.slane %v4206_v43, %v12336_v60  ;;  %v6863_v9 = vcombine.low %v6854_v10, %v6861_v41 }
 0x460   : > { %v8520_v18 = vrot.slane %v8519_v21, 1  ;;  %v6903_v5 = vrot.slane %v6893_v15, %v12336_v60  ;;  %v4221_v24 = vrot.slane %v4205_v62, %v12336_v60  ;;  %v12555_v48 = vsel %vm8425_vm1, %v6892_v3, -inf }
 0x461   : > { %v4235_v53 = vrot.slane %v4207_v50, %v12336_v60  ;;  %v6721_v54 = vcombine.low %v4190_v27, %v4214_v45  ;;  %v6773_v12 = vrot.slane %v4228_v63, %v12336_v60  ;;  %v6877_v39 = vrot.slane %v6863_v9, %v12336_v60 }
 0x462   : > { %v12560_v46 = vcombine.low %v6903_v5, %v6910_v20  ;;  %v6742_v61 = vrot.slane %v6720_v16, %v12336_v60  ;;  %v9694_v6 = vcombine.high %v4214_v45, %v4228_v63  ;;  %v12567_v3 = vmax.f32 %v8519_v21, %v8520_v18 }
 0x463   : > { %v6749_v10 = vrot.slane %v6721_v54, %v12336_v60  ;;  %v6780_v15 = vrot.slane %v6773_v12, %v12336_v60  ;;  %v6782_v62 = vcombine.low %v4221_v24, %v4235_v53  ;;  %v9695_v43 = vcombine.high %v4221_v24, %v4235_v53  ;;  %v12565_v41 = vpop.f32.mrb[4].mxu0 }
 0x464   : > { %14043 = vst [vmem:[#allocation45_spill] sm:$0xff] %v12567_v3  ;;  %v6878_v50 = vcombine.low %v12530_v36, %v6877_v39  ;;  %v6791_v20 = vrot.slane %v9694_v6, %v12336_v60  ;;  %v2624_v9 = vpop.f32.mrb[5].mxu0  ;;  %v8522_v5 = vsel %vm8421_vm2, %v6717_v13, -inf  ;;  %v9881_v36 = vadd.f32 %v12243_v47, %v12485_v57 }
 0x465   : > { %v6751_v16 = vcombine.low %v6742_v61, %v6749_v10  ;;  %v6798_v45 = vrot.slane %v6782_v62, %v12336_v60  ;;  %v6805_v63 = vrot.slane %v9695_v43, %v12336_v60  ;;  %v12576_v24 = vpop.f32.mrb[6].mxu0  ;;  %v8525_v21 = vsel %vm8425_vm1, %v6780_v15, -inf }
 0x466   : > { %v9882_v18 = vadd.f32 %v12243_v47, %v12492_v28  ;;  %v2959_v53 = vadd.f32 %v12512_v42, %v12034_v56  ;;  %v2627_v54 = vpop.f32.mrb[7].mxu0  ;;  %v2951_v13 = vadd.f32 %v12516_v44, %v12005_v26  ;;  %v8534_v6 = vsel %vm8421_vm2, %v6878_v50, -inf }
 0x467   : > { %v6765_v12 = vrot.slane %v6751_v16, %v12336_v60  ;;  %v6813_v39 = vcombine.low %v6791_v20, %v6798_v45  ;;  %v6814_v61 = vcombine.low %v6805_v63, %v12502_v23  ;;  %v2855_v10 = vadd.f32 %v9881_v36, %v12259_v30 }
 0x468   : > { %v2858_v57 = vadd.f32 %v9882_v18, %v12268_v34  ;;  %v3086_v15 = vmax.f32 %v2959_v53, 0.0  ;;  %v12594_v42 = vmax.f32 %v2951_v13, 0.0 }
 0x469   : > { %v6766_v47 = vcombine.low %v6758_v19, %v6765_v12  ;;  %v6821_v28 = vrot.slane %v6813_v39, %v12336_v60  ;;  %v6828_v56 = vrot.slane %v6814_v61, %v12336_v60  ;;  %v3060_v62 = vmax.f32 %v2855_v10, 0.0 }
 0x46a   : > { %v3061_v43 = vmax.f32 %v2858_v57, 0.0  ;;  %v4436_v23 = vcombine.high %v3086_v15, %v3086_v15  ;;  %v12597_v20 = vrot.slane %v3086_v15, %v12336_v60 }
 0x46b   : > { %v6829_v26 = vcombine.low %v6821_v28, %v6828_v56  ;;  %v8523_v44 = vsel %vm8421_vm2, %v6766_v47, -inf  ;;  %v3162_v50 = vcombine.high %v3060_v62, %v3060_v62  ;;  %v3169_v9 = vrot.slane %v3060_v62, %v12336_v60 }
 0x46c   : > { %v8524_v19 = vmax.f32 %v8522_v5, %v8523_v44  ;;  %v3211_v16 = vcombine.high %v3061_v43, %v3061_v43  ;;  %v12605_v45 = vpop.f32.mrb[104].mxu1  ;;  %v3218_v36 = vrot.slane %v3061_v43, %v12336_v60  ;;  %v4450_v18 = vrot.slane %v4436_v23, %v12336_v60 }
 0x46d   : > { %v8533_v63 = vsel %vm8421_vm2, %v6829_v26, -inf  ;;  %v4451_v53 = vcombine.high %v12597_v20, %v12597_v20  ;;  %v12612_v54 = vpop.f32.mrb[105].mxu1  ;;  %v3176_v5 = vrot.slane %v3162_v50, %v12336_v60  ;;  %v3177_v61 = vcombine.high %v3169_v9, %v3169_v9 }
 0x46e   : > { %v8526_v12 = vmax.f32 %v8524_v19, %v8525_v21  ;;  %v8535_v39 = vmax.f32 %v8533_v63, %v8534_v6  ;;  %v12615_v13 = vpop.f32.mrb[106].mxu1  ;;  %v3185_v10 = vrot.slane %v3169_v9, %v12336_v60  ;;  %v3225_v57 = vrot.slane %v3211_v16, %v12336_v60 }
 0x46f   : > { %v3226_v15 = vcombine.high %v3218_v36, %v3218_v36  ;;  %v3234_v47 = vrot.slane %v3218_v36, %v12336_v60  ;;  %v12620_v28 = vpop.f32.mrb[107].mxu1  ;;  %v3178_v43 = vcombine.high %v3176_v5, %v3176_v5  ;;  %v3192_v21 = vrot.slane %v3176_v5, %v12336_v60 }
 0x470   : > { %v8527_v56 = vrot.slane %v8526_v12, 4  ;;  %v8537_v62 = vmax.f32 %v8535_v39, %v12555_v48  ;;  %v3199_v6 = vrot.slane %v3177_v61, %v12336_v60  ;;  %v3227_v23 = vcombine.high %v3225_v57, %v3225_v57 }
 0x471   : > { %v3241_v26 = vrot.slane %v3225_v57, %v12336_v60  ;;  %v3248_v44 = vrot.slane %v3226_v15, %v12336_v60  ;;  %v3206_v9 = vrot.slane %v3178_v43, %v12336_v60  ;;  %v4452_v16 = vcombine.high %v4450_v18, %v4450_v18 }
 0x472   : > { %v8528_v19 = vmax.f32 %v8526_v12, %v8527_v56  ;;  %v8538_v50 = vrot.slane %v8537_v62, 4  ;;  %v5661_v63 = vcombine.low %v3185_v10, %v3199_v6  ;;  %v9674_v36 = vcombine.high %v3185_v10, %v3199_v6 }
 0x473   : > { %v3255_v27 = vrot.slane %v3227_v23, %v12336_v60  ;;  %v5710_v48 = vcombine.low %v3234_v47, %v3248_v44  ;;  %v5663_v5 = vcombine.low %v3192_v21, %v3206_v9  ;;  %v9675_v34 = vcombine.high %v3192_v21, %v3206_v9 }
 0x474   : > { %v8529_v39 = vrot.slane %v8528_v19, 2  ;;  %v8539_v30 = vmax.f32 %v8537_v62, %v8538_v50  ;;  %v5671_v61 = vrot.slane %v5661_v63, %v12336_v60  ;;  %v5678_v57 = vrot.slane %v9674_v36, %v12336_v60 }
 0x475   : > { %v9676_v3 = vcombine.high %v3234_v47, %v3248_v44  ;;  %v5712_v15 = vcombine.low %v3241_v26, %v3255_v27  ;;  %v5685_v43 = vrot.slane %v5663_v5, %v12336_v60  ;;  %v5692_v0 = vrot.slane %v9675_v34, %v12336_v60 }
 0x476   : > { %v8530_v12 = vmax.f32 %v8528_v19, %v8529_v39  ;;  %v8540_v56 = vrot.slane %v8539_v30, 2  ;;  %v5693_v10 = vcombine.low %v5671_v61, %v5678_v57  ;;  %v9677_v6 = vcombine.high %v3241_v26, %v3255_v27 }
 0x477   : > { %v5720_v23 = vrot.slane %v5710_v48, %v12336_v60  ;;  %v5727_v62 = vrot.slane %v9676_v3, %v12336_v60  ;;  %v5694_v9 = vcombine.low %v5685_v43, %v5692_v0  ;;  %v5734_v63 = vrot.slane %v5712_v15, %v12336_v60 }
 0x478   : > { %v8531_v50 = vrot.slane %v8530_v12, 1  ;;  %v8541_v21 = vmax.f32 %v8539_v30, %v8540_v56  ;;  %v12637_v47 = vrot.slane %v5693_v10, %v12336_v60  ;;  %v5741_v44 = vrot.slane %v9677_v6, %v12336_v60 }
 0x479   : > { %v5742_v19 = vcombine.low %v5720_v23, %v5727_v62  ;;  %v4345_v34 = vrot.slane %v12594_v42, %v12336_v60  ;;  %v12645_v26 = vrot.slane %v5694_v9, %v12336_v60  ;;  %v4459_v0 = vrot.slane %v12597_v20, %v12336_v60 }
 0x47a   : > { %v12642_v36 = vmax.f32 %v8530_v12, %v8531_v50  ;;  %v8542_v27 = vrot.slane %v8541_v21, 1  ;;  %v12649_v3 = vpop.f32.mrb[8].mxu0  ;;  %v5743_v30 = vcombine.low %v5734_v63, %v5741_v44  ;;  %v4466_v48 = vrot.slane %v4450_v18, %v12336_v60 }
 0x47b   : > { %v4473_v39 = vrot.slane %v4451_v53, %v12336_v60  ;;  %v4480_v5 = vrot.slane %v4452_v16, %v12336_v60  ;;  %v2632_v61 = vpop.f32.mrb[9].mxu0  ;;  %v12659_v12 = vrot.slane %v5742_v19, %v12336_v60  ;;  %v14046_v20 = vcombine.high %v12594_v42, %v12594_v42 }
 0x47c   : > { %14044 = vst [vmem:[#allocation46_spill] sm:$0xff] %v12642_v36  ;;  %v12654_v57 = vmax.f32 %v8541_v21, %v8542_v27  ;;  %v8696_v15 = vpack.c.bf16 %v12642_v36, %v12642_v36  ;;  %v12665_v43 = vpop.f32.mrb[10].mxu0  ;;  %v12670_v23 = vrot.slane %v5743_v30, %v12336_v60  ;;  %v4353_v50 = vcombine.high %v4345_v34, %v4345_v34  ;;  %v12720_v36 = vld [vmem:[#allocation7] ss:$0 sm:$0xff] }
 0x47d   : > { %v4352_v56 = vrot.slane %v14046_v20, %v12336_v60  ;;  %v7007_v53 = vcombine.low %v4459_v0, %v4473_v39  ;;  %v9699_v16 = vcombine.high %v4459_v0, %v4473_v39  ;;  %v7054_v10 = vcombine.low %v4466_v48, %v4480_v5  ;;  %v2635_v6 = vpop.f32.mrb[11].mxu0 }
 0x47e   : > { %14045 = vst [vmem:[#allocation47_spill] sm:$0xff] %v12654_v57  ;;  %v9700_v62 = vcombine.high %v4466_v48, %v4480_v5  ;;  %v12672_v9 = vunpack.c.l.b16 %v8696_v15  ;;  %v4361_v27 = vrot.slane %v4345_v34, %v12336_v60  ;;  %v4375_v30 = vrot.slane %v4353_v50, %v12336_v60 }
 0x47f   : > { %v4354_v21 = vcombine.high %v4352_v56, %v4352_v56  ;;  %v7029_v42 = vrot.slane %v7007_v53, %v12336_v60  ;;  %v7036_v63 = vrot.slane %v9699_v16, %v12336_v60  ;;  %v7064_v44 = vrot.slane %v7054_v10, %v12336_v60 }
 0x480   : > { %14047 = vst [vmem:[#allocation48_spill] sm:$0xff] %v12672_v9  ;;  %v7071_v19 = vrot.slane %v9700_v62, %v12336_v60  ;;  %v4368_v0 = vrot.slane %v4352_v56, %v12336_v60  ;;  %v2962_v5 = vadd.f32 %v12522_v29, %v12037_v38  ;;  %v2954_v61 = vadd.f32 %v12527_v4, %v12009_v8 }
 0x481   : > { %v7038_v39 = vcombine.low %v7029_v42, %v7036_v63  ;;  %v4382_v48 = vrot.slane %v4354_v21, %v12336_v60  ;;  %v4383_v20 = vcombine.high %v4361_v27, %v4361_v27  ;;  %v4385_v16 = vcombine.high %v4375_v30, %v4375_v30 }
 0x482   : > { %v7086_v15 = vcombine.low %v7064_v44, %v7071_v19  ;;  %v4384_v53 = vcombine.high %v4368_v0, %v4368_v0  ;;  %v14048_v56 = vcombine.high %v12539_v59, %v12539_v59  ;;  %v3087_v6 = vmax.f32 %v2962_v5, 0.0 }
 0x483   : > { %v3085_v62 = vmax.f32 %v2954_v61, 0.0  ;;  %v12691_v50 = vpop.f32.mrb[108].mxu1  ;;  %v12694_v38 = vrot.slane %v7038_v39, %v12336_v60  ;;  %v6896_v29 = vcombine.low %v4375_v30, %v4383_v20  ;;  %v6942_v8 = vcombine.low %v4385_v16, %v4368_v0 }
 0x484   : > { %v6895_v10 = vcombine.low %v14048_v56, %v4361_v27  ;;  %v6943_v4 = vcombine.low %v4382_v48, %v4384_v53  ;;  %v12696_v21 = vpop.f32.mrb[109].mxu1  ;;  %v12699_v42 = vrot.slane %v7086_v15, %v12336_v60  ;;  %v4485_v44 = vcombine.high %v3087_v6, %v3087_v6 }
 0x485   : > { %v4492_v59 = vrot.slane %v3087_v6, %v12336_v60  ;;  %v12703_v19 = vpop.f32.mrb[110].mxu1  ;;  %v6924_v27 = vrot.slane %v6896_v29, %v12336_v60  ;;  %v6952_v39 = vrot.slane %v6942_v8, %v12336_v60  ;;  %v4387_v0 = vcombine.high %v3085_v62, %v3085_v62 }
 0x486   : > { %v6917_v63 = vrot.slane %v6895_v10, %v12336_v60  ;;  %v6959_v30 = vrot.slane %v6943_v4, %v12336_v60  ;;  %v12708_v5 = vpop.f32.mrb[111].mxu1  ;;  %v4499_v61 = vrot.slane %v4485_v44, %v12336_v60  ;;  %v4386_v20 = vcombine.high %v4382_v48, %v4382_v48 }
 0x487   : > { %v4500_v15 = vcombine.high %v4492_v59, %v4492_v59  ;;  %v4394_v53 = vrot.slane %v3085_v62, %v12336_v60  ;;  %v4508_v10 = vrot.slane %v4492_v59, %v12336_v60  ;;  %v4401_v6 = vrot.slane %v4387_v0, %v12336_v60 }
 0x488   : > { %v6926_v16 = vcombine.low %v6917_v63, %v6924_v27  ;;  %v12712_v56 = vcombine.low %v6952_v39, %v6959_v30  ;;  %v4501_v29 = vcombine.high %v4499_v61, %v4499_v61  ;;  %v4515_v8 = vrot.slane %v4499_v61, %v12336_v60 }
 0x489   : > { %v4522_v4 = vrot.slane %v4500_v15, %v12336_v60  ;;  %v4402_v18 = vcombine.high %v4394_v53, %v4394_v53  ;;  %v4403_v44 = vcombine.high %v4401_v6, %v4401_v6  ;;  %v4410_v48 = vrot.slane %v4394_v53, %v12336_v60 }
 0x48a   : > { %v6940_v34 = vrot.slane %v6926_v16, %v12336_v60  ;;  %v9883_v62 = vadd.f32 %v12720_v36, %v12565_v41  ;;  %v12725_v63 = vrot.slane %v4501_v29, %v12336_v60  ;;  %v4531_v59 = vcombine.high %v4515_v8, %v4515_v8 }
 0x48b   : > { %v7056_v27 = vcombine.low %v4508_v10, %v4522_v4  ;;  %v9701_v39 = vcombine.high %v4508_v10, %v4522_v4  ;;  %v14049_v30 = vrot.slane %v12560_v46, %v12336_v60  ;;  %v6982_v61 = vrot.slane %v12712_v56, %v12336_v60 }
 0x48c   : > { %v7109_v15 = vrot.slane %v4515_v8, %v12336_v60  ;;  %v4424_v53 = vrot.slane %v4402_v18, %v12336_v60  ;;  %v4417_v29 = vrot.slane %v4401_v6, %v12336_v60  ;;  %v4431_v9 = vrot.slane %v4403_v44, %v12336_v60 }
 0x48d   : > { %v6941_v0 = vcombine.low %v14049_v30, %v6940_v34  ;;  %v7078_v16 = vrot.slane %v7056_v27, %v12336_v60  ;;  %v7085_v41 = vrot.slane %v9701_v39, %v12336_v60  ;;  %v12740_v46 = vcombine.low %v12725_v63, %v4531_v59 }
 0x48e   : > { %v7116_v10 = vrot.slane %v7109_v15, %v12336_v60  ;;  %v4432_v34 = vcombine.high %v4410_v48, %v4410_v48  ;;  %v4434_v4 = vcombine.high %v4424_v53, %v4424_v53  ;;  %v6944_v30 = vcombine.low %v4386_v20, %v4410_v48 }
 0x48f   : > { %v7087_v56 = vcombine.low %v7078_v16, %v7085_v41  ;;  %v7005_v8 = vcombine.low %v4417_v29, %v4431_v9  ;;  %v9698_v57 = vcombine.high %v4417_v29, %v4431_v9  ;;  %v8544_v18 = vsel %vm8421_vm2, %v6941_v0, -inf }
 0x490   : > { %v6945_v27 = vcombine.low %v4424_v53, %v4432_v34  ;;  %v6997_v39 = vrot.slane %v4434_v4, %v12336_v60  ;;  %v2863_v6 = vadd.f32 %v9883_v62, %v12257_v51  ;;  %v6966_v15 = vrot.slane %v6944_v30, %v12336_v60 }
 0x491   : > { %v7101_v44 = vrot.slane %v7087_v56, %v12336_v60  ;;  %v7015_v59 = vrot.slane %v7005_v8, %v12336_v60  ;;  %v7022_v35 = vrot.slane %v9698_v57, %v12336_v60  ;;  %v12749_v33 = vpop.f32.mrb[12].mxu0  ;;  %v8558_v20 = vsel %vm8425_vm1, %v7116_v10, -inf }
 0x492   : > { %v6973_v9 = vrot.slane %v6945_v27, %v12336_v60  ;;  %v7004_v48 = vrot.slane %v6997_v39, %v12336_v60  ;;  %v3062_v0 = vmax.f32 %v2863_v6, 0.0  ;;  %v2640_v53 = vpop.f32.mrb[13].mxu0  ;;  %v14050_v16 = vcombine.low %v12659_v12, %v12670_v23 }
 0x493   : > { %v7102_v51 = vcombine.low %v12699_v42, %v7101_v44  ;;  %v7037_v62 = vcombine.low %v7015_v59, %v7022_v35  ;;  %v9884_v57 = vadd.f32 %v12720_v36, %v12576_v24  ;;  %v12761_v29 = vpop.f32.mrb[14].mxu0  ;;  %v14051_v56 = vcombine.low %v12637_v47, %v12645_v26 }
 0x494   : > { %v8423_v41 = vsel %vm8421_vm2, %v14050_v16, -inf  ;;  %v6975_v10 = vcombine.low %v6966_v15, %v6973_v9  ;;  %v3260_v34 = vcombine.high %v3062_v0, %v3062_v0  ;;  %v3267_v4 = vrot.slane %v3062_v0, %v12336_v60  ;;  %v2643_v35 = vpop.f32.mrb[15].mxu0 }
 0x495   : > { %v8422_v42 = vsel %vm8421_vm2, %v14051_v56, -inf  ;;  %v8556_v30 = vsel %vm8421_vm2, %v7102_v51, -inf  ;;  %v7045_v12 = vrot.slane %v7037_v62, %v12336_v60  ;;  %v2866_v8 = vadd.f32 %v9884_v57, %v12261_v7 }
 0x496   : > { %v8424_v23 = vmax.f32 %v8422_v42, %v8423_v41  ;;  %v6989_v24 = vrot.slane %v6975_v10, %v12336_v60  ;;  %v3274_v27 = vrot.slane %v3260_v34, %v12336_v60  ;;  %v3275_v39 = vcombine.high %v3267_v4, %v3267_v4 }
 0x497   : > { %v3283_v6 = vrot.slane %v3267_v4, %v12336_v60  ;;  %v7053_v44 = vcombine.low %v7045_v12, %v12694_v38  ;;  %v3063_v47 = vmax.f32 %v2866_v8, 0.0  ;;  %v2975_v26 = vadd.f32 %v12605_v45, %v12102_v31 }
 0x498   : > { %v2967_v15 = vadd.f32 %v12612_v54, %v12067_v32  ;;  %v6990_v59 = vcombine.low %v6982_v61, %v6989_v24  ;;  %v3276_v9 = vcombine.high %v3274_v27, %v3274_v27  ;;  %v3290_v7 = vrot.slane %v3274_v27, %v12336_v60 }
 0x499   : > { %v3297_v0 = vrot.slane %v3275_v39, %v12336_v60  ;;  %v8555_v53 = vsel %vm8421_vm2, %v7053_v44, -inf  ;;  %v3305_v51 = vcombine.high %v3283_v6, %v3283_v6  ;;  %v5765_v62 = vrot.slane %v3283_v6, %v12336_v60 }
 0x49a   : > { %v3309_v16 = vcombine.high %v3063_v47, %v3063_v47  ;;  %v8545_v38 = vsel %vm8421_vm2, %v6990_v59, -inf  ;;  %v8557_v41 = vmax.f32 %v8555_v53, %v8556_v30  ;;  %v3304_v31 = vrot.slane %v3276_v9, %v12336_v60  ;;  %v12785_v57 = vpop.f32.mrb[112].mxu1 }
 0x49b   : > { %v3306_v45 = vcombine.high %v3290_v7, %v3290_v7  ;;  %v8546_v32 = vmax.f32 %v8544_v18, %v8545_v38  ;;  %v3307_v54 = vcombine.high %v3297_v0, %v3297_v0  ;;  %v5772_v61 = vrot.slane %v5765_v62, %v12336_v60  ;;  %v12788_v34 = vpop.f32.mrb[113].mxu1 }
 0x49c   : > { %v5773_v10 = vcombine.low %v3297_v0, %v3305_v51  ;;  %v8547_v4 = vsel %vm8425_vm1, %v7004_v48, -inf  ;;  %v8559_v56 = vmax.f32 %v8557_v41, %v8558_v20  ;;  %v3316_v35 = vrot.slane %v3063_v47, %v12336_v60  ;;  %v12792_v12 = vpop.f32.mrb[114].mxu1 }
 0x49d   : > { %v5775_v42 = vcombine.low %v3304_v31, %v3306_v45  ;;  %v8548_v30 = vmax.f32 %v8546_v32, %v8547_v4  ;;  %v5774_v8 = vcombine.low %v3307_v54, %v3290_v7  ;;  %v8426_v24 = vsel %vm8425_vm1, %v5772_v61, -inf  ;;  %v12795_v18 = vpop.f32.mrb[115].mxu1 }
 0x49e   : > { %v3308_v27 = vcombine.high %v3304_v31, %v3304_v31  ;;  %v8560_v39 = vrot.slane %v8559_v56, 4  ;;  %v8427_v6 = vmax.f32 %v8424_v23, %v8426_v24  ;;  %v3323_v44 = vrot.slane %v3309_v16, %v12336_v60 }
 0x49f   : > { %v3324_v59 = vcombine.high %v3316_v35, %v3316_v35  ;;  %v8549_v9 = vrot.slane %v8548_v30, 4  ;;  %v5783_v20 = vrot.slane %v5773_v10, %v12336_v60  ;;  %v5790_v48 = vrot.slane %v5774_v8, %v12336_v60 }
 0x4a0   : > { %v3332_v47 = vrot.slane %v3316_v35, %v12336_v60  ;;  %v12801_v0 = vmax.f32 %v8559_v56, %v8560_v39  ;;  %v8428_v7 = vrot.slane %v8427_v6, 4  ;;  %v3325_v53 = vcombine.high %v3323_v44, %v3323_v44 }
 0x4a1   : > { %v3339_v51 = vrot.slane %v3323_v44, %v12336_v60  ;;  %v8550_v62 = vmax.f32 %v8548_v30, %v8549_v9  ;;  %v5805_v38 = vcombine.low %v5783_v20, %v5790_v48  ;;  %v3346_v23 = vrot.slane %v3324_v59, %v12336_v60 }
 0x4a2   : > { %v3354_v41 = vcombine.high %v3332_v47, %v3332_v47  ;;  %v8429_v16 = vmax.f32 %v8427_v6, %v8428_v7  ;;  %v12806_v31 = vrot.slane %v3325_v53, %v12336_v60  ;;  %v5797_v32 = vrot.slane %v5775_v42, %v12336_v60 }
 0x4a3   : > { %v3355_v45 = vcombine.high %v3339_v51, %v3339_v51  ;;  %v8551_v54 = vrot.slane %v8550_v62, 2  ;;  %v3356_v10 = vcombine.high %v3346_v23, %v3346_v23  ;;  %v5776_v4 = vcombine.low %v3308_v27, %v3332_v47 }
 0x4a4   : > { %v5813_v56 = vrot.slane %v5805_v38, %v12336_v60  ;;  %v8430_v35 = vrot.slane %v8429_v16, 2  ;;  %v5822_v30 = vcombine.low %v3346_v23, %v3354_v41  ;;  %v3090_v8 = vmax.f32 %v2975_v26, 0.0 }
 0x4a5   : > { %v8552_v24 = vmax.f32 %v8550_v62, %v8551_v54  ;;  %v5804_v39 = vrot.slane %v5776_v4, %v12336_v60  ;;  %v5823_v6 = vcombine.low %v3356_v10, %v3339_v51  ;;  %v3088_v44 = vmax.f32 %v2967_v15, 0.0 }
 0x4a6   : > { %v8431_v59 = vmax.f32 %v8429_v16, %v8430_v35  ;;  %v12813_v9 = vcombine.low %v12806_v31, %v3355_v45  ;;  %v4632_v42 = vcombine.high %v3090_v8, %v3090_v8  ;;  %v4639_v20 = vrot.slane %v3090_v8, %v12336_v60 }
 0x4a7   : > { %v8553_v48 = vrot.slane %v8552_v24, 1  ;;  %v5806_v7 = vcombine.low %v5797_v32, %v5804_v39  ;;  %v5832_v27 = vrot.slane %v5822_v30, %v12336_v60  ;;  %v5839_v47 = vrot.slane %v5823_v6, %v12336_v60 }
 0x4a8   : > { %v8432_v53 = vrot.slane %v8431_v59, 1  ;;  %v4646_v26 = vrot.slane %v4632_v42, %v12336_v60  ;;  %v4647_v62 = vcombine.high %v4639_v20, %v4639_v20  ;;  %v4533_v15 = vcombine.high %v12725_v63, %v12725_v63  ;;  %v12821_v51 = vpop.f32.mrb[16].mxu0 }
 0x4a9   : > { %v12823_v38 = vmax.f32 %v8552_v24, %v8553_v48  ;;  %v5820_v23 = vrot.slane %v5806_v7, %v12336_v60  ;;  %v4655_v41 = vrot.slane %v4639_v20, %v12336_v60  ;;  %v4534_v16 = vcombine.high %v3088_v44, %v3088_v44  ;;  %v2648_v45 = vpop.f32.mrb[17].mxu0 }
 0x4aa   : > { %v12827_v32 = vmax.f32 %v8431_v59, %v8432_v53  ;;  %v12829_v54 = vcombine.low %v5832_v27, %v5839_v47  ;;  %v4648_v10 = vcombine.high %v4646_v26, %v4646_v26  ;;  %v4669_v4 = vrot.slane %v4647_v62, %v12336_v60  ;;  %v12832_v35 = vpop.f32.mrb[18].mxu0 }
 0x4ab   : > { %14052 = vst [vmem:[#allocation49_spill] sm:$0xff] %v12823_v38  ;;  %v12834_v63 = vcombine.low %v5813_v56, %v5820_v23  ;;  %v4662_v30 = vrot.slane %v4646_v26, %v12336_v60  ;;  %v4541_v8 = vrot.slane %v3088_v44, %v12336_v60  ;;  %v4548_v24 = vrot.slane %v4534_v16, %v12336_v60  ;;  %v2651_v39 = vpop.f32.mrb[19].mxu0 }
 0x4ac   : > { %v8687_v6 = vpack.c.bf16 %v12827_v32, %v12827_v32  ;;  %v4676_v59 = vrot.slane %v4648_v10, %v12336_v60  ;;  %v7230_v42 = vcombine.low %v4655_v41, %v4669_v4  ;;  %v9703_v20 = vcombine.high %v4655_v41, %v4669_v4 }
 0x4ad   : > { %v4549_v48 = vcombine.high %v4541_v8, %v4541_v8  ;;  %v4550_v7 = vcombine.high %v4548_v24, %v4548_v24  ;;  %v4557_v27 = vrot.slane %v4541_v8, %v12336_v60  ;;  %v4564_v56 = vrot.slane %v4548_v24, %v12336_v60 }
 0x4ae   : > { %v12844_v47 = vunpack.c.l.b16 %v8687_v6  ;;  %v7232_v53 = vcombine.low %v4662_v30, %v4676_v59  ;;  %v12849_v26 = vrot.slane %v7230_v42, %v12336_v60  ;;  %v9704_v62 = vcombine.high %v4662_v30, %v4676_v59 }
 0x4af   : > { %v4571_v23 = vrot.slane %v4549_v48, %v12336_v60  ;;  %v4578_v41 = vrot.slane %v4550_v7, %v12336_v60  ;;  %v4579_v16 = vcombine.high %v4557_v27, %v4557_v27  ;;  %v7253_v45 = vrot.slane %v9703_v20, %v12336_v60 }
 0x4b0   : > { %14053 = vst [vmem:[#allocation50_spill] sm:$0xff] %v12844_v47  ;;  %v7260_v10 = vrot.slane %v7232_v53, %v12336_v60  ;;  %v4580_v4 = vcombine.high %v4564_v56, %v4564_v56  ;;  %v7118_v8 = vcombine.low %v4533_v15, %v4557_v27  ;;  %v7127_v6 = vrot.slane %v12740_v46, %v12336_v60 }
 0x4b1   : > { %v4581_v24 = vcombine.high %v4571_v23, %v4571_v23  ;;  %v7119_v39 = vcombine.low %v4571_v23, %v4579_v16  ;;  %v2978_v42 = vadd.f32 %v12615_v13, %v12107_v22  ;;  %v12859_v30 = vpop.f32.mrb[116].mxu1  ;;  %v2970_v20 = vadd.f32 %v12620_v28, %v12070_v58 }
 0x4b2   : > { %v7262_v59 = vcombine.low %v7253_v45, %v7260_v10  ;;  %v7134_v48 = vrot.slane %v7118_v8, %v12336_v60  ;;  %v12862_v7 = vcombine.low %v4578_v41, %v4580_v4  ;;  %v12866_v53 = vpop.f32.mrb[117].mxu1  ;;  %v12869_v15 = vrot.slane %v9704_v62, %v12336_v60 }
 0x4b3   : > { %v7120_v27 = vcombine.low %v4581_v24, %v4564_v56  ;;  %v7141_v46 = vrot.slane %v7119_v39, %v12336_v60  ;;  %v3091_v23 = vmax.f32 %v2978_v42, 0.0  ;;  %v3089_v16 = vmax.f32 %v2970_v20, 0.0 }
 0x4b4   : > { %v12873_v22 = vrot.slane %v7262_v59, %v12336_v60  ;;  %v7149_v13 = vcombine.low %v7127_v6, %v7134_v48  ;;  %v4582_v45 = vcombine.high %v4578_v41, %v4578_v41  ;;  %v9885_v28 = vadd.f32 %v12720_v36, %v12649_v3 }
 0x4b5   : > { %v7148_v10 = vrot.slane %v7120_v27, %v12336_v60  ;;  %v4681_v4 = vcombine.high %v3091_v23, %v3091_v23  ;;  %v4688_v58 = vrot.slane %v3091_v23, %v12336_v60  ;;  %v4583_v56 = vcombine.high %v3089_v16, %v3089_v16 }
 0x4b6   : > { %v7157_v62 = vrot.slane %v7149_v13, %v12336_v60  ;;  %v4590_v8 = vrot.slane %v3089_v16, %v12336_v60  ;;  %v7176_v24 = vrot.slane %v12862_v7, %v12336_v60  ;;  %v2871_v3 = vadd.f32 %v9885_v28, %v12287_v11  ;;  %v10250_v11 = vld [vmem:[#allocation8] sm:$0xff]  }
 0x4b7   : > { %v7150_v39 = vcombine.low %v7141_v46, %v7148_v10  ;;  %v4695_v6 = vrot.slane %v4681_v4, %v12336_v60  ;;  %v4696_v41 = vcombine.high %v4688_v58, %v4688_v58  ;;  %v4704_v42 = vrot.slane %v4688_v58, %v12336_v60  ;;  %9841 = vmatprep.subr.bf16.mxu1 %v10250_v11 }
 0x4b8   : > { %v4597_v59 = vrot.slane %v4583_v56, %v12336_v60  ;;  %v4598_v48 = vcombine.high %v4590_v8, %v4590_v8  ;;  %v4606_v20 = vrot.slane %v4590_v8, %v12336_v60  ;;  %9842 = vmatpush3.bf16.msra.mxu1 %v10250_v11 }
 0x4b9   : > { %v7164_v27 = vrot.slane %v7150_v39, %v12336_v60  ;;  %v4697_v23 = vcombine.high %v4695_v6, %v4695_v6  ;;  %v4711_v13 = vrot.slane %v4695_v6, %v12336_v60  ;;  %v4718_v7 = vrot.slane %v4696_v41, %v12336_v60 }
 0x4ba   : > { %v4599_v46 = vcombine.high %v4597_v59, %v4597_v59  ;;  %v4613_v16 = vrot.slane %v4597_v59, %v12336_v60  ;;  %v4620_v10 = vrot.slane %v4598_v48, %v12336_v60  ;;  %v4628_v4 = vcombine.high %v4606_v20, %v4606_v20  ;;  %v12902_v48 = vpop.f32.mrb[118].mxu1 }
 0x4bb   : > { %v7165_v58 = vcombine.low %v7157_v62, %v7164_v27  ;;  %v12894_v56 = vrot.slane %v4697_v23, %v12336_v60  ;;  %v4727_v8 = vcombine.high %v4711_v13, %v4711_v13  ;;  %v7279_v61 = vcombine.low %v4704_v42, %v4718_v7 }
 0x4bc   : > { %v9705_v28 = vcombine.high %v4704_v42, %v4718_v7  ;;  %v4627_v39 = vrot.slane %v4599_v46, %v12336_v60  ;;  %v4630_v44 = vcombine.high %v4620_v10, %v4620_v10  ;;  %v7167_v6 = vcombine.low %v4582_v45, %v4606_v20  ;;  %v12906_v45 = vpop.f32.mrb[119].mxu1 }
 0x4bd   : > { %v7281_v41 = vcombine.low %v4711_v13, %v12894_v56  ;;  %v7295_v47 = vrot.slane %v7279_v61, %v12336_v60  ;;  %v7333_v59 = vrot.slane %v4727_v8, %v12336_v60  ;;  %v3357_v62 = vcombine.high %v12806_v31, %v12806_v31 }
 0x4be   : > { %v7302_v27 = vrot.slane %v9705_v28, %v12336_v60  ;;  %v7168_v23 = vcombine.low %v4620_v10, %v4628_v4  ;;  %v7169_v42 = vcombine.low %v4630_v44, %v4613_v16  ;;  %v7183_v7 = vrot.slane %v7167_v6, %v12336_v60 }
 0x4bf   : > { %v7309_v20 = vrot.slane %v7281_v41, %v12336_v60  ;;  %v7310_v61 = vcombine.low %v12869_v15, %v7295_v47  ;;  %v7340_v13 = vrot.slane %v7333_v59, %v12336_v60  ;;  %v7221_v31 = vrot.slane %v4627_v39, %v12336_v60 }
 0x4c0   : > { %v7190_v46 = vrot.slane %v7168_v23, %v12336_v60  ;;  %v7197_v8 = vrot.slane %v7169_v42, %v12336_v60  ;;  %v7198_v28 = vcombine.low %v7176_v24, %v7183_v7  ;;  %v9702_v10 = vcombine.high %v4613_v16, %v4627_v39 }
 0x4c1   : > { %v8566_v44 = vsel %vm8421_vm2, %v7165_v58, -inf  ;;  %v7311_v4 = vcombine.low %v7302_v27, %v7309_v20  ;;  %v7318_v11 = vrot.slane %v7310_v61, %v12336_v60  ;;  %v7228_v6 = vrot.slane %v7221_v31, %v12336_v60 }
 0x4c2   : > { %v7199_v41 = vcombine.low %v7190_v46, %v7197_v8  ;;  %v7206_v47 = vrot.slane %v7198_v28, %v12336_v60  ;;  %v7239_v15 = vrot.slane %v9702_v10, %v12336_v60  ;;  %v3064_v59 = vmax.f32 %v2871_v3, 0.0 }
 0x4c3   : > { %v7325_v38 = vrot.slane %v7311_v4, %v12336_v60  ;;  %v8580_v23 = vsel %vm8425_vm1, %v7340_v13, -inf  ;;  %v8569_v24 = vsel %vm8425_vm1, %v7228_v6, -inf  ;;  %v5846_v16 = vrot.slane %v12813_v9, %v12336_v60 }
 0x4c4   : > { %v7213_v58 = vrot.slane %v7199_v41, %v12336_v60  ;;  %v7261_v39 = vcombine.low %v7239_v15, %v12849_v26  ;;  %v3358_v27 = vcombine.high %v3064_v59, %v3064_v59  ;;  %v3365_v42 = vrot.slane %v3064_v59, %v12336_v60 }
 0x4c5   : > { %v7326_v7 = vcombine.low %v7318_v11, %v7325_v38  ;;  %v9886_v3 = vadd.f32 %v12720_v36, %v12665_v43  ;;  %v2991_v20 = vadd.f32 %v12691_v50, %v12170_v37  ;;  %v12933_v61 = vadd.f32 %v12696_v21, %v12138_v1 }
 0x4c6   : > { %v7214_v13 = vcombine.low %v7206_v47, %v7213_v58  ;;  %v7269_v9 = vrot.slane %v7261_v39, %v12336_v60  ;;  %v3372_v31 = vrot.slane %v3358_v27, %v12336_v60  ;;  %v3373_v26 = vcombine.high %v3365_v42, %v3365_v42  ;;  %v12952_v58 = vpop.f32.mrb[20].mxu0 }
 0x4c7   : > { %v3381_v46 = vrot.slane %v3365_v42, %v12336_v60  ;;  %v12940_v38 = vsel %vm8421_vm2, %v12834_v63, -inf  ;;  %v2874_v43 = vadd.f32 %v9886_v3, %v12296_v2  ;;  %v3094_v8 = vmax.f32 %v2991_v20, 0.0  ;;  %v2656_v42 = vpop.f32.mrb[21].mxu0 }
 0x4c8   : > { %v8578_v37 = vsel %vm8421_vm2, %v7326_v7, -inf  ;;  %v7277_v1 = vcombine.low %v7269_v9, %v12873_v22  ;;  %v8567_v50 = vsel %vm8421_vm2, %v7214_v13, -inf  ;;  %v3374_v21 = vcombine.high %v3372_v31, %v3372_v31 }
 0x4c9   : > { %v8568_v28 = vmax.f32 %v8566_v44, %v8567_v50  ;;  %v3395_v10 = vrot.slane %v3373_v26, %v12336_v60  ;;  %v5825_v4 = vcombine.low %v3357_v62, %v3381_v46  ;;  %v3065_v11 = vmax.f32 %v2874_v43, 0.0 }
 0x4ca   : > { %v8577_v6 = vsel %vm8421_vm2, %v7277_v1, -inf  ;;  %v3388_v63 = vrot.slane %v3372_v31, %v12336_v60  ;;  %v3402_v41 = vrot.slane %v3374_v21, %v12336_v60  ;;  %v4828_v2 = vcombine.high %v3094_v8, %v3094_v8 }
 0x4cb   : > { %v8570_v47 = vmax.f32 %v8568_v28, %v8569_v24  ;;  %v8579_v15 = vmax.f32 %v8577_v6, %v8578_v37  ;;  %v5853_v59 = vrot.slane %v5825_v4, %v12336_v60  ;;  %v5877_v22 = vrot.slane %v3395_v10, %v12336_v60  ;;  %v12966_v28 = vpop.f32.mrb[22].mxu0 }
 0x4cc   : > { %v9678_v44 = vcombine.high %v3381_v46, %v3395_v10  ;;  %v5886_v39 = vcombine.low %v3388_v63, %v3402_v41  ;;  %v9679_v27 = vcombine.high %v3388_v63, %v3402_v41  ;;  %v3407_v62 = vcombine.high %v3065_v11, %v3065_v11  ;;  %v2659_v63 = vpop.f32.mrb[23].mxu0 }
 0x4cd   : > { %v8571_v7 = vrot.slane %v8570_v47, 4  ;;  %v12954_v3 = vmax.f32 %v8579_v15, %v8580_v23  ;;  %v5855_v20 = vcombine.low %v5846_v16, %v5853_v59  ;;  %v5884_v13 = vrot.slane %v5877_v22, %v12336_v60 }
 0x4ce   : > { %v5895_v24 = vrot.slane %v9678_v44, %v12336_v60  ;;  %v5902_v9 = vrot.slane %v5886_v39, %v12336_v60  ;;  %v3414_v31 = vrot.slane %v3065_v11, %v12336_v60  ;;  %v4835_v26 = vrot.slane %v3094_v8, %v12336_v60 }
 0x4cf   : > { %v8572_v43 = vmax.f32 %v8570_v47, %v8571_v7  ;;  %v5869_v46 = vrot.slane %v5855_v20, %v12336_v60  ;;  %v5909_v37 = vrot.slane %v9679_v27, %v12336_v60  ;;  %v3421_v1 = vrot.slane %v3407_v62, %v12336_v60 }
 0x4d0   : > { %v5917_v23 = vcombine.low %v5895_v24, %v5902_v9  ;;  %v8437_v16 = vsel %vm8425_vm1, %v5884_v13, -inf  ;;  %v3422_v50 = vcombine.high %v3414_v31, %v3414_v31  ;;  %v4842_v21 = vrot.slane %v4828_v2, %v12336_v60 }
 0x4d1   : > { %v8573_v10 = vrot.slane %v8572_v43, 2  ;;  %v14054_v4 = vrot.slane %v12829_v54, %v12336_v60  ;;  %v3423_v11 = vcombine.high %v3421_v1, %v3421_v1  ;;  %v3430_v6 = vrot.slane %v3414_v31, %v12336_v60 }
 0x4d2   : > { %v3437_v41 = vrot.slane %v3421_v1, %v12336_v60  ;;  %v3444_v47 = vrot.slane %v3422_v50, %v12336_v60  ;;  %v4843_v15 = vcombine.high %v4835_v26, %v4835_v26  ;;  %v4844_v59 = vcombine.high %v4842_v21, %v4842_v21 }
 0x4d3   : > { %v5870_v8 = vcombine.low %v14054_v4, %v5869_v46  ;;  %v12974_v22 = vmax.f32 %v8572_v43, %v8573_v10  ;;  %v12977_v2 = vrot.slane %v5917_v23, %v12336_v60  ;;  %v3451_v54 = vrot.slane %v3423_v11, %v12336_v60 }
 0x4d4   : > { %v5888_v27 = vcombine.low %v3430_v6, %v3444_v47  ;;  %v9680_v62 = vcombine.high %v3430_v6, %v3444_v47  ;;  %v4851_v42 = vrot.slane %v4835_v26, %v12336_v60  ;;  %v4865_v13 = vrot.slane %v4843_v15, %v12336_v60 }
 0x4d5   : > { %v8435_v44 = vsel %vm8421_vm2, %v5870_v8, -inf  ;;  %v5935_v7 = vcombine.low %v3437_v41, %v3451_v54  ;;  %v9681_v20 = vcombine.high %v3437_v41, %v3451_v54  ;;  %v4872_v24 = vrot.slane %v4844_v59, %v12336_v60  ;;  %v13003_v54 = vpop.f32.mrb[120].mxu1 }
 0x4d6   : > { %v8436_v39 = vmax.f32 %v12940_v38, %v8435_v44  ;;  %v5916_v31 = vrot.slane %v5888_v27, %v12336_v60  ;;  %v5944_v43 = vrot.slane %v9680_v62, %v12336_v60  ;;  %v4858_v46 = vrot.slane %v4842_v21, %v12336_v60 }
 0x4d7   : > { %v5951_v1 = vrot.slane %v5935_v7, %v12336_v60  ;;  %v7453_v38 = vcombine.low %v4851_v42, %v4865_v13  ;;  %v9706_v23 = vcombine.high %v4851_v42, %v4865_v13  ;;  %v3092_v50 = vmax.f32 %v12933_v61, 0.0  ;;  %v13009_v7 = vpop.f32.mrb[121].mxu1 }
 0x4d8   : > { %v8438_v9 = vmax.f32 %v8436_v39, %v8437_v16  ;;  %v5918_v10 = vcombine.low %v5909_v37, %v5916_v31  ;;  %v7455_v4 = vcombine.low %v4858_v46, %v4872_v24  ;;  %v9707_v8 = vcombine.high %v4858_v46, %v4872_v24 }
 0x4d9   : > { %v12991_v11 = vrot.slane %v9681_v20, %v12336_v60  ;;  %v5966_v16 = vcombine.low %v5944_v43, %v5951_v1  ;;  %v7463_v6 = vrot.slane %v7453_v38, %v12336_v60  ;;  %v7470_v63 = vrot.slane %v9706_v23, %v12336_v60 }
 0x4da   : > { %v8439_v26 = vrot.slane %v8438_v9, 4  ;;  %v12996_v21 = vrot.slane %v5918_v10, %v12336_v60  ;;  %v7477_v47 = vrot.slane %v7455_v4, %v12336_v60  ;;  %v7484_v61 = vrot.slane %v9707_v8, %v12336_v60 }
 0x4db   : > { %v7485_v15 = vcombine.low %v7463_v6, %v7470_v63  ;;  %v4729_v37 = vcombine.high %v12894_v56, %v12894_v56  ;;  %v4730_v59 = vcombine.high %v3092_v50, %v3092_v50  ;;  %v4737_v44 = vrot.slane %v3092_v50, %v12336_v60 }
 0x4dc   : > { %v8440_v41 = vmax.f32 %v8438_v9, %v8439_v26  ;;  %v5933_v27 = vcombine.low %v12977_v2, %v12996_v21  ;;  %v7486_v62 = vcombine.low %v7477_v47, %v7484_v61  ;;  %v2994_v42 = vadd.f32 %v12703_v19, %v12175_v55 }
 0x4dd   : > { %v13012_v20 = vrot.slane %v5966_v16, %v12336_v60  ;;  %v4744_v56 = vrot.slane %v4730_v59, %v12336_v60  ;;  %v4745_v13 = vcombine.high %v4737_v44, %v4737_v44  ;;  %v4753_v24 = vrot.slane %v4737_v44, %v12336_v60 }
 0x4de   : > { %v8441_v39 = vrot.slane %v8440_v41, 2  ;;  %v13019_v31 = vrot.slane %v7486_v62, %v12336_v60  ;;  %v3095_v43 = vmax.f32 %v2994_v42, 0.0  ;;  %v2986_v46 = vadd.f32 %v12708_v5, %v12142_v17 }
 0x4df   : > { %v4746_v55 = vcombine.high %v4744_v56, %v4744_v56  ;;  %v4760_v19 = vrot.slane %v4744_v56, %v12336_v60  ;;  %v4767_v1 = vrot.slane %v4745_v13, %v12336_v60  ;;  %v4775_v38 = vcombine.high %v4753_v24, %v4753_v24 }
 0x4e0   : > { %v13016_v9 = vmax.f32 %v8440_v41, %v8441_v39  ;;  %v13027_v50 = vrot.slane %v7485_v15, %v12336_v60  ;;  %v7341_v26 = vcombine.low %v4729_v37, %v4753_v24  ;;  %v4877_v10 = vcombine.high %v3095_v43, %v3095_v43 }
 0x4e1   : > { %v4774_v4 = vrot.slane %v4746_v55, %v12336_v60  ;;  %v4776_v8 = vcombine.high %v4760_v19, %v4760_v19  ;;  %v4777_v16 = vcombine.high %v4767_v1, %v4767_v1  ;;  %v7342_v6 = vcombine.low %v4767_v1, %v4775_v38 }
 0x4e2   : > { %v7501_v17 = vcombine.low %v13027_v50, %v13019_v31  ;;  %v4884_v5 = vrot.slane %v3095_v43, %v12336_v60  ;;  %v4891_v63 = vrot.slane %v4877_v10, %v12336_v60  ;;  %v3093_v41 = vmax.f32 %v2986_v46, 0.0 }
 0x4e3   : > { %v7343_v47 = vcombine.low %v4777_v16, %v4760_v19  ;;  %v7344_v61 = vcombine.low %v4774_v4, %v4776_v8  ;;  %v7351_v15 = vrot.slane %v7341_v26, %v12336_v60  ;;  %v7358_v37 = vrot.slane %v7342_v6, %v12336_v60 }
 0x4e4   : > { %v4892_v59 = vcombine.high %v4884_v5, %v4884_v5  ;;  %v4893_v44 = vcombine.high %v4891_v63, %v4891_v63  ;;  %v4900_v39 = vrot.slane %v4884_v5, %v12336_v60  ;;  %v4778_v62 = vcombine.high %v4774_v4, %v4774_v4 }
 0x4e5   : > { %v7365_v42 = vrot.slane %v7343_v47, %v12336_v60  ;;  %v7372_v56 = vrot.slane %v7344_v61, %v12336_v60  ;;  %v7373_v13 = vcombine.low %v7351_v15, %v7358_v37  ;;  %v4779_v24 = vcombine.high %v3093_v41, %v3093_v41 }
 0x4e6   : > { %v4907_v43 = vrot.slane %v4891_v63, %v12336_v60  ;;  %v4914_v46 = vrot.slane %v4892_v59, %v12336_v60  ;;  %v4921_v55 = vrot.slane %v4893_v44, %v12336_v60  ;;  %v4786_v19 = vrot.slane %v3093_v41, %v12336_v60 }
 0x4e7   : > { %v7374_v1 = vcombine.low %v7365_v42, %v7372_v56  ;;  %v7381_v38 = vrot.slane %v7373_v13, %v12336_v60  ;;  %v4793_v26 = vrot.slane %v4779_v24, %v12336_v60  ;;  %v9887_v10 = vadd.f32 %v12720_v36, %v12749_v33 }
 0x4e8   : > { %v7502_v4 = vcombine.low %v4900_v39, %v4914_v46  ;;  %v9708_v8 = vcombine.high %v4900_v39, %v4914_v46  ;;  %v7504_v16 = vcombine.low %v4907_v43, %v4921_v55  ;;  %v9709_v6 = vcombine.high %v4907_v43, %v4921_v55 }
 0x4e9   : > { %v7388_v5 = vrot.slane %v7374_v1, %v12336_v60  ;;  %v4794_v63 = vcombine.high %v4786_v19, %v4786_v19  ;;  %v4795_v47 = vcombine.high %v4793_v26, %v4793_v26  ;;  %v4802_v61 = vrot.slane %v4786_v19, %v12336_v60 }
 0x4ea   : > { %v7512_v41 = vrot.slane %v7502_v4, %v12336_v60  ;;  %v7519_v15 = vrot.slane %v9708_v8, %v12336_v60  ;;  %v7526_v37 = vrot.slane %v7504_v16, %v12336_v60  ;;  %v7533_v59 = vrot.slane %v9709_v6, %v12336_v60 }
 0x4eb   : > { %v7389_v44 = vcombine.low %v7381_v38, %v7388_v5  ;;  %v4809_v33 = vrot.slane %v4793_v26, %v12336_v60  ;;  %v4816_v39 = vrot.slane %v4794_v63, %v12336_v60  ;;  %v4823_v42 = vrot.slane %v4795_v47, %v12336_v60 }
 0x4ec   : > { %v7534_v56 = vcombine.low %v7512_v41, %v7519_v15  ;;  %v7535_v13 = vcombine.low %v7526_v37, %v7533_v59  ;;  %v4824_v24 = vcombine.high %v4802_v61, %v4802_v61  ;;  %v7390_v43 = vcombine.low %v4778_v62, %v4802_v61 }
 0x4ed   : > { %v4825_v46 = vcombine.high %v4809_v33, %v4809_v33  ;;  %v4826_v55 = vcombine.high %v4816_v39, %v4816_v39  ;;  %v4827_v19 = vcombine.high %v4823_v42, %v4823_v42  ;;  %v13060_v1 = vsel %vm8421_vm2, %v5933_v27, -inf }
 0x4ee   : > { %v8588_v38 = vsel %vm8421_vm2, %v7389_v44, -inf  ;;  %v13064_v26 = vrot.slane %v7535_v13, %v12336_v60  ;;  %v7391_v4 = vcombine.low %v4816_v39, %v4824_v24  ;;  %v7400_v8 = vrot.slane %v7390_v43, %v12336_v60 }
 0x4ef   : > { %v7392_v16 = vcombine.low %v4826_v55, %v4809_v33  ;;  %v7393_v6 = vcombine.low %v4823_v42, %v4825_v46  ;;  %v7445_v62 = vrot.slane %v4827_v19, %v12336_v60  ;;  %v2879_v5 = vadd.f32 %v9887_v10, %v12285_v52 }
 0x4f0   : > { %v13070_v63 = vrot.slane %v7534_v56, %v12336_v60  ;;  %v7407_v2 = vrot.slane %v7391_v4, %v12336_v60  ;;  %v9888_v21 = vadd.f32 %v12720_v36, %v12761_v29  ;;  %v3007_v27 = vadd.f32 %v12785_v57, %v12229_v14 }
 0x4f1   : > { %v7414_v47 = vrot.slane %v7392_v16, %v12336_v60  ;;  %v7421_v61 = vrot.slane %v7393_v6, %v12336_v60  ;;  %v7452_v41 = vrot.slane %v7445_v62, %v12336_v60  ;;  %v3066_v15 = vmax.f32 %v2879_v5, 0.0 }
 0x4f2   : > { %v7422_v37 = vcombine.low %v7400_v8, %v7407_v2  ;;  %v2882_v52 = vadd.f32 %v9888_v21, %v12289_v25  ;;  %v3098_v10 = vmax.f32 %v3007_v27, 0.0  ;;  %v13083_v59 = vadd.f32 %v12788_v34, %v12201_v40 }
 0x4f3   : > { %v7550_v36 = vcombine.low %v13070_v63, %v13064_v26  ;;  %v7423_v29 = vcombine.low %v7414_v47, %v7421_v61  ;;  %v3456_v14 = vcombine.high %v3066_v15, %v3066_v15  ;;  %v3463_v57 = vrot.slane %v3066_v15, %v12336_v60 }
 0x4f4   : > { %v7430_v44 = vrot.slane %v7422_v37, %v12336_v60  ;;  %v8591_v33 = vsel %vm8425_vm1, %v7452_v41, -inf  ;;  %v3067_v39 = vmax.f32 %v2882_v52, 0.0  ;;  %v5024_v42 = vcombine.high %v3098_v10, %v3098_v10 }
 0x4f5   : > { %v7437_v25 = vrot.slane %v7423_v29, %v12336_v60  ;;  %v3470_v56 = vrot.slane %v3456_v14, %v12336_v60  ;;  %v3471_v13 = vcombine.high %v3463_v57, %v3463_v57  ;;  %v3479_v40 = vrot.slane %v3463_v57, %v12336_v60 }
 0x4f6   : > { %v3505_v34 = vcombine.high %v3067_v39, %v3067_v39  ;;  %v3512_v24 = vrot.slane %v3067_v39, %v12336_v60  ;;  %v5031_v43 = vrot.slane %v3098_v10, %v12336_v60  ;;  %v5038_v46 = vrot.slane %v5024_v42, %v12336_v60 }
 0x4f7   : > { %v7438_v55 = vcombine.low %v7430_v44, %v7437_v25  ;;  %v3472_v19 = vcombine.high %v3470_v56, %v3470_v56  ;;  %v3486_v4 = vrot.slane %v3470_v56, %v12336_v60  ;;  %v3493_v8 = vrot.slane %v3471_v13, %v12336_v60 }
 0x4f8   : > { %v3501_v16 = vcombine.high %v3479_v40, %v3479_v40  ;;  %v3519_v6 = vrot.slane %v3505_v34, %v12336_v60  ;;  %v3520_v62 = vcombine.high %v3512_v24, %v3512_v24  ;;  %v3528_v5 = vrot.slane %v3512_v24, %v12336_v60 }
 0x4f9   : > { %v8589_v2 = vsel %vm8421_vm2, %v7438_v55, -inf  ;;  %v3500_v21 = vrot.slane %v3472_v19, %v12336_v60  ;;  %v3502_v27 = vcombine.high %v3486_v4, %v3486_v4  ;;  %v3503_v47 = vcombine.high %v3493_v8, %v3493_v8 }
 0x4fa   : > { %v8590_v61 = vmax.f32 %v8588_v38, %v8589_v2  ;;  %v5937_v41 = vcombine.low %v3479_v40, %v3493_v8  ;;  %v5989_v15 = vrot.slane %v3501_v16, %v12336_v60  ;;  %v3521_v37 = vcombine.high %v3519_v6, %v3519_v6 }
 0x4fb   : > { %v5997_v52 = vcombine.low %v3503_v47, %v3486_v4  ;;  %v5998_v10 = vcombine.low %v3500_v21, %v3502_v27  ;;  %v3504_v29 = vcombine.high %v3500_v21, %v3500_v21  ;;  %v3535_v14 = vrot.slane %v3519_v6, %v12336_v60 }
 0x4fc   : > { %v13104_v57 = vmax.f32 %v8590_v61, %v8591_v33  ;;  %v5965_v44 = vrot.slane %v5937_v41, %v12336_v60  ;;  %v5996_v39 = vrot.slane %v5989_v15, %v12336_v60  ;;  %v3542_v42 = vrot.slane %v3520_v62, %v12336_v60 }
 0x4fd   : > { %v6007_v25 = vrot.slane %v5997_v52, %v12336_v60  ;;  %v6014_v38 = vrot.slane %v5998_v10, %v12336_v60  ;;  %v13112_v56 = vrot.slane %v3521_v37, %v12336_v60  ;;  %v3550_v13 = vcombine.high %v3528_v5, %v3528_v5 }
 0x4fe   : > { %v5967_v34 = vcombine.low %v12991_v11, %v5965_v44  ;;  %v3551_v33 = vcombine.high %v3535_v14, %v3535_v14  ;;  %v5039_v24 = vcombine.high %v5031_v43, %v5031_v43  ;;  %v8448_v55 = vsel %vm8425_vm1, %v5996_v39, -inf }
 0x4ff   : > { %v3552_v19 = vcombine.high %v3542_v42, %v3542_v42  ;;  %v5999_v4 = vcombine.low %v3504_v29, %v3528_v5  ;;  %v6000_v8 = vcombine.low %v3542_v42, %v3550_v13  ;;  %v6029_v6 = vcombine.low %v6007_v25, %v6014_v38 }
 0x500   : > { %v5981_v16 = vrot.slane %v5967_v34, %v12336_v60  ;;  %v6047_v62 = vcombine.low %v13112_v56, %v3551_v33  ;;  %v5040_v2 = vcombine.high %v5038_v46, %v5038_v46  ;;  %v13122_v11 = vrot.slane %v5031_v43, %v12336_v60 }
 0x501   : > { %v6021_v21 = vrot.slane %v5999_v4, %v12336_v60  ;;  %v6028_v27 = vrot.slane %v6000_v8, %v12336_v60  ;;  %v6046_v47 = vcombine.low %v3552_v19, %v3535_v14  ;;  %v5054_v5 = vrot.slane %v5038_v46, %v12336_v60 }
 0x502   : > { %v5982_v61 = vcombine.low %v13012_v20, %v5981_v16  ;;  %v6063_v41 = vrot.slane %v6047_v62, %v12336_v60  ;;  %v5061_v15 = vrot.slane %v5039_v24, %v12336_v60  ;;  %v5068_v10 = vrot.slane %v5040_v2, %v12336_v60 }
 0x503   : > { %v6030_v37 = vcombine.low %v6021_v21, %v6028_v27  ;;  %v6056_v52 = vrot.slane %v6046_v47, %v12336_v60  ;;  %v3096_v29 = vmax.f32 %v13083_v59, 0.0  ;;  %v6037_v14 = vrot.slane %v6029_v6, %v12336_v60  ;;  %v13162_v47 = vpop.f32.mrb[122].mxu1 }
 0x504   : > { %v8446_v43 = vsel %vm8421_vm2, %v5982_v61, -inf  ;;  %v7669_v44 = vrot.slane %v5061_v15, %v12336_v60  ;;  %v9710_v20 = vcombine.high %v13122_v11, %v5061_v15  ;;  %v7678_v25 = vcombine.low %v5054_v5, %v5068_v10 }
 0x505   : > { %v8447_v39 = vmax.f32 %v13060_v1, %v8446_v43  ;;  %v6044_v46 = vrot.slane %v6030_v37, %v12336_v60  ;;  %v13137_v42 = vcombine.low %v6056_v52, %v6063_v41  ;;  %v9711_v13 = vcombine.high %v5054_v5, %v5068_v10  ;;  %v13169_v37 = vpop.f32.mrb[123].mxu1  ;;  %v14055_v43 = vld [vmem:[#allocation16_spill] sm:$0xff] }
 0x506   : > { %v7676_v38 = vrot.slane %v7669_v44, %v12336_v60  ;;  %v4926_v34 = vcombine.high %v3096_v29, %v3096_v29  ;;  %v8599_v59 = vsel %vm8421_vm2, %v7501_v17, -inf  ;;  %v7687_v19 = vrot.slane %v9710_v20, %v12336_v60 }
 0x507   : > { %v8449_v33 = vmax.f32 %v8447_v39, %v8448_v55  ;;  %v6045_v24 = vcombine.low %v6037_v14, %v6044_v46  ;;  %v7694_v1 = vrot.slane %v7678_v25, %v12336_v60  ;;  %v6086_v4 = vrot.slane %v13137_v42, %v12336_v60 }
 0x508   : > { %v13149_v8 = vrot.slane %v9711_v13, %v12336_v60  ;;  %v4933_v16 = vrot.slane %v3096_v29, %v12336_v60  ;;  %v4940_v6 = vrot.slane %v4926_v34, %v12336_v60  ;;  %v13154_v50 = vsel %vm8425_vm1, %v7676_v38, -inf }
 0x509   : > { %v8450_v62 = vrot.slane %v8449_v33, 4  ;;  %v7709_v31 = vcombine.low %v7687_v19, %v7694_v1  ;;  %v8600_v17 = vsel %vm8421_vm2, %v7550_v36, -inf  ;;  %v13165_v41 = vsel %vm8421_vm2, %v6045_v24, -inf }
 0x50a   : > { %v4941_v55 = vcombine.high %v4933_v16, %v4933_v16  ;;  %v4942_v2 = vcombine.high %v4940_v6, %v4940_v6  ;;  %v4949_v21 = vrot.slane %v4933_v16, %v12336_v60  ;;  %v4956_v27 = vrot.slane %v4940_v6, %v12336_v60 }
 0x50b   : > { %v8451_v61 = vmax.f32 %v8449_v33, %v8450_v62  ;;  %v8601_v5 = vmax.f32 %v8599_v59, %v8600_v17  ;;  %v3010_v15 = vadd.f32 %v12792_v12, %v12233_v49  ;;  %v3002_v44 = vadd.f32 %v12795_v18, %v14055_v43 }
 0x50c   : > { %v4963_v26 = vrot.slane %v4941_v55, %v12336_v60  ;;  %v4970_v63 = vrot.slane %v4942_v2, %v12336_v60  ;;  %v4971_v36 = vcombine.high %v4949_v21, %v4949_v21  ;;  %v4972_v52 = vcombine.high %v4956_v27, %v4956_v27 }
 0x50d   : > { %v8452_v10 = vrot.slane %v8451_v61, 2  ;;  %v7557_v29 = vrot.slane %v4949_v21, %v12336_v60  ;;  %v3099_v14 = vmax.f32 %v3010_v15, 0.0  ;;  %v13177_v20 = vrot.slane %v7709_v31, %v12336_v60 }
 0x50e   : > { %v4973_v39 = vcombine.high %v4963_v26, %v4963_v26  ;;  %v7565_v49 = vcombine.low %v4963_v26, %v4971_v36  ;;  %v13179_v12 = vcombine.low %v4970_v63, %v4972_v52  ;;  %v4974_v13 = vcombine.high %v4970_v63, %v4970_v63 }
 0x50f   : > { %v7564_v46 = vrot.slane %v7557_v29, %v12336_v60  ;;  %v5073_v25 = vcombine.high %v3099_v14, %v3099_v14  ;;  %v5080_v38 = vrot.slane %v3099_v14, %v12336_v60  ;;  %v13183_v34 = vmax.f32 %v8451_v61, %v8452_v10 }
 0x510   : > { %v7566_v59 = vcombine.low %v4973_v39, %v4956_v27  ;;  %v7575_v33 = vrot.slane %v7565_v49, %v12336_v60  ;;  %v3097_v24 = vmax.f32 %v3002_v44, 0.0  ;;  %v7589_v16 = vrot.slane %v13179_v12, %v12336_v60  ;;  %v13201_v44 = vld [vmem:[#allocation7] ss:$0 sm:$0xff] }
 0x511   : > { %v8602_v18 = vsel %vm8425_vm1, %v7564_v46, -inf  ;;  %v5087_v19 = vrot.slane %v5073_v25, %v12336_v60  ;;  %v5088_v1 = vcombine.high %v5080_v38, %v5080_v38  ;;  %v5096_v2 = vrot.slane %v5080_v38, %v12336_v60 }
 0x512   : > { %v7582_v6 = vrot.slane %v7566_v59, %v12336_v60  ;;  %v8603_v62 = vmax.f32 %v8601_v5, %v8602_v18  ;;  %v4975_v31 = vcombine.high %v3097_v24, %v3097_v24  ;;  %v4982_v17 = vrot.slane %v3097_v24, %v12336_v60  ;;  %v13210_v18 = vpop.f32.mrb[24].mxu0 }
 0x513   : > { %v5089_v55 = vcombine.high %v5087_v19, %v5087_v19  ;;  %v5103_v21 = vrot.slane %v5087_v19, %v12336_v60  ;;  %v5110_v27 = vrot.slane %v5088_v1, %v12336_v60  ;;  %v9889_v39 = vadd.f32 %v13201_v44, %v12821_v51 }
 0x514   : > { %v13195_v61 = vcombine.low %v7575_v33, %v7582_v6  ;;  %v8604_v15 = vrot.slane %v8603_v62, 4  ;;  %v4989_v26 = vrot.slane %v4975_v31, %v12336_v60  ;;  %v4990_v63 = vcombine.high %v4982_v17, %v4982_v17 }
 0x515   : > { %v5117_v36 = vrot.slane %v5089_v55, %v12336_v60  ;;  %v7680_v52 = vcombine.low %v5096_v2, %v5110_v27  ;;  %v9712_v5 = vcombine.high %v5096_v2, %v5110_v27  ;;  %v4998_v10 = vrot.slane %v4982_v17, %v12336_v60 }
 0x516   : > { %v8605_v29 = vmax.f32 %v8603_v62, %v8604_v15  ;;  %v4991_v14 = vcombine.high %v4989_v26, %v4989_v26  ;;  %v5005_v43 = vrot.slane %v4989_v26, %v12336_v60  ;;  %v7605_v49 = vrot.slane %v13195_v61, %v12336_v60  ;;  %v2664_v62 = vpop.f32.mrb[25].mxu0 }
 0x517   : > { %v7708_v12 = vrot.slane %v7680_v52, %v12336_v60  ;;  %v7727_v46 = vcombine.low %v5103_v21, %v5117_v36  ;;  %v9713_v25 = vcombine.high %v5103_v21, %v5117_v36  ;;  %v5012_v59 = vrot.slane %v4990_v63, %v12336_v60  ;;  %v13215_v21 = vpop.f32.mrb[26].mxu0 }
 0x518   : > { %v8606_v38 = vrot.slane %v8605_v29, 2  ;;  %v5019_v33 = vrot.slane %v4991_v14, %v12336_v60  ;;  %v5020_v24 = vcombine.high %v4998_v10, %v4998_v10  ;;  %v7736_v1 = vrot.slane %v9712_v5, %v12336_v60  ;;  %v2667_v63 = vpop.f32.mrb[27].mxu0 }
 0x519   : > { %v7710_v19 = vcombine.low %v13149_v8, %v7708_v12  ;;  %v7743_v51 = vrot.slane %v7727_v46, %v12336_v60  ;;  %v5021_v6 = vcombine.high %v5005_v43, %v5005_v43  ;;  %v5022_v17 = vcombine.high %v5012_v59, %v5012_v59  ;;  %v10251_v12 = vld [vmem:[#allocation8 + $0x8] sm:$0xff]   ;;  %v13229_v46 = vpop.f32.mrb[124].mxu1 }
 0x51a   : > { %v8607_v31 = vmax.f32 %v8605_v29, %v8606_v38  ;;  %v5023_v55 = vcombine.high %v5019_v33, %v5019_v33  ;;  %v7568_v2 = vcombine.low %v4974_v13, %v4998_v10  ;;  %v7614_v15 = vcombine.low %v5012_v59, %v5020_v24  ;;  %v14056_v24 = vld [vmem:[#allocation33_spill] sm:$0xff]  ;;  %9843 = vmatprep.subr.bf16.mxu1 %v10251_v12 }
 0x51b   : > { %v13218_v27 = vrot.slane %v7710_v19, %v12336_v60  ;;  %v7758_v61 = vcombine.low %v7736_v1, %v7743_v51  ;;  %v7616_v26 = vcombine.low %v5019_v33, %v5021_v6  ;;  %v7615_v52 = vcombine.low %v5022_v17, %v5005_v43  ;;  %v14057_v1 = vld [vmem:[#allocation24_spill] sm:$0xff]  ;;  %9844 = vmatpush3.bf16.msra.mxu1 %v10251_v12  ;;  %v13246_v17 = vpop.f32.mrb[125].mxu1 }
 0x51c   : > { %v8608_v8 = vrot.slane %v8607_v31, 1  ;;  %v7596_v36 = vrot.slane %v7568_v2, %v12336_v60  ;;  %v7617_v5 = vcombine.low %v5023_v55, %v13122_v11  ;;  %v13225_v13 = vrot.slane %v9713_v25, %v12336_v60  ;;  %v14058_v2 = vld [vmem:[#allocation27_spill] sm:$0xff] }
 0x51d   : > { %v7725_v29 = vcombine.low %v13177_v20, %v13218_v27  ;;  %v7624_v10 = vrot.slane %v7614_v15, %v12336_v60  ;;  %v7638_v14 = vrot.slane %v7616_v26, %v12336_v60  ;;  %v7631_v43 = vrot.slane %v7615_v52, %v12336_v60  ;;  %v14059_v15 = vld [vmem:[#allocation19_spill] sm:$0xff]  ;;  %v9840_v26 = vpop.f32.mrb[126].mxu1 }
 0x51e   : > { %v13231_v38 = vmax.f32 %v8607_v31, %v8608_v8  ;;  %v7598_v59 = vcombine.low %v7589_v16, %v7596_v36  ;;  %v7645_v11 = vrot.slane %v7617_v5, %v12336_v60  ;;  %v13236_v33 = vrot.slane %v7758_v61, %v12336_v60 }
 0x51f   : > { %v2887_v25 = vadd.f32 %v9889_v39, %v14056_v24  ;;  %v9890_v19 = vadd.f32 %v13201_v44, %v12832_v35  ;;  %v3023_v51 = vadd.f32 %v12859_v30, %v14057_v1  ;;  %v7646_v62 = vcombine.low %v7624_v10, %v7631_v43 }
 0x520   : > { %v8703_v6 = vpack.c.bf16 %v13231_v38, %v13231_v38  ;;  %v7612_v16 = vrot.slane %v7598_v59, %v12336_v60  ;;  %v7647_v31 = vcombine.low %v7638_v14, %v7645_v11  ;;  %v3015_v35 = vadd.f32 %v12866_v53, %v14059_v15 }
 0x521   : > { %v3068_v55 = vmax.f32 %v2887_v25, 0.0  ;;  %v2890_v39 = vadd.f32 %v9890_v19, %v14058_v2  ;;  %v3102_v61 = vmax.f32 %v3023_v51, 0.0  ;;  %v7654_v63 = vrot.slane %v7646_v62, %v12336_v60 }
 0x522   : > { %v7613_v30 = vcombine.low %v7605_v49, %v7612_v16  ;;  %v7661_v8 = vrot.slane %v7647_v31, %v12336_v60  ;;  %v3553_v36 = vcombine.high %v13112_v56, %v13112_v56  ;;  %v13256_v12 = vunpack.c.l.b16 %v8703_v6 }
 0x523   : > { %v3554_v52 = vcombine.high %v3068_v55, %v3068_v55  ;;  %v3561_v5 = vrot.slane %v3068_v55, %v12336_v60  ;;  %v3069_v10 = vmax.f32 %v2890_v39, 0.0  ;;  %v5220_v14 = vcombine.high %v3102_v61, %v3102_v61 }
 0x524   : > { %v7662_v59 = vcombine.low %v7654_v63, %v7661_v8  ;;  %v8610_v43 = vsel %vm8421_vm2, %v7613_v30, -inf  ;;  %v5227_v53 = vrot.slane %v3102_v61, %v12336_v60  ;;  %v13265_v51 = vmax.f32 %v3015_v35, 0.0 }
 0x525   : > { %v3568_v49 = vrot.slane %v3554_v52, %v12336_v60  ;;  %v3569_v11 = vcombine.high %v3561_v5, %v3561_v5  ;;  %v3577_v24 = vrot.slane %v3561_v5, %v12336_v60  ;;  %v3603_v25 = vcombine.high %v3069_v10, %v3069_v10 }
 0x526   : > { %v8611_v56 = vsel %vm8421_vm2, %v7662_v59, -inf  ;;  %v3610_v19 = vrot.slane %v3069_v10, %v12336_v60  ;;  %v5234_v1 = vrot.slane %v5220_v14, %v12336_v60  ;;  %v5235_v31 = vcombine.high %v5227_v53, %v5227_v53 }
 0x527   : > { %v8612_v6 = vmax.f32 %v8610_v43, %v8611_v56  ;;  %v3570_v16 = vcombine.high %v3568_v49, %v3568_v49  ;;  %v3591_v62 = vrot.slane %v3569_v11, %v12336_v60  ;;  %v3599_v55 = vcombine.high %v3577_v24, %v3577_v24 }
 0x528   : > { %v6048_v2 = vcombine.low %v3553_v36, %v3577_v24  ;;  %v3617_v39 = vrot.slane %v3603_v25, %v12336_v60  ;;  %v3618_v61 = vcombine.high %v3610_v19, %v3610_v19  ;;  %v3584_v26 = vrot.slane %v3568_v49, %v12336_v60 }
 0x529   : > { %v8614_v15 = vmax.f32 %v8612_v6, %v13154_v50  ;;  %v3598_v30 = vrot.slane %v3570_v16, %v12336_v60  ;;  %v3601_v63 = vcombine.high %v3591_v62, %v3591_v62  ;;  %v6049_v8 = vcombine.low %v3591_v62, %v3599_v55 }
 0x52a   : > { %v6070_v35 = vrot.slane %v6048_v2, %v12336_v60  ;;  %v3619_v52 = vcombine.high %v3617_v39, %v3617_v39  ;;  %v3626_v5 = vrot.slane %v3610_v19, %v12336_v60  ;;  %v3633_v50 = vrot.slane %v3617_v39, %v12336_v60 }
 0x52b   : > { %v8615_v10 = vrot.slane %v8614_v15, 4  ;;  %v6101_v14 = vrot.slane %v3601_v63, %v12336_v60  ;;  %v6109_v36 = vcombine.low %v3584_v26, %v3598_v30  ;;  %v9682_v59 = vcombine.high %v3584_v26, %v3598_v30 }
 0x52c   : > { %v6077_v43 = vrot.slane %v6049_v8, %v12336_v60  ;;  %v3640_v49 = vrot.slane %v3618_v61, %v12336_v60  ;;  %v3647_v11 = vrot.slane %v3619_v52, %v12336_v60  ;;  %v5236_v6 = vcombine.high %v5234_v1, %v5234_v1 }
 0x52d   : > { %v8616_v24 = vmax.f32 %v8614_v15, %v8615_v10  ;;  %v6119_v25 = vrot.slane %v6109_v36, %v12336_v60  ;;  %v6126_v56 = vrot.slane %v9682_v59, %v12336_v60  ;;  %v6108_v26 = vrot.slane %v6101_v14, %v12336_v60 }
 0x52e   : > { %v6079_v19 = vcombine.low %v6070_v35, %v6077_v43  ;;  %v6111_v16 = vcombine.low %v3626_v5, %v3640_v49  ;;  %v9683_v62 = vcombine.high %v3626_v5, %v3640_v49  ;;  %v6158_v55 = vcombine.low %v3633_v50, %v3647_v11 }
 0x52f   : > { %v8617_v2 = vrot.slane %v8616_v24, 2  ;;  %v6141_v30 = vcombine.low %v6119_v25, %v6126_v56  ;;  %v9684_v63 = vcombine.high %v3633_v50, %v3647_v11  ;;  %v13291_v5 = vrot.slane %v5227_v53, %v12336_v60 }
 0x530   : > { %v6093_v39 = vrot.slane %v6079_v19, %v12336_v60  ;;  %v6133_v61 = vrot.slane %v6111_v16, %v12336_v60  ;;  %v6140_v15 = vrot.slane %v9683_v62, %v12336_v60  ;;  %v6168_v8 = vrot.slane %v6158_v55, %v12336_v60 }
 0x531   : > { %v8618_v52 = vmax.f32 %v8616_v24, %v8617_v2  ;;  %v13287_v10 = vrot.slane %v6141_v30, %v12336_v60  ;;  %v6175_v35 = vrot.slane %v9684_v63, %v12336_v60  ;;  %v5250_v59 = vrot.slane %v5234_v1, %v12336_v60 }
 0x532   : > { %v6094_v14 = vcombine.low %v6086_v4, %v6093_v39  ;;  %v6142_v36 = vcombine.low %v6133_v61, %v6140_v15  ;;  %v5257_v43 = vrot.slane %v5235_v31, %v12336_v60  ;;  %v5264_v11 = vrot.slane %v5236_v6, %v12336_v60 }
 0x533   : > { %v8619_v50 = vrot.slane %v8618_v52, 1  ;;  %v6190_v49 = vcombine.low %v6168_v8, %v6175_v35  ;;  %v5265_v24 = vcombine.high %v13291_v5, %v13291_v5  ;;  %v5122_v42 = vcombine.high %v13265_v51, %v13265_v51 }
 0x534   : > { %v8457_v25 = vsel %vm8421_vm2, %v6094_v14, -inf  ;;  %v13303_v53 = vrot.slane %v6142_v36, %v12336_v60  ;;  %v5267_v56 = vcombine.high %v5257_v43, %v5257_v43  ;;  %v8459_v31 = vsel %vm8425_vm1, %v6108_v26, -inf }
 0x535   : > { %v13307_v4 = vmax.f32 %v8618_v52, %v8619_v50  ;;  %v8458_v1 = vmax.f32 %v13165_v41, %v8457_v25  ;;  %v13311_v19 = vcombine.low %v5257_v43, %v5265_v24  ;;  %v7901_v62 = vcombine.low %v5250_v59, %v5264_v11 }
 0x536   : > { %v6157_v6 = vcombine.low %v13287_v10, %v13303_v53  ;;  %v7893_v16 = vrot.slane %v5267_v56, %v12336_v60  ;;  %v9714_v55 = vcombine.high %v5250_v59, %v5264_v11  ;;  %v13319_v63 = vrot.slane %v6190_v49, %v12336_v60 }
 0x537   : > { %v8704_v2 = vpack.c.bf16 %v13307_v4, %v13307_v4  ;;  %v8460_v30 = vmax.f32 %v8458_v1, %v8459_v31  ;;  %v5129_v41 = vrot.slane %v13265_v51, %v12336_v60  ;;  %v7911_v39 = vrot.slane %v7901_v62, %v12336_v60  ;;  %v14060_v1 = vld [vmem:[#allocation25_spill] sm:$0xff] }
 0x538   : > { %v7900_v26 = vrot.slane %v7893_v16, %v12336_v60  ;;  %v7918_v61 = vrot.slane %v9714_v55, %v12336_v60  ;;  %v5136_v15 = vrot.slane %v5122_v42, %v12336_v60  ;;  %v7869_v52 = vrot.slane %v13311_v19, %v12336_v60  ;;  %v13346_v16 = vpop.f32.mrb[127].mxu1 }
 0x539   : > { %v8461_v8 = vrot.slane %v8460_v30, 4  ;;  %v5137_v35 = vcombine.high %v5129_v41, %v5129_v41  ;;  %v5145_v14 = vrot.slane %v5129_v41, %v12336_v60  ;;  %v13330_v36 = vunpack.c.l.b16 %v8704_v2 }
 0x53a   : > { %v7933_v59 = vcombine.low %v7911_v39, %v7918_v61  ;;  %v5138_v43 = vcombine.high %v5136_v15, %v5136_v15  ;;  %v5152_v51 = vrot.slane %v5136_v15, %v12336_v60  ;;  %v13336_v49 = vsel %vm8425_vm1, %v7900_v26, -inf }
 0x53b   : > { %v13333_v50 = vmax.f32 %v8460_v30, %v8461_v8  ;;  %v5159_v11 = vrot.slane %v5137_v35, %v12336_v60  ;;  %v5167_v24 = vcombine.high %v5145_v14, %v5145_v14  ;;  %v8621_v42 = vsel %vm8421_vm2, %v7725_v29, -inf  ;;  %v14061_v30 = vld [vmem:[#allocation20_spill] sm:$0xff] }
 0x53c   : > { %v5166_v25 = vrot.slane %v5138_v43, %v12336_v60  ;;  %v5168_v56 = vcombine.high %v5152_v51, %v5152_v51  ;;  %v3026_v31 = vadd.f32 %v12902_v48, %v14060_v1  ;;  %v3018_v41 = vadd.f32 %v12906_v45, %v14061_v30  ;;  %v14062_v45 = vld [vmem:[#allocation22_spill] sm:$0xff] }
 0x53d   : > { %v5169_v62 = vcombine.high %v5159_v11, %v5159_v11  ;;  %v7729_v55 = vcombine.low %v5145_v14, %v5159_v11  ;;  %v7781_v2 = vrot.slane %v5167_v24, %v12336_v60  ;;  %v13352_v26 = vrot.slane %v7933_v59, %v12336_v60 }
 0x53e   : > { %v7790_v39 = vcombine.low %v5166_v25, %v5168_v56  ;;  %v3103_v61 = vmax.f32 %v3026_v31, 0.0  ;;  %v9891_v20 = vadd.f32 %v13201_v44, %v12952_v58  ;;  %v3101_v15 = vmax.f32 %v3018_v41, 0.0 }
 0x53f   : > { %v7757_v27 = vrot.slane %v7729_v55, %v12336_v60  ;;  %v7788_v48 = vrot.slane %v7781_v2, %v12336_v60  ;;  %v7789_v29 = vcombine.low %v5169_v62, %v5152_v51  ;;  %v5170_v24 = vcombine.high %v5166_v25, %v5166_v25 }
 0x540   : > { %v7806_v8 = vrot.slane %v7790_v39, %v12336_v60  ;;  %v5269_v35 = vcombine.high %v3103_v61, %v3103_v61  ;;  %v5276_v14 = vrot.slane %v3103_v61, %v12336_v60  ;;  %v2895_v43 = vadd.f32 %v9891_v20, %v14062_v45 }
 0x541   : > { %v7759_v59 = vcombine.low %v13225_v13, %v7757_v27  ;;  %v7799_v11 = vrot.slane %v7789_v29, %v12336_v60  ;;  %v5171_v56 = vcombine.high %v3101_v15, %v3101_v15  ;;  %v8624_v58 = vsel %vm8425_vm1, %v7788_v48, -inf }
 0x542   : > { %v5283_v1 = vrot.slane %v5269_v35, %v12336_v60  ;;  %v5284_v31 = vcombine.high %v5276_v14, %v5276_v14  ;;  %v5178_v51 = vrot.slane %v3101_v15, %v12336_v60  ;;  %v5292_v2 = vrot.slane %v5276_v14, %v12336_v60 }
 0x543   : > { %v7773_v62 = vrot.slane %v7759_v59, %v12336_v60  ;;  %v13367_v55 = vcombine.low %v7799_v11, %v7806_v8  ;;  %v5185_v30 = vrot.slane %v5171_v56, %v12336_v60  ;;  %v3070_v39 = vmax.f32 %v2895_v43, 0.0 }
 0x544   : > { %v5285_v13 = vcombine.high %v5283_v1, %v5283_v1  ;;  %v5306_v41 = vrot.slane %v5284_v31, %v12336_v60  ;;  %v5186_v25 = vcombine.high %v5178_v51, %v5178_v51  ;;  %v5299_v20 = vrot.slane %v5283_v1, %v12336_v60 }
 0x545   : > { %v7774_v61 = vcombine.low %v13236_v33, %v7773_v62  ;;  %v5187_v27 = vcombine.high %v5185_v30, %v5185_v30  ;;  %v5194_v48 = vrot.slane %v5178_v51, %v12336_v60  ;;  %v5201_v35 = vrot.slane %v5185_v30, %v12336_v60 }
 0x546   : > { %v5313_v29 = vrot.slane %v5285_v13, %v12336_v60  ;;  %v7903_v15 = vcombine.low %v5292_v2, %v5306_v41  ;;  %v9715_v8 = vcombine.high %v5292_v2, %v5306_v41  ;;  %v5208_v45 = vrot.slane %v5186_v25, %v12336_v60 }
 0x547   : > { %v8622_v14 = vsel %vm8421_vm2, %v7774_v61, -inf  ;;  %v5215_v59 = vrot.slane %v5187_v27, %v12336_v60  ;;  %v5216_v43 = vcombine.high %v5194_v48, %v5194_v48  ;;  %v5217_v51 = vcombine.high %v5201_v35, %v5201_v35 }
 0x548   : > { %v8623_v11 = vmax.f32 %v8621_v42, %v8622_v14  ;;  %v7925_v33 = vrot.slane %v7903_v15, %v12336_v60  ;;  %v7932_v56 = vrot.slane %v9715_v8, %v12336_v60  ;;  %v7950_v1 = vcombine.low %v5299_v20, %v5313_v29 }
 0x549   : > { %v9716_v31 = vcombine.high %v5299_v20, %v5313_v29  ;;  %v5218_v62 = vcombine.high %v5208_v45, %v5208_v45  ;;  %v5219_v13 = vcombine.high %v5215_v59, %v5215_v59  ;;  %v7791_v61 = vcombine.low %v5170_v24, %v5194_v48 }
 0x54a   : > { %v8625_v2 = vmax.f32 %v8623_v11, %v8624_v58  ;;  %v7934_v41 = vcombine.low %v7925_v33, %v7932_v56  ;;  %v7960_v30 = vrot.slane %v7950_v1, %v12336_v60  ;;  %v7792_v40 = vcombine.low %v5208_v45, %v5216_v43 }
 0x54b   : > { %v7967_v25 = vrot.slane %v9716_v31, %v12336_v60  ;;  %v7838_v27 = vcombine.low %v5218_v62, %v5201_v35  ;;  %v7839_v23 = vcombine.low %v5215_v59, %v5217_v51  ;;  %v7813_v8 = vrot.slane %v7791_v61, %v12336_v60 }
 0x54c   : > { %v8626_v42 = vrot.slane %v8625_v2, 4  ;;  %v13385_v15 = vrot.slane %v7934_v41, %v12336_v60  ;;  %v7840_v20 = vcombine.low %v5219_v13, %v13291_v5  ;;  %v7820_v58 = vrot.slane %v7792_v40, %v12336_v60 }
 0x54d   : > { %v7982_v29 = vcombine.low %v7960_v30, %v7967_v25  ;;  %v7848_v14 = vrot.slane %v7838_v27, %v12336_v60  ;;  %v7855_v24 = vrot.slane %v7839_v23, %v12336_v60  ;;  %v3652_v59 = vcombine.high %v3070_v39, %v3070_v39 }
 0x54e   : > { %v8627_v48 = vmax.f32 %v8625_v2, %v8626_v42  ;;  %v7949_v35 = vcombine.low %v13352_v26, %v13385_v15  ;;  %v7862_v45 = vrot.slane %v7840_v20, %v12336_v60  ;;  %v7829_v43 = vrot.slane %v13367_v55, %v12336_v60 }
 0x54f   : > { %v7822_v11 = vcombine.low %v7813_v8, %v7820_v58  ;;  %v7870_v33 = vcombine.low %v7848_v14, %v7855_v24  ;;  %v3659_v5 = vrot.slane %v3070_v39, %v12336_v60  ;;  %v13399_v40 = vrot.slane %v7982_v29, %v12336_v60 }
 0x550   : > { %v8628_v56 = vrot.slane %v8627_v48, 2  ;;  %v7871_v23 = vcombine.low %v7862_v45, %v7869_v52  ;;  %v3666_v1 = vrot.slane %v3652_v59, %v12336_v60  ;;  %v9892_v19 = vadd.f32 %v13201_v44, %v12966_v28  ;;  %v14063_v52 = vld [vmem:[#allocation34_spill] sm:$0xff] }
 0x551   : > { %v7836_v31 = vrot.slane %v7822_v11, %v12336_v60  ;;  %v7878_v51 = vrot.slane %v7870_v33, %v12336_v60  ;;  %v3667_v62 = vcombine.high %v3659_v5, %v3659_v5  ;;  %v3675_v55 = vrot.slane %v3659_v5, %v12336_v60  ;;  %v14064_v28 = vld [vmem:[#allocation26_spill] sm:$0xff] }
 0x552   : > { %v8629_v13 = vmax.f32 %v8627_v48, %v8628_v56  ;;  %v7885_v39 = vrot.slane %v7871_v23, %v12336_v60  ;;  %v3668_v2 = vcombine.high %v3666_v1, %v3666_v1  ;;  %v3682_v41 = vrot.slane %v3666_v1, %v12336_v60 }
 0x553   : > { %v7837_v30 = vcombine.low %v7829_v43, %v7836_v31  ;;  %v3689_v61 = vrot.slane %v3667_v62, %v12336_v60  ;;  %v3039_v25 = vadd.f32 %v13003_v54, %v14063_v52  ;;  %v2898_v43 = vadd.f32 %v9892_v19, %v14064_v28 }
 0x554   : > { %v8630_v27 = vrot.slane %v8629_v13, 1  ;;  %v7886_v42 = vcombine.low %v7878_v51, %v7885_v39  ;;  %v3696_v8 = vrot.slane %v3668_v2, %v12336_v60  ;;  %v3698_v20 = vcombine.high %v3682_v41, %v3682_v41 }
 0x555   : > { %v8632_v29 = vsel %vm8421_vm2, %v7837_v30, -inf  ;;  %v6160_v58 = vcombine.low %v3675_v55, %v3689_v61  ;;  %v9685_v14 = vcombine.high %v3675_v55, %v3689_v61  ;;  %v6213_v24 = vrot.slane %v3682_v41, %v12336_v60  ;;  %v14065_v30 = vld [vmem:[#allocation28_spill] sm:$0xff] }
 0x556   : > { %v13418_v48 = vmax.f32 %v8629_v13, %v8630_v27  ;;  %v8633_v45 = vsel %vm8421_vm2, %v7886_v42, -inf  ;;  %v6221_v59 = vcombine.low %v3696_v8, %v3698_v20  ;;  %v8467_v23 = vsel %vm8421_vm2, %v6157_v6, -inf }
 0x557   : > { %v8634_v11 = vmax.f32 %v8632_v29, %v8633_v45  ;;  %v6182_v54 = vrot.slane %v6160_v58, %v12336_v60  ;;  %v6189_v33 = vrot.slane %v9685_v14, %v12336_v60  ;;  %v6220_v5 = vrot.slane %v6213_v24, %v12336_v60 }
 0x558   : > { %v8705_v56 = vpack.c.bf16 %v13418_v48, %v13418_v48  ;;  %v3071_v1 = vmax.f32 %v2898_v43, 0.0  ;;  %v3700_v31 = vcombine.high %v3696_v8, %v3696_v8  ;;  %v6231_v55 = vrot.slane %v6221_v59, %v12336_v60 }
 0x559   : > { %v8636_v51 = vmax.f32 %v8634_v11, %v13336_v49  ;;  %v6191_v62 = vcombine.low %v6182_v54, %v6189_v33  ;;  %v3106_v13 = vmax.f32 %v3039_v25, 0.0  ;;  %v8470_v39 = vsel %vm8425_vm1, %v6220_v5, -inf }
 0x55a   : > { %v3701_v2 = vcombine.high %v3071_v1, %v3071_v1  ;;  %v3708_v41 = vrot.slane %v3071_v1, %v12336_v60  ;;  %v3031_v61 = vadd.f32 %v13009_v7, %v14065_v30 }
 0x55b   : > { %v8637_v19 = vrot.slane %v8636_v51, 4  ;;  %v6205_v10 = vrot.slane %v6191_v62, %v12336_v60  ;;  %v5416_v53 = vcombine.high %v3106_v13, %v3106_v13  ;;  %v5423_v6 = vrot.slane %v3106_v13, %v12336_v60 }
 0x55c   : > { %v3715_v49 = vrot.slane %v3701_v2, %v12336_v60  ;;  %v3716_v52 = vcombine.high %v3708_v41, %v3708_v41  ;;  %v3724_v27 = vrot.slane %v3708_v41, %v12336_v60  ;;  %v3104_v25 = vmax.f32 %v3031_v61, 0.0 }
 0x55d   : > { %v8638_v42 = vmax.f32 %v8636_v51, %v8637_v19  ;;  %v6206_v8 = vcombine.low %v13319_v63, %v6205_v10  ;;  %v5430_v20 = vrot.slane %v5416_v53, %v12336_v60  ;;  %v5431_v29 = vcombine.high %v5423_v6, %v5423_v6 }
 0x55e   : > { %v3717_v58 = vcombine.high %v3715_v49, %v3715_v49  ;;  %v3731_v7 = vrot.slane %v3715_v49, %v12336_v60  ;;  %v3738_v14 = vrot.slane %v3716_v52, %v12336_v60  ;;  %v3746_v24 = vcombine.high %v3724_v27, %v3724_v27 }
 0x55f   : > { %v8639_v45 = vrot.slane %v8638_v42, 2  ;;  %v8468_v59 = vsel %vm8421_vm2, %v6206_v8, -inf  ;;  %v6222_v28 = vcombine.low %v3700_v31, %v3724_v27  ;;  %v5432_v43 = vcombine.high %v5430_v20, %v5430_v20 }
 0x560   : > { %v8469_v11 = vmax.f32 %v8467_v23, %v8468_v59  ;;  %v13447_v54 = vrot.slane %v3717_v58, %v12336_v60  ;;  %v3747_v33 = vcombine.high %v3731_v7, %v3731_v7  ;;  %v3748_v63 = vcombine.high %v3738_v14, %v3738_v14 }
 0x561   : > { %v8640_v5 = vmax.f32 %v8638_v42, %v8639_v45  ;;  %v6223_v1 = vcombine.low %v3738_v14, %v3746_v24  ;;  %v6238_v51 = vrot.slane %v6222_v28, %v12336_v60  ;;  %v13451_v62 = vrot.slane %v5423_v6, %v12336_v60 }
 0x562   : > { %v13453_v13 = vunpack.c.l.b16 %v8705_v56  ;;  %v8471_v2 = vmax.f32 %v8469_v11, %v8470_v39  ;;  %v6224_v41 = vcombine.low %v3748_v63, %v3731_v7  ;;  %v13456_v31 = vcombine.low %v13447_v54, %v3747_v33 }
 0x563   : > { %v8641_v23 = vrot.slane %v8640_v5, 1  ;;  %v6245_v30 = vrot.slane %v6223_v1, %v12336_v60  ;;  %v6253_v61 = vcombine.low %v6231_v55, %v6238_v51  ;;  %v5453_v19 = vrot.slane %v5431_v29, %v12336_v60 }
 0x564   : > { %v8472_v10 = vrot.slane %v8471_v2, 4  ;;  %v6252_v53 = vrot.slane %v6224_v41, %v12336_v60  ;;  %v5460_v49 = vrot.slane %v5432_v43, %v12336_v60  ;;  %v5461_v56 = vcombine.high %v13451_v62, %v13451_v62 }
 0x565   : > { %v13464_v6 = vmax.f32 %v8640_v5, %v8641_v23  ;;  %v5446_v39 = vrot.slane %v5430_v20, %v12336_v60  ;;  %v5463_v52 = vcombine.high %v5453_v19, %v5453_v19  ;;  %v5318_v27 = vcombine.high %v3104_v25, %v3104_v25 }
 0x566   : > { %v6254_v42 = vcombine.low %v6245_v30, %v6252_v53  ;;  %v6261_v8 = vrot.slane %v6253_v61, %v12336_v60  ;;  %v8064_v55 = vcombine.low %v5453_v19, %v5461_v56  ;;  %v8117_v29 = vrot.slane %v5460_v49, %v12336_v60  ;;  %v14067_v53 = vld [vmem:[#allocation21_spill] sm:$0xff]  ;;  %v14068_v56 = vld [vmem:[#allocation36_spill] sm:$0xff] }
 0x567   : > { %v8706_v58 = vpack.c.bf16 %v13464_v6, %v13464_v6  ;;  %v8065_v7 = vcombine.low %v5463_v52, %v5446_v39  ;;  %v9718_v14 = vcombine.high %v5446_v39, %v5460_v49  ;;  %v5325_v24 = vrot.slane %v3104_v25, %v12336_v60  ;;  %v14069_v39 = vld [vmem:[#allocation23_spill] sm:$0xff] }
 0x568   : > { %v13472_v45 = vmax.f32 %v8471_v2, %v8472_v10  ;;  %v6268_v59 = vrot.slane %v6254_v42, %v12336_v60  ;;  %v8124_v20 = vrot.slane %v8117_v29, %v12336_v60  ;;  %v5332_v28 = vrot.slane %v5318_v27, %v12336_v60  ;;  %v14066_v10 = vld [vmem:[#allocation31_spill] sm:$0xff] }
 0x569   : > { %v13477_v43 = vunpack.c.l.b16 %v8706_v58  ;;  %v8086_v11 = vrot.slane %v8064_v55, %v12336_v60  ;;  %v8093_v33 = vrot.slane %v8065_v7, %v12336_v60  ;;  %v5333_v63 = vcombine.high %v5325_v24, %v5325_v24 }
 0x56a   : > { %v6269_v5 = vcombine.low %v6261_v8, %v6268_v59  ;;  %v13482_v1 = vrot.slane %v9718_v14, %v12336_v60  ;;  %v13485_v25 = vsel %vm8425_vm1, %v8124_v20, -inf  ;;  %v5334_v51 = vcombine.high %v5332_v28, %v5332_v28 }
 0x56b   : > { %v13487_v2 = vcombine.low %v8086_v11, %v8093_v33  ;;  %v5341_v41 = vrot.slane %v5325_v24, %v12336_v60  ;;  %v5348_v23 = vrot.slane %v5332_v28, %v12336_v60  ;;  %v5355_v30 = vrot.slane %v5333_v63, %v12336_v60 }
 0x56c   : > { %v5362_v61 = vrot.slane %v5334_v51, %v12336_v60  ;;  %v8643_v19 = vsel %vm8421_vm2, %v7949_v35, -inf  ;;  %v2802_v49 = vadd.f32 %v14067_v53, %v14066_v10  ;;  %v2794_v52 = vadd.f32 %v14069_v39, %v14068_v56 }
 0x56d   : > { %v13502_v27 = vsel %vm8421_vm2, %v6269_v5, -inf  ;;  %v5364_v42 = vcombine.high %v5348_v23, %v5348_v23  ;;  %v7952_v8 = vcombine.low %v5341_v41, %v5355_v30  ;;  %v9717_v55 = vcombine.high %v5341_v41, %v5355_v30  ;;  %v14070_v5 = vld [vmem:[#allocation35_spill] sm:$0xff] }
 0x56e   : > { %v8109_v29 = vrot.slane %v13487_v2, %v12336_v60  ;;  %v8005_v58 = vrot.slane %v5348_v23, %v12336_v60  ;;  %v3042_v26 = vadd.f32 %v13162_v47, %v2802_v49  ;;  %v3034_v15 = vadd.f32 %v13169_v37, %v2794_v52 }
 0x56f   : > { %v7974_v35 = vrot.slane %v7952_v8, %v12336_v60  ;;  %v7981_v7 = vrot.slane %v9717_v55, %v12336_v60  ;;  %v8013_v14 = vcombine.low %v5362_v61, %v5364_v42  ;;  %v9893_v24 = vadd.f32 %v13201_v44, %v13210_v18 }
 0x570   : > { %v8012_v59 = vrot.slane %v8005_v58, %v12336_v60  ;;  %v3107_v20 = vmax.f32 %v3042_v26, 0.0  ;;  %v3105_v28 = vmax.f32 %v3034_v15, 0.0  ;;  %v5366_v11 = vcombine.high %v5362_v61, %v5362_v61 }
 0x571   : > { %v7983_v33 = vcombine.low %v7974_v35, %v7981_v7  ;;  %v8023_v63 = vrot.slane %v8013_v14, %v12336_v60  ;;  %v2903_v47 = vadd.f32 %v9893_v24, %v14070_v5  ;;  %v3749_v37 = vcombine.high %v13447_v54, %v13447_v54 }
 0x572   : > { %v5465_v51 = vcombine.high %v3107_v20, %v3107_v20  ;;  %v5472_v41 = vrot.slane %v3107_v20, %v12336_v60  ;;  %v5367_v23 = vcombine.high %v3105_v28, %v3105_v28  ;;  %v6280_v18 = vrot.slane %v13456_v31, %v12336_v60 }
 0x573   : > { %v7997_v30 = vrot.slane %v7983_v33, %v12336_v60  ;;  %v8646_v10 = vsel %vm8425_vm1, %v8012_v59, -inf  ;;  %v5374_v61 = vrot.slane %v3105_v28, %v12336_v60  ;;  %v3072_v53 = vmax.f32 %v2903_v47, 0.0 }
 0x574   : > { %v5479_v49 = vrot.slane %v5465_v51, %v12336_v60  ;;  %v5480_v56 = vcombine.high %v5472_v41, %v5472_v41  ;;  %v5381_v39 = vrot.slane %v5367_v23, %v12336_v60  ;;  %v13528_v52 = vadd.f32 %v13201_v44, %v13215_v21 }
 0x575   : > { %v7998_v42 = vcombine.low %v13399_v40, %v7997_v30  ;;  %v5488_v8 = vrot.slane %v5472_v41, %v12336_v60  ;;  %v5382_v55 = vcombine.high %v5374_v61, %v5374_v61  ;;  %v5390_v58 = vrot.slane %v5374_v61, %v12336_v60 }
 0x576   : > { %v5481_v26 = vcombine.high %v5479_v49, %v5479_v49  ;;  %v5495_v15 = vrot.slane %v5479_v49, %v12336_v60  ;;  %v5502_v35 = vrot.slane %v5480_v56, %v12336_v60  ;;  %v5383_v7 = vcombine.high %v5381_v39, %v5381_v39 }
 0x577   : > { %v8644_v14 = vsel %vm8421_vm2, %v7998_v42, -inf  ;;  %v5397_v24 = vrot.slane %v5381_v39, %v12336_v60  ;;  %v5404_v44 = vrot.slane %v5382_v55, %v12336_v60  ;;  %v5412_v21 = vcombine.high %v5390_v58, %v5390_v58 }
 0x578   : > { %v8645_v59 = vmax.f32 %v8643_v19, %v8644_v14  ;;  %v5509_v40 = vrot.slane %v5481_v26, %v12336_v60  ;;  %v8126_v20 = vcombine.low %v5488_v8, %v5502_v35  ;;  %v9719_v28 = vcombine.high %v5488_v8, %v5502_v35 }
 0x579   : > { %v5411_v33 = vrot.slane %v5383_v7, %v12336_v60  ;;  %v5413_v5 = vcombine.high %v5397_v24, %v5397_v24  ;;  %v5414_v47 = vcombine.high %v5404_v44, %v5404_v44  ;;  %v8014_v51 = vcombine.low %v5366_v11, %v5390_v58 }
 0x57a   : > { %v8647_v41 = vmax.f32 %v8645_v59, %v8646_v10  ;;  %v8128_v23 = vcombine.low %v5495_v15, %v5509_v40  ;;  %v8142_v30 = vrot.slane %v8126_v20, %v12336_v60  ;;  %v3750_v61 = vcombine.high %v3072_v53, %v3072_v53 }
 0x57b   : > { %v8149_v49 = vrot.slane %v9719_v28, %v12336_v60  ;;  %v5415_v56 = vcombine.high %v5411_v33, %v5411_v33  ;;  %v8015_v39 = vcombine.low %v5404_v44, %v5412_v21  ;;  %v8016_v42 = vcombine.low %v5414_v47, %v5397_v24 }
 0x57c   : > { %v8648_v19 = vrot.slane %v8647_v41, 4  ;;  %v8156_v55 = vrot.slane %v8128_v23, %v12336_v60  ;;  %v8157_v8 = vcombine.low %v13482_v1, %v8142_v30  ;;  %v8030_v26 = vrot.slane %v8014_v51, %v12336_v60 }
 0x57d   : > { %v9720_v35 = vcombine.high %v5495_v15, %v5509_v40  ;;  %v8037_v11 = vrot.slane %v8015_v39, %v12336_v60  ;;  %v8044_v10 = vrot.slane %v8016_v42, %v12336_v60  ;;  %v8062_v58 = vcombine.low %v5411_v33, %v5413_v5 }
 0x57e   : > { %v8649_v7 = vmax.f32 %v8647_v41, %v8648_v19  ;;  %v8158_v14 = vcombine.low %v8149_v49, %v8156_v55  ;;  %v8165_v59 = vrot.slane %v8157_v8, %v12336_v60  ;;  %v8045_v20 = vcombine.low %v8023_v63, %v8030_v26 }
 0x57f   : > { %v8046_v44 = vcombine.low %v8037_v11, %v8044_v10  ;;  %v8063_v24 = vcombine.low %v5415_v56, %v13451_v62  ;;  %v8072_v21 = vrot.slane %v8062_v58, %v12336_v60  ;;  %v3757_v1 = vrot.slane %v3072_v53, %v12336_v60 }
 0x580   : > { %v8650_v28 = vrot.slane %v8649_v7, 2  ;;  %v8172_v15 = vrot.slane %v8158_v14, %v12336_v60  ;;  %v8053_v40 = vrot.slane %v8045_v20, %v12336_v60  ;;  %v3764_v47 = vrot.slane %v3750_v61, %v12336_v60  ;;  %v14071_v20 = vld [vmem:[#allocation29_spill] sm:$0xff] }
 0x581   : > { %v8060_v33 = vrot.slane %v8046_v44, %v12336_v60  ;;  %v8079_v5 = vrot.slane %v8063_v24, %v12336_v60  ;;  %v3765_v51 = vcombine.high %v3757_v1, %v3757_v1  ;;  %v3773_v63 = vrot.slane %v3757_v1, %v12336_v60 }
 0x582   : > { %v8651_v41 = vmax.f32 %v8649_v7, %v8650_v28  ;;  %v8173_v62 = vcombine.low %v8165_v59, %v8172_v15  ;;  %v13558_v23 = vrot.slane %v9720_v35, %v12336_v60  ;;  %v3766_v53 = vcombine.high %v3764_v47, %v3764_v47 }
 0x583   : > { %v8061_v30 = vcombine.low %v8053_v40, %v8060_v33  ;;  %v8094_v49 = vcombine.low %v8072_v21, %v8079_v5  ;;  %v3787_v56 = vrot.slane %v3765_v51, %v12336_v60  ;;  %v3795_v39 = vcombine.high %v3773_v63, %v3773_v63  ;;  %v14072_v40 = vld [vmem:[#allocation44_spill] sm:$0xff] }
 0x584   : > { %v8652_v42 = vrot.slane %v8651_v41, 1  ;;  %v3780_v61 = vrot.slane %v3764_v47, %v12336_v60  ;;  %v3794_v19 = vrot.slane %v3766_v53, %v12336_v60  ;;  %v6271_v55 = vcombine.low %v3749_v37, %v3773_v63  ;;  %v14073_v47 = vld [vmem:[#allocation18_spill] sm:$0xff] }
 0x585   : > { %v13567_v8 = vsel %vm8421_vm2, %v8173_v62, -inf  ;;  %v8102_v26 = vrot.slane %v8094_v49, %v12336_v60  ;;  %v3797_v35 = vcombine.high %v3787_v56, %v3787_v56  ;;  %v6272_v11 = vcombine.low %v3787_v56, %v3795_v39  ;;  %v14074_v49 = vld [vmem:[#allocation38_spill] sm:$0xff]  ;;  %v14075_v56 = vld [vmem:[#allocation32_spill] sm:$0xff] }
 0x586   : > { %v13570_v10 = vmax.f32 %v8651_v41, %v8652_v42  ;;  %v6287_v58 = vrot.slane %v6271_v55, %v12336_v60  ;;  %v6325_v7 = vrot.slane %v3794_v19, %v12336_v60  ;;  %v9686_v14 = vcombine.high %v3780_v61, %v3794_v19  ;;  %v14076_v42 = vld [vmem:[#allocation41_spill] sm:$0xff] }
 0x587   : > { %v8110_v59 = vcombine.low %v8102_v26, %v8109_v29  ;;  %v8654_v54 = vsel %vm8421_vm2, %v8061_v30, -inf  ;;  %v6273_v37 = vcombine.low %v3797_v35, %v3780_v61  ;;  %v2906_v44 = vadd.f32 %v13528_v52, %v14071_v20  ;;  %v14077_v61 = vld [vmem:[#allocation17_spill] sm:$0xff] }
 0x588   : > { %v8707_v24 = vpack.c.bf16 %v13570_v10, %v13570_v10  ;;  %v6294_v21 = vrot.slane %v6272_v11, %v12336_v60  ;;  %v6302_v1 = vcombine.low %v6280_v18, %v6287_v58  ;;  %v6332_v28 = vrot.slane %v6325_v7, %v12336_v60 }
 0x589   : > { %v8655_v2 = vsel %vm8421_vm2, %v8110_v59, -inf  ;;  %v6301_v29 = vrot.slane %v6273_v37, %v12336_v60  ;;  %v3073_v15 = vmax.f32 %v2906_v44, 0.0  ;;  %v2815_v33 = vadd.f32 %v14073_v47, %v14072_v40 }
 0x58a   : > { %v13591_v52 = vunpack.c.l.b16 %v8707_v24  ;;  %v8656_v5 = vmax.f32 %v8654_v54, %v8655_v2  ;;  %v6310_v51 = vrot.slane %v6302_v1, %v12336_v60  ;;  %v6343_v63 = vrot.slane %v9686_v14, %v12336_v60 }
 0x58b   : > { %v6303_v41 = vcombine.low %v6294_v21, %v6301_v29  ;;  %v3799_v31 = vcombine.high %v3073_v15, %v3073_v15  ;;  %v3806_v18 = vrot.slane %v3073_v15, %v12336_v60  ;;  %v3055_v62 = vadd.f32 %v13229_v46, %v2815_v33 }
 0x58c   : > { %v8658_v53 = vmax.f32 %v8656_v5, %v13485_v25  ;;  %v8481_v30 = vsel %vm8425_vm1, %v6332_v28, -inf  ;;  %v2807_v39 = vadd.f32 %v14075_v56, %v14074_v49  ;;  %v2810_v19 = vadd.f32 %v14077_v61, %v14076_v42 }
 0x58d   : > { %v6317_v55 = vrot.slane %v6303_v41, %v12336_v60  ;;  %v3813_v26 = vrot.slane %v3799_v31, %v12336_v60  ;;  %v3814_v35 = vcombine.high %v3806_v18, %v3806_v18  ;;  %v3822_v11 = vrot.slane %v3806_v18, %v12336_v60 }
 0x58e   : > { %v8659_v58 = vrot.slane %v8658_v53, 4  ;;  %v3110_v7 = vmax.f32 %v3055_v62, 0.0  ;;  %v3047_v46 = vadd.f32 %v13246_v17, %v2807_v39  ;;  %v3050_v25 = vadd.f32 %v13346_v16, %v2810_v19 }
 0x58f   : > { %v6318_v14 = vcombine.low %v6310_v51, %v6317_v55  ;;  %v3815_v59 = vcombine.high %v3813_v26, %v3813_v26  ;;  %v3829_v54 = vrot.slane %v3813_v26, %v12336_v60  ;;  %v3836_v37 = vrot.slane %v3814_v35, %v12336_v60  ;;  %v14078_v55 = vld [vmem:[#allocation37_spill] sm:$0xff] }
 0x590   : > { %v8660_v20 = vmax.f32 %v8658_v53, %v8659_v58  ;;  %v5612_v44 = vcombine.high %v3110_v7, %v3110_v7  ;;  %v5619_v24 = vrot.slane %v3110_v7, %v12336_v60  ;;  %v3108_v21 = vmax.f32 %v3047_v46, 0.0 }
 0x591   : > { %v8479_v1 = vsel %vm8421_vm2, %v6318_v14, -inf  ;;  %v3843_v28 = vrot.slane %v3815_v59, %v12336_v60  ;;  %v6334_v2 = vcombine.low %v3822_v11, %v3836_v37  ;;  %v9687_v29 = vcombine.high %v3822_v11, %v3836_v37 }
 0x592   : > { %v8661_v17 = vrot.slane %v8660_v20, 2  ;;  %v8480_v16 = vmax.f32 %v13502_v27, %v8479_v1  ;;  %v5626_v15 = vrot.slane %v5612_v44, %v12336_v60  ;;  %v5627_v40 = vcombine.high %v5619_v24, %v5619_v24 }
 0x593   : > { %v6336_v47 = vcombine.low %v3829_v54, %v3843_v28  ;;  %v6350_v33 = vrot.slane %v6334_v2, %v12336_v60  ;;  %v6357_v5 = vrot.slane %v9687_v29, %v12336_v60  ;;  %v9688_v51 = vcombine.high %v3829_v54, %v3843_v28  ;;  %v14080_v2 = vld [vmem:[#allocation40_spill] sm:$0xff] }
 0x594   : > { %v8662_v41 = vmax.f32 %v8660_v20, %v8661_v17  ;;  %v13617_v31 = vmax.f32 %v8480_v16, %v8481_v30  ;;  %v5628_v18 = vcombine.high %v5626_v15, %v5626_v15  ;;  %v13620_v62 = vrot.slane %v5619_v24, %v12336_v60 }
 0x595   : > { %v6364_v53 = vrot.slane %v6336_v47, %v12336_v60  ;;  %v6365_v49 = vcombine.low %v6343_v63, %v6350_v33  ;;  %v6392_v27 = vrot.slane %v9688_v51, %v12336_v60  ;;  %v5642_v56 = vrot.slane %v5626_v15, %v12336_v60 }
 0x596   : > { %v8663_v39 = vrot.slane %v8662_v41, 1  ;;  %v5649_v42 = vrot.slane %v5627_v40, %v12336_v60  ;;  %v5656_v61 = vrot.slane %v5628_v18, %v12336_v60  ;;  %v5657_v30 = vcombine.high %v13620_v62, %v13620_v62 }
 0x597   : > { %v6366_v19 = vcombine.low %v6357_v5, %v6364_v53  ;;  %v6414_v26 = vcombine.low %v6392_v27, %v14078_v55  ;;  %v5658_v35 = vcombine.high %v5642_v56, %v5642_v56  ;;  %v14079_v11 = vrot.slane %v13016_v9, 1 }
 0x598   : > { %v6373_v58 = vrot.slane %v6365_v49, %v12336_v60  ;;  %v5659_v7 = vcombine.high %v5649_v42, %v5649_v42  ;;  %v5660_v46 = vcombine.high %v5656_v61, %v5656_v61  ;;  %v13636_v14 = vcombine.low %v5649_v42, %v5657_v30 }
 0x599   : > { %v13633_v63 = vmax.f32 %v13016_v9, %v14079_v11  ;;  %v6380_v59 = vrot.slane %v6366_v19, %v12336_v60  ;;  %v13640_v54 = vrot.slane %v6414_v26, %v12336_v60  ;;  %v8289_v37 = vcombine.low %v5656_v61, %v5658_v35 }
 0x59a   : > { %v5514_v20 = vcombine.high %v3108_v21, %v3108_v21  ;;  %v13642_v44 = vmax.f32 %v8662_v41, %v8663_v39  ;;  %v8288_v24 = vcombine.low %v5659_v7, %v5642_v56  ;;  %v13645_v1 = vrot.slane %v5660_v46, %v12336_v60 }
 0x59b   : > { %v5521_v9 = vrot.slane %v3108_v21, %v12336_v60  ;;  %v6381_v28 = vcombine.low %v6373_v58, %v6380_v59  ;;  %v6430_v29 = vcombine.low %v13640_v54, %v14080_v2  ;;  %v8317_v17 = vrot.slane %v8289_v37, %v12336_v60 }
 0x59c   : > { %v5528_v16 = vrot.slane %v5514_v20, %v12336_v60  ;;  %v8303_v15 = vrot.slane %v13636_v14, %v12336_v60  ;;  %v8310_v40 = vrot.slane %v8288_v24, %v12336_v60  ;;  %v8348_v47 = vrot.slane %v13645_v1, %v12336_v60 }
 0x59d   : > { %v5529_v33 = vcombine.high %v5521_v9, %v5521_v9  ;;  %v5537_v21 = vrot.slane %v5521_v9, %v12336_v60  ;;  %v3109_v41 = vmax.f32 %v3050_v25, 0.0  ;;  %v13660_v18 = vsel %vm8421_vm2, %v6381_v28, -inf }
 0x59e   : > { %v5530_v5 = vcombine.high %v5528_v16, %v5528_v16  ;;  %v5544_v51 = vrot.slane %v5528_v16, %v12336_v60  ;;  %v13662_v53 = vcombine.low %v8310_v40, %v8317_v17  ;;  %v8454_v27 = vrot.slane %v13183_v34, 1 }
 0x59f   : > { %v5551_v49 = vrot.slane %v5529_v33, %v12336_v60  ;;  %v5563_v42 = vcombine.high %v3109_v41, %v3109_v41  ;;  %v5570_v61 = vrot.slane %v3109_v41, %v12336_v60 }
 0x5a0   : > { %v5558_v56 = vrot.slane %v5530_v5, %v12336_v60  ;;  %v5560_v39 = vcombine.high %v5544_v51, %v5544_v51  ;;  %v8333_v30 = vrot.slane %v13662_v53, %v12336_v60  ;;  %v13671_v55 = vmax.f32 %v13183_v34, %v8454_v27 }
 0x5a1   : > { %v8175_v19 = vcombine.low %v5537_v21, %v5551_v49  ;;  %v9721_v25 = vcombine.high %v5537_v21, %v5551_v49  ;;  %v5577_v58 = vrot.slane %v5563_v42, %v12336_v60  ;;  %v5578_v59 = vcombine.high %v5570_v61, %v5570_v61 }
 0x5a2   : > { %v8177_v26 = vcombine.low %v5544_v51, %v5558_v56  ;;  %v8229_v35 = vrot.slane %v5560_v39, %v12336_v60  ;;  %v5562_v11 = vcombine.high %v5558_v56, %v5558_v56  ;;  %v5586_v37 = vrot.slane %v5570_v61, %v12336_v60 }
 0x5a3   : > { %v8191_v7 = vrot.slane %v8175_v19, %v12336_v60  ;;  %v8198_v46 = vrot.slane %v9721_v25, %v12336_v60  ;;  %v5579_v9 = vcombine.high %v5577_v58, %v5577_v58  ;;  %v5593_v34 = vrot.slane %v5577_v58, %v12336_v60 }
 0x5a4   : > { %v8205_v20 = vrot.slane %v8177_v26, %v12336_v60  ;;  %v8236_v24 = vrot.slane %v8229_v35, %v12336_v60  ;;  %v5600_v17 = vrot.slane %v5578_v59, %v12336_v60  ;;  %v5608_v16 = vcombine.high %v5586_v37, %v5586_v37 }
 0x5a5   : > { %v8206_v28 = vcombine.low %v13558_v23, %v8191_v7  ;;  %v8237_v40 = vcombine.low %v5562_v11, %v5586_v37  ;;  %v5607_v21 = vrot.slane %v5579_v9, %v12336_v60  ;;  %v5609_v51 = vcombine.high %v5593_v34, %v5593_v34 }
 0x5a6   : > { %v8207_v33 = vcombine.low %v8198_v46, %v8205_v20  ;;  %v8668_v5 = vsel %vm8425_vm1, %v8236_v24, -inf  ;;  %v5610_v49 = vcombine.high %v5600_v17, %v5600_v17  ;;  %v8238_v27 = vcombine.low %v5600_v17, %v5608_v16 }
 0x5a7   : > { %v8214_v41 = vrot.slane %v8206_v28, %v12336_v60  ;;  %v8247_v56 = vrot.slane %v8237_v40, %v12336_v60  ;;  %v5611_v42 = vcombine.high %v5607_v21, %v5607_v21  ;;  %v8240_v23 = vcombine.low %v5607_v21, %v5609_v51 }
 0x5a8   : > { %v8221_v39 = vrot.slane %v8207_v33, %v12336_v60  ;;  %v8463_v61 = vrot.slane %v13333_v50, 2  ;;  %v8239_v19 = vcombine.low %v5610_v49, %v5593_v34  ;;  %v8254_v25 = vrot.slane %v8238_v27, %v12336_v60  ;;  %v14082_v27 = vld [vmem:[#allocation39_spill] sm:$0xff] }
 0x5a9   : > { %v8474_v26 = vrot.slane %v13472_v45, 2  ;;  %v8483_v35 = vrot.slane %v13617_v31, 4  ;;  %v8268_v58 = vrot.slane %v8240_v23, %v12336_v60  ;;  %v8286_v7 = vcombine.low %v5611_v42, %v13620_v62 }
 0x5aa   : > { %v8222_v11 = vcombine.low %v8214_v41, %v8221_v39  ;;  %v8464_v46 = vmax.f32 %v13333_v50, %v8463_v61  ;;  %v8261_v59 = vrot.slane %v8239_v19, %v12336_v60  ;;  %v8269_v37 = vcombine.low %v8247_v56, %v8254_v25  ;;  %v14083_v39 = vld [vmem:[#allocation43_spill] sm:$0xff]  ;;  %v14084_v61 = vld [vmem:[#allocation42_spill] sm:$0xff] }
 0x5ab   : > { %v8475_v20 = vmax.f32 %v13472_v45, %v8474_v26  ;;  %v8484_v24 = vmax.f32 %v13617_v31, %v8483_v35  ;;  %v8296_v34 = vrot.slane %v8286_v7, %v12336_v60  ;;  %v8490_v17 = vsel %vm8421_vm2, %v6430_v29, -inf  ;;  %v14081_v29 = vld [vmem:[#allocation30_spill] sm:$0xff] }
 0x5ac   : > { %v8666_v9 = vsel %vm8421_vm2, %v8222_v11, -inf  ;;  %v8465_v28 = vrot.slane %v8464_v46, 1  ;;  %v8270_v50 = vcombine.low %v8261_v59, %v8268_v58  ;;  %v8277_v16 = vrot.slane %v8269_v37, %v12336_v60 }
 0x5ad   : > { %v8667_v62 = vmax.f32 %v13567_v8, %v8666_v9  ;;  %v8476_v40 = vrot.slane %v8475_v20, 1  ;;  %v8318_v45 = vcombine.low %v8296_v34, %v8303_v15  ;;  %v8485_v33 = vrot.slane %v8484_v24, 2 }
 0x5ae   : > { %v13709_v31 = vmax.f32 %v8464_v46, %v8465_v28  ;;  %v8491_v21 = vmax.f32 %v13660_v18, %v8490_v17  ;;  %v8284_v54 = vrot.slane %v8270_v50, %v12336_v60  ;;  %v8500_v8 = vsel %vm8421_vm2, %v14081_v29, -inf }
 0x5af   : > { %v8669_v51 = vmax.f32 %v8667_v62, %v8668_v5  ;;  %v8477_v2 = vmax.f32 %v8475_v20, %v8476_v40  ;;  %v8326_v41 = vrot.slane %v8318_v45, %v12336_v60  ;;  %v8486_v49 = vmax.f32 %v8484_v24, %v8485_v33 }
 0x5b0   : > { %v8493_v56 = vmax.f32 %v8491_v21, %v14082_v27  ;;  %v8501_v14 = vsel %vm8421_vm2, %v14083_v39, -inf  ;;  %v8285_v42 = vcombine.low %v8277_v16, %v8284_v54  ;;  %v14085_v18 = vrot.slane %v14084_v61, %v12336_v60 }
 0x5b1   : > { %v8670_v15 = vrot.slane %v8669_v51, 4  ;;  %v8502_v23 = vmax.f32 %v8500_v8, %v8501_v14  ;;  %v8334_v19 = vcombine.low %v8326_v41, %v8333_v30  ;;  %v8487_v25 = vrot.slane %v8486_v49, 1 }
 0x5b2   : > { %v8503_v5 = vsel %vm8425_vm1, %v14085_v18, -inf  ;;  %v8494_v26 = vrot.slane %v8493_v56, 4  ;;  %v8688_v35 = vpack.c.bf16 %v13633_v63, %v13633_v63  ;;  %v8679_v11 = vsel %vm8425_vm1, %v8348_v47, -inf }
 0x5b3   : > { %v8671_v58 = vmax.f32 %v8669_v51, %v8670_v15  ;;  %v8504_v7 = vmax.f32 %v8502_v23, %v8503_v5  ;;  %v8689_v46 = vpack.c.bf16 %v13671_v55, %v13671_v55  ;;  %v8676_v59 = vsel %vm8421_vm2, %v8285_v42, -inf }
 0x5b4   : > { %v8677_v53 = vsel %vm8421_vm2, %v8334_v19, -inf  ;;  %v8495_v30 = vmax.f32 %v8493_v56, %v8494_v26  ;;  %v8690_v37 = vpack.c.bf16 %v13709_v31, %v13709_v31  ;;  %v8691_v34 = vpack.c.bf16 %v8477_v2, %v8477_v2 }
 0x5b5   : > { %v8672_v20 = vrot.slane %v8671_v58, 2  ;;  %v8678_v24 = vmax.f32 %v8676_v59, %v8677_v53  ;;  %v8505_v9 = vrot.slane %v8504_v7, 4  ;;  %v8488_v60 = vmax.f32 %v8486_v49, %v8487_v25 }
 0x5b6   : > { %v8496_v1 = vrot.slane %v8495_v30, 2  ;;  %v13738_v47 = vunpack.c.l.b16 %v8688_v35  ;;  %v13740_v28 = vunpack.c.l.b16 %v8689_v46  ;;  %v13742_v16 = vunpack.c.l.b16 %v8690_v37  ;;  %v14088_v37 = vld [vmem:[#allocation45_spill] sm:$0xff] }
 0x5b7   : > { %v8673_v17 = vmax.f32 %v8671_v58, %v8672_v20  ;;  %v8680_v62 = vmax.f32 %v8678_v24, %v8679_v11  ;;  %v8506_v50 = vmax.f32 %v8504_v7, %v8505_v9  ;;  %v13744_v45 = vunpack.c.l.b16 %v8691_v34  ;;  %v14089_v24 = vld [vmem:[#allocation47_spill] sm:$0xff] }
 0x5b8   : > { %v8497_v40 = vmax.f32 %v8495_v30, %v8496_v1  ;;  %v8929_v49 = vsel %vm8770_vm3, %v13633_v63, %v12827_v32  ;;  %v8692_v39 = vpack.c.bf16 %v8488_v60, %v8488_v60  ;;  %v14086_v14 = vrot.slane %v12801_v0, 2 }
 0x5b9   : > { %v8674_v33 = vrot.slane %v8673_v17, 1  ;;  %v8681_v21 = vrot.slane %v8680_v62, 4  ;;  %v8507_v51 = vrot.slane %v8506_v50, 2  ;;  %v8930_v56 = vsel %vm8772_vm4, %v13671_v55, %v8929_v49 }
 0x5ba   : > { %v8498_v54 = vrot.slane %v8497_v40, 1  ;;  %v8563_v15 = vmax.f32 %v12801_v0, %v14086_v14  ;;  %v8931_v61 = vsel %vm8774_vm5, %v13709_v31, %v8930_v56  ;;  %v8575_v26 = vrot.slane %v12974_v22, 1 }
 0x5bb   : > { %v13746_v29 = vmax.f32 %v8673_v17, %v8674_v33  ;;  %v8682_v8 = vmax.f32 %v8680_v62, %v8681_v21  ;;  %v8508_v41 = vmax.f32 %v8506_v50, %v8507_v51  ;;  %v8932_v32 = vsel %vm8776_vm6, %v8477_v2, %v8931_v61  ;;  %v14091_v51 = vld [vmem:[#allocation50_spill] sm:$0xff] }
 0x5bc   : > { %v8499_v27 = vmax.f32 %v8497_v40, %v8498_v54  ;;  %v8564_v63 = vrot.slane %v8563_v15, 1  ;;  %v8933_v25 = vsel %vm8778_vm7, %v8488_v60, %v8932_v32  ;;  %v8751_v35 = vunpack.c.l.b16 %v8692_v39  ;;  %v14090_v60 = vld [vmem:[#allocation49_spill] sm:$0xff] }
 0x5bd   : > { %v8683_v42 = vrot.slane %v8682_v8, 2  ;;  %v8509_v23 = vrot.slane %v8508_v41, 1  ;;  %v8709_v18 = vpack.c.bf16 %v13746_v29, %v13746_v29  ;;  %v8582_v31 = vrot.slane %v12954_v3, 4 }
 0x5be   : > { %v8693_v5 = vpack.c.bf16 %v8499_v27, %v8499_v27  ;;  %v8934_v0 = vsel %vm8780_vm8, %v8499_v27, %v8933_v25  ;;  %v13764_v11 = vmax.f32 %v8563_v15, %v8564_v63  ;;  %v8576_v2 = vmax.f32 %v12974_v22, %v8575_v26  ;;  %v14092_v27 = vld [vmem:[#allocation48_spill] sm:$0xff] }
 0x5bf   : > { %v8684_v19 = vmax.f32 %v8682_v8, %v8683_v42  ;;  %v8510_v55 = vmax.f32 %v8508_v41, %v8509_v23  ;;  %v8583_v59 = vmax.f32 %v12954_v3, %v8582_v31  ;;  %v14087_v53 = vrot.slane %v13104_v57, 4 }
 0x5c0   : > { %v8752_v7 = vunpack.c.l.b16 %v8693_v5  ;;  %v8695_v20 = vpack.c.bf16 %v14088_v37, %v14088_v37  ;;  %v8697_v9 = vpack.c.bf16 %v14089_v24, %v14089_v24  ;;  %v8698_v1 = vpack.c.bf16 %v14090_v60, %v14090_v60 }
 0x5c1   : > { %v8685_v58 = vrot.slane %v8684_v19, 1  ;;  %v8935_v46 = vsel %vm8782_vm9, %v8510_v55, %v8934_v0  ;;  %v8594_v30 = vmax.f32 %v13104_v57, %v14087_v53  ;;  %v8694_v34 = vpack.c.bf16 %v8510_v55, %v8510_v55 }
 0x5c2   : > { %8950 = vrot.lane.b32.xlu1 %v8935_v46, %s10558_s24  ;;  %v8699_v22 = vpack.c.bf16 %v13764_v11, %v13764_v11  ;;  %v8700_v17 = vpack.c.bf16 %v8576_v2, %v8576_v2  ;;  %v8584_v62 = vrot.slane %v8583_v59, 2  ;;  %v8754_v50 = vunpack.c.l.b16 %v8695_v20 }
 0x5c3   : > { %v8595_v3 = vrot.slane %v8594_v30, 2  ;;  %v8756_v40 = vunpack.c.l.b16 %v8697_v9  ;;  %v8757_v33 = vunpack.c.l.b16 %v8698_v1  ;;  %v8771_v54 = vsel %vm8770_vm3, %v13738_v47, %v14091_v51 }
 0x5c4   : > { %v8758_v57 = vunpack.c.l.b16 %v8699_v22  ;;  %v8759_v21 = vunpack.c.l.b16 %v8700_v17  ;;  %v8585_v8 = vmax.f32 %v8583_v59, %v8584_v62  ;;  %v8773_v49 = vsel %vm8772_vm4, %v13740_v28, %v8771_v54 }
 0x5c5   : > { %v8596_v41 = vmax.f32 %v8594_v30, %v8595_v3  ;;  %v8784_v56 = vsel %vm8770_vm3, %v14092_v27, %v8754_v50  ;;  %v8775_v39 = vsel %vm8774_vm5, %v13742_v16, %v8773_v49  ;;  %v13792_v15 = vmax.f32 %v8684_v19, %v8685_v58 }
 0x5c6   : > { %v8785_v14 = vsel %vm8772_vm4, %v8756_v40, %v8784_v56  ;;  %v8708_v42 = vpack.c.bf16 %v13642_v44, %v13642_v44  ;;  %v8586_v23 = vrot.slane %v8585_v8, 1  ;;  %v8777_v61 = vsel %vm8776_vm6, %v13744_v45, %v8775_v39 }
 0x5c7   : > { %v8597_v47 = vrot.slane %v8596_v41, 1  ;;  %v8786_v28 = vsel %vm8774_vm5, %v8757_v33, %v8785_v14  ;;  %v8753_v5 = vunpack.c.l.b16 %v8694_v34  ;;  %v8779_v32 = vsel %vm8778_vm7, %v8751_v35, %v8777_v61 }
 0x5c8   : > { %v8787_v63 = vsel %vm8776_vm6, %v8758_v57, %v8786_v28  ;;  %v8710_v16 = vpack.c.bf16 %v13792_v15, %v13792_v15  ;;  %v8587_v19 = vmax.f32 %v8585_v8, %v8586_v23  ;;  %v8781_v25 = vsel %vm8780_vm8, %v8752_v7, %v8779_v32  ;;  %v14093_v7 = vld [vmem:[#allocation46_spill] sm:$0xff]  ;;  %v9722_v57 = vld [vmem:[#allocation10] ss:$0 sm:$0xff] }
 0x5c9   : > { %v8598_v55 = vmax.f32 %v8596_v41, %v8597_v47  ;;  %v8788_v26 = vsel %vm8778_vm7, %v8759_v21, %v8787_v63  ;;  %v8783_v0 = vsel %vm8782_vm9, %v8753_v5, %v8781_v25  ;;  %v8767_v31 = vunpack.c.l.b16 %v8708_v42 }
 0x5ca   : > { %v8791_v45 = vsel %vm8770_vm3, %v13330_v36, %v13256_v12  ;;  %v8701_v58 = vpack.c.bf16 %v8587_v19, %v8587_v19  ;;  %v8768_v46 = vunpack.c.l.b16 %v8709_v18  ;;  %v8769_v53 = vunpack.c.l.b16 %v8710_v16 }
 0x5cb   : > { %v8702_v35 = vpack.c.bf16 %v8598_v55, %v8598_v55  ;;  %v8792_v59 = vsel %vm8772_vm4, %v13453_v13, %v8791_v45  ;;  %v8936_v20 = vsel %vm8770_vm3, %v14093_v7, %v14088_v37 }
 0x5cc   : > { %v8793_v30 = vsel %vm8774_vm5, %v13477_v43, %v8792_v59  ;;  %v8760_v9 = vunpack.c.l.b16 %v8701_v58  ;;  %v8937_v12 = vsel %vm8772_vm4, %v14089_v24, %v8936_v20 }
 0x5cd   : > { %v8761_v34 = vunpack.c.l.b16 %v8702_v35  ;;  %v8794_v1 = vsel %vm8776_vm6, %v13591_v52, %v8793_v30  ;;  %v8938_v13 = vsel %vm8774_vm5, %v14090_v60, %v8937_v12 }
 0x5ce   : > { %v8795_v36 = vsel %vm8778_vm7, %v8767_v31, %v8794_v1  ;;  %v8789_v18 = vsel %vm8780_vm8, %v8760_v9, %v8788_v26  ;;  %v8939_v37 = vsel %vm8776_vm6, %v13764_v11, %v8938_v13  ;;  %v8943_v11 = vsel %vm8770_vm3, %v13307_v4, %v13231_v38 }
 0x5cf   : > { %v8796_v43 = vsel %vm8780_vm8, %v8768_v46, %v8795_v36  ;;  %v8790_v22 = vsel %vm8782_vm9, %v8761_v34, %v8789_v18  ;;  %v8940_v52 = vsel %vm8778_vm7, %v8576_v2, %v8939_v37  ;;  %v8944_v60 = vsel %vm8772_vm4, %v13418_v48, %v8943_v11 }
 0x5d0   : > { %v8797_v17 = vsel %vm8782_vm9, %v8769_v53, %v8796_v43  ;;  %v8798_v62 = vpack.c.b16 %v8790_v22, %v8783_v0  ;;  %v8941_v3 = vsel %vm8780_vm8, %v8587_v19, %v8940_v52  ;;  %v8945_v2 = vsel %vm8774_vm5, %v13464_v6, %v8944_v60 }
 0x5d1   : > { %v8799_v24 = vpack.c.b16 %v8797_v17, %v8797_v17  ;;  %v8942_v50 = vsel %vm8782_vm9, %v8598_v55, %v8941_v3  ;;  %v8946_v40 = vsel %vm8776_vm6, %v13570_v10, %v8945_v2 }
 0x5d2   : > { %9845 = vmatprep.mubr.msk.bf16.mxu1 %vm8421_vm2, %v8798_v62  ;;  %v8947_v33 = vsel %vm8778_vm7, %v13642_v44, %v8946_v40 }
 0x5d3   : > { %9846 = vmatmul.mubr.msk.bf16.vlgmr.msra.gmra.mrb[128].mxu1 %vm8421_vm2, %v8799_v24  ;;  %v8948_v6 = vsel %vm8780_vm8, %v13746_v29, %v8947_v33 }
 0x5d4   : > { %v8949_v10 = vsel %vm8782_vm9, %v13792_v15, %v8948_v6 }
 0x634   : > { %v8951_v28 = vpop.permute.xlu1 %8950 }
 0x6a6   : > { %v9847_v21 = vpop.f32.mrb[128].mxu1 }
 0x6a7   : > { %v8861_v51 = vadd.f32 %v9847_v21, %v9722_v57  ;;  %v8852_v54 = vpop.f32.mrb[129].mxu1 }
 0x6a8   : > { %v9848_v8 = vpop.f32.mrb[130].mxu1  ;;  %v8853_v49 = vadd.f32 %v9722_v57, %v8852_v54 }
 0x6a9   : > { %v8868_v41 = vmax.f32 %v8861_v51, 0.0  ;;  %v8855_v38 = vpop.f32.mrb[131].mxu1  ;;  %v9729_v56 = vmul.f32 -1.442695, %v8861_v51 }
 0x6aa   : > { %v8856_v4 = vadd.f32 %v9722_v57, %v8855_v38  ;;  %v8866_v27 = vmax.f32 %v8853_v49, 0.0  ;;  %v9727_v44 = vmul.f32 -1.442695, %v8853_v49 }
 0x6ab   : > { %8894 = vrot.lane.b32.xlu0 %v8868_v41, %s10558_s24 }
 0x6ac   : > { %v8867_v48 = vmax.f32 %v8856_v4, 0.0  ;;  %10252 = vpow2.f32 %v9727_v44  ;;  %v9728_v39 = vmul.f32 -1.442695, %v8856_v4 }
 0x6ad   : > { %10254 = vpow2.f32 %v9729_v56 }
 0x6ae   : > { %8892 = vrot.lane.b32.xlu1 %v8867_v48, %s10558_s24  ;;  %10256 = vpow2.f32 %v9728_v39 }
 0x6af   : > { %8890 = vrot.lane.b32.xlu0 %v8866_v27, %s10558_s24 }
 0x6b2   : > { %8954 = vrot.lane.b32.xlu1 %v8949_v10, %s10558_s24 }
 0x6b3   : > { %8952 = vrot.lane.b32.xlu0 %v8942_v50, %s10558_s24 }
 0x6b6   : > { %v10253_v14 = vpop.eup %10252 }
 0x6b7   : > { %v8878_v42 = vadd.f32 1.0, %v10253_v14  ;;  %v10255_v23 = vpop.eup %10254 }
 0x6b8   : > { %v10257_v47 = vpop.eup %10256  ;;  %v8880_v61 = vadd.f32 1.0, %v10255_v23 }
 0x6b9   : > { %10258 = vrcp.f32 %v8878_v42  ;;  %v8879_v29 = vadd.f32 1.0, %v10257_v47 }
 0x6ba   : > { %10260 = vrcp.f32 %v8880_v61 }
 0x6bb   : > { %10262 = vrcp.f32 %v8879_v29 }
 0x6c3   : > { %v10259_v15 = vpop.eup %10258 }
 0x6c4   : > { %v8902_v32 = vsub.f32 1.0, %v10259_v15  ;;  %v10261_v63 = vpop.eup %10260 }
 0x6c5   : > { %v10263_v19 = vpop.eup %10262  ;;  %v8904_v0 = vsub.f32 1.0, %v10261_v63 }
 0x6c6   : > { %v8959_v25 = vmul.f32 %v8951_v28, %v8902_v32  ;;  %v8903_v58 = vsub.f32 1.0, %v10263_v19 }
 0x71d   : > { %v8895_v5 = vpop.permute.xlu0 %8894 }
 0x71e   : > { %v8901_v35 = vmul.f32 %v10261_v63, %v8895_v5 }
 0x720   : > { %v8893_v16 = vpop.permute.xlu1 %8892 }
 0x721   : > { %v8891_v55 = vpop.permute.xlu0 %8890  ;;  %v8900_v53 = vmul.f32 %v10263_v19, %v8893_v16 }
 0x722   : > { %v8899_v26 = vmul.f32 %v10259_v15, %v8891_v55 }
 0x724   : > { %v8962_v31 = vadd.f32 %v8959_v25, %v8899_v26  ;;  %v8955_v45 = vpop.permute.xlu1 %8954 }
 0x725   : > { %v8961_v46 = vmul.f32 %v8955_v45, %v8904_v0  ;;  %v8953_v59 = vpop.permute.xlu0 %8952 }
 0x726   : > { %v8960_v30 = vmul.f32 %v8953_v59, %v8903_v58  ;;  %8968 = vrot.lane.b32.xlu0 %v8962_v31, %s10559_s26 }
 0x727   : > { %v8964_v7 = vadd.f32 %v8961_v46, %v8901_v35 }
 0x728   : > { %v8963_v20 = vadd.f32 %v8960_v30, %v8900_v53 }
 0x72a   : > { %8972 = vrot.lane.b32.xlu0 %v8964_v7, %s10559_s26  ;;  %8970 = vrot.lane.b32.xlu1 %v8963_v20, %s10559_s26 }
 0x798   : > { %v8969_v9 = vpop.permute.xlu0 %8968 }
 0x799   : > { %8977 = vst.msk [vmem:[%s296_s12] sm:$0xff] %vm8421_vm2, %v8969_v9 }
 0x79c   : > { %v8971_v34 = vpop.permute.xlu1 %8970  ;;  %v8973_v1 = vpop.permute.xlu0 %8972 }
 0x79d   : > { %8978 = vst.msk [vmem:[%s296_s12 + $0x8] sm:$0xff] %vm8421_vm2, %v8971_v34  ;;  %8979 = vst.msk [vmem:[%s296_s12 + $0x10] sm:$0xff] %vm8421_vm2, %v8973_v1 }
 0x79e   : > { %10479 = shalt.err (!%p10476_p13)
}
 0x79f   : > { %s10480_s17 = scalar_lea.hbm %s13862_s11, 384  ;;  %s10484_s26 = scalar_lea.hbm %s13913_s5, 768 }
 0x7a0   : > { %p10481_p9 = scmp.ne.s32.totalorder %s13862_s11, %s10480_s17  ;;  %p10485_p6 = scmp.lt.u32.totalorder %s13862_s11, %s13913_s5 }
 0x7a1   : > { %p10486_p4 = scmp.lt.u32.totalorder %s10484_s26, %s10480_s17  ;;  %p10488_p3 = scmp.lt.u32.totalorder %s10480_s17, %s13862_s11 }
 0x7a2   : > { %p10482_p0 = pnand %p10481_p9, %p10752_p10 }
 0x7a3   : > { %p10487_p8 = por %p10486_p4, %p10485_p6 }
 0x7a4   : > { %p10483_p11 = pneg %p10482_p0 }
 0x7a5   : > { %p10489_p5 = por %p10488_p3, %p10487_p8 }
 0x7a7   : > { %p10490_p7 = pnand %p10489_p5, %p10483_p11 }
 0x7a9   : > { %10493 = shalt.err (!%p10490_p7)
}
 0x7aa   : > { %s10561_s15 = smov 128   ;;  %s10562_s30 = smov 8  }
 0x7ab   : > { %10016 = dma.vmem_to_hbm [thread:$0]  (%p10752_p10), %s13856_s8, 384, %s13862_s11, %s8981_s22, %s10561_s15, %s10561_s15, %s10562_s30  }
 0x7ac PF: > { %s9009_s7 = sand.u32 1, %s10528_s18   ;;  %p14094_p12 = scmp.ne.s32.totalorder %s13944_s25, 0 }
 0x7ad   : > { %p14095_p2 = scmp.ge.s32.totalorder %s10540_s21, 2  ;;  %s9010_s13 = scalar_lea.sflag [#allocation4], %s9009_s7 }
 0x7af   : > { %p10036_p1 = pnand %p14095_p2, %p14094_p12 }
 0x7b1   : > { %10523 = dma.done.wait (!%p10036_p1), %s9010_s13, 384  }
 0x7b2   : > { %10525 = vsyncadd (!%p10036_p1), %s9010_s13, 4294966912  ;;  %p20_p13 = scmp.ge.s32.totalorder %s10742_s14, 4   ;;  %s14096_s18 = smov %s10532_s19 }
 0x7b3   : > { %s14097_s19 = smov %s10536_s20  ;;  %s14098_s20 = smov %s10758_s28 }
 0x7b4   : > { %s14099_s21 = smov %s10742_s14  ;;  %22 = sbr.rel (!%p20_p13) target bundleno = 7 (0x7), region = 101 }
 0x7bb   :  { %9015 = vsyncpa [#allocation3], 1 }
 0x7bc   :  { %9017 = vsyncpa [#allocation3 + $0x1], 1 }
 0x7bd   :  { %9018 = vsyncpa [#allocation6], 1 }
 0x7be   :  { %9019 = vsyncpa [#allocation9], 1 }
 0x7bf   :  { %9020 = vsyncpa [#allocation4], 1 }
 0x7c0   :  { %9022 = vsyncpa [#allocation4 + $0x1], 1 }

</bundles_post_ra>
